<compile_context>
chip_gen: v7x
topology: tpu7x:2x2x1
jax: 0.10.0
libtpu: 0.0.40
codegen_flags: <defaults>
</compile_context>

<pallas_src>
import functools

import numpy as np
import jax
import jax.numpy as jnp
from jax.experimental import pallas as pl
from jax.experimental.pallas import tpu as pltpu


_PARAM_NAMES = (
    "n1_w", "n1_b",
    "p_w1", "p_b1", "p_lnw", "p_lnb", "p_w2", "p_b2",
    "n2_w", "n2_b",
    "c_w1", "c_b1", "c_lnw", "c_lnb", "c_w2", "c_b2",
)

_INV_SQRT2 = 0.7071067811865476


def _round_up(x, m):
    return ((x + m - 1) // m) * m


def _layernorm(x, w, b, true_n, mask=None, eps=1e-5):
    """Two-pass LayerNorm over a (possibly zero-padded) last dim.

    x: (M, Dp) with padded columns exactly zero; w/b: (1, Dp), zero in padded
    columns; true_n: real feature count; mask: (1, Dp) of 1/0 over real columns
    (None when Dp == true_n).
    """
    inv_n = 1.0 / true_n
    mu = jnp.sum(x, axis=-1, keepdims=True) * inv_n     # pads are zero -> exact mean
    d = x - mu
    if mask is not None:
        d = d * mask                                    # keep pads out of the variance
    var = jnp.sum(d * d, axis=-1, keepdims=True) * inv_n
    inv = jax.lax.rsqrt(var + eps)
    return d * inv * w + b


def _gelu(x):
    # exact (erf) GELU, same as torch.nn.GELU() default
    return 0.5 * x * (1.0 + jax.lax.erf(x * _INV_SQRT2))


def _transpose_last2(x3):
    """(TB, A, Bd) -> (TB*Bd, A) via a single batched minor-dim transpose."""
    TB, A, Bd = x3.shape
    if TB == 1:
        return x3.reshape(A, Bd).T
    return jnp.swapaxes(x3, 1, 2).reshape(TB * Bd, A)


def mixer_kernel(x_ref,
                 n1w_ref, n1b_ref,
                 pw1_ref, pb1_ref, plnw_ref, plnb_ref, pw2_ref, pb2_ref,
                 n2w_ref, n2b_ref,
                 cw1_ref, cb1_ref, clnw_ref, clnb_ref, cw2_ref, cb2_ref,
                 out_ref, *, true_c, true_h, resident):
    layer = pl.program_id(1)

    def rd(ref):
        # resident: ref holds all L layers -> dynamic-index the layer axis.
        # per-layer blocking: ref holds exactly this layer's (1, ...) block.
        return ref[layer] if resident else ref[0]

    # Load the carry into the VMEM-resident output block at the first layer only;
    # it then stays resident across the whole layer axis (writeback only happens
    # when the batch block changes).
    @pl.when(layer == 0)
    def _():
        out_ref[...] = x_ref[...]

    act3 = out_ref[...]                                   # (TB, Pp, Cp)
    TB, Pp, Cp = act3.shape
    Hp = pw1_ref.shape[-1]

    ch_mask = None
    if Cp > true_c:
        ch_mask = (jax.lax.broadcasted_iota(jnp.int32, (1, Cp), 1)
                   < true_c).astype(jnp.float32)
    h_mask = None
    if Hp > true_h:
        h_mask = (jax.lax.broadcasted_iota(jnp.int32, (1, Hp), 1)
                  < true_h).astype(jnp.float32)

    def mm(a, w):
        # bf16 path: weights arrive as bf16, cast the activation side too;
        # accumulation stays f32 on the MXU. No-op cast for the f32 path.
        return jnp.dot(a.astype(w.dtype), w, preferred_element_type=jnp.float32)

    inp = act3.reshape(TB * Pp, Cp)                       # fold batch into matmul M

    # ---- norm_1 over channel ----
    xn = _layernorm(inp, rd(n1w_ref), rd(n1b_ref), true_c, ch_mask)

    # ---- patch MLP (mixes along the patch axis), M = TB*Cp ----
    xt = _transpose_last2(xn.reshape(TB, Pp, Cp))                      # (TB*Cp, Pp)
    h = mm(xt, rd(pw1_ref)) + rd(pb1_ref)                              # (TB*Cp, Hp)
    h = _layernorm(_gelu(h), rd(plnw_ref), rd(plnb_ref), true_h, h_mask)
    y = mm(h, rd(pw2_ref)) + rd(pb2_ref)                               # (TB*Cp, Pp)
    yt = _transpose_last2(y.reshape(TB, Cp, Pp))                       # (TB*Pp, Cp)
    if ch_mask is not None:
        yt = yt * ch_mask           # keep padded channel columns exactly zero
    x2 = yt + inp                                                      # residual #1

    # ---- norm_2 + channel MLP, M = TB*Pp ----
    z = _layernorm(x2, rd(n2w_ref), rd(n2b_ref), true_c, ch_mask)
    h2 = mm(z, rd(cw1_ref)) + rd(cb1_ref)                              # (TB*Pp, Hp)
    h2 = _layernorm(_gelu(h2), rd(clnw_ref), rd(clnb_ref), true_h, h_mask)
    y2 = mm(h2, rd(cw2_ref)) + rd(cb2_ref)                             # (TB*Pp, Cp)

    # residual #2 (inside mixer) + outer stacked residual "+ x"
    out_ref[...] = (y2 + x2 + inp).reshape(TB, Pp, Cp)


def stacked_residual_mixer(x, layer_params, *, batch_block=None, use_bf16=False,
                           pad_to=128):
    """x: (B, P, C) float32; layer_params: list of dicts with keys _PARAM_NAMES."""
    B, P, C = x.shape
    L = len(layer_params)
    H = layer_params[0]["p_w1"].shape[1]
    assert layer_params[0]["p_w1"].shape[0] == P
    assert layer_params[0]["c_w1"].shape[0] == C

    Pp = _round_up(P, pad_to)
    Cp = _round_up(C, pad_to)
    Hp = _round_up(H, pad_to)

    # Stack per-layer params along a leading L axis and zero-pad feature dims.
    pad_tgt = {
        "n1_w": (1, Cp), "n1_b": (1, Cp), "n2_w": (1, Cp), "n2_b": (1, Cp),
        "p_w1": (Pp, Hp), "p_b1": (1, Hp), "p_lnw": (1, Hp), "p_lnb": (1, Hp),
        "p_w2": (Hp, Pp), "p_b2": (1, Pp),
        "c_w1": (Cp, Hp), "c_b1": (1, Hp), "c_lnw": (1, Hp), "c_lnb": (1, Hp),
        "c_w2": (Hp, Cp), "c_b2": (1, Cp),
    }
    mat_names = ("p_w1", "p_w2", "c_w1", "c_w2")
    stacked = []
    for name in _PARAM_NAMES:
        a = jnp.stack([p[name] for p in layer_params], axis=0)        # (L, s0, s1)
        t0, t1 = pad_tgt[name]
        a = jnp.pad(a, ((0, 0), (0, t0 - a.shape[1]), (0, t1 - a.shape[2])))
        if use_bf16 and name in mat_names:
            a = a.astype(jnp.bfloat16)
        stacked.append(a)

    # ---- generation-aware VMEM budget (128 MiB v5e/v6e, 64 MiB v7x) ----
    vmem_cap = 64 * 1024 * 1024
    try:
        vmem_cap = int(getattr(pltpu.get_tpu_info(), "vmem_capacity_bytes", vmem_cap))
    except Exception:
        pass
    vmem_limit = int(min((vmem_cap * 3) // 4, 100 * 1024 * 1024))

    weight_bytes = sum(int(np.prod(a.shape)) * a.dtype.itemsize for a in stacked)
    # Keep the full weight stack VMEM-resident (fetched from HBM exactly once)
    # when it uses at most ~1/4 of the budget; otherwise per-layer blocking.
    resident = weight_bytes <= vmem_limit // 4

    # ---- batch tile: >=2 blocks so v7x megacore can shard the "parallel" axis,
    #      working set kept under the VMEM limit ----
    fixed_bytes = weight_bytes if resident else 3 * max(weight_bytes // L, 1)
    if batch_block is None:
        tb = 1
        for d in sorted((d for d in range(1, B + 1) if B % d == 0), reverse=True):
            if B >= 2 and B // d < 2:
                continue
            # rough working set: double-buffered input tile + carried output tile
            if fixed_bytes + 5 * d * Pp * Cp * 4 <= vmem_limit:
                tb = d
                break
    else:
        tb = batch_block
        assert B % tb == 0, "batch_block must divide batch"

    # ---- specs ----
    act_spec = pl.BlockSpec((tb, Pp, Cp), lambda b, l: (b, 0, 0))
    in_specs = [act_spec]
    for a in stacked:
        if resident:
            # Constant block index -> DMA'd once, stays resident across the grid.
            in_specs.append(pl.BlockSpec(a.shape, lambda b, l: (0, 0, 0)))
        else:
            in_specs.append(pl.BlockSpec((1,) + a.shape[1:],
                                         lambda b, l: (l, 0, 0),
                                         pipeline_mode=pl.Buffered(3)))
    out_spec = pl.BlockSpec((tb, Pp, Cp), lambda b, l: (b, 0, 0))

    xp = jnp.pad(x, ((0, 0), (0, Pp - P), (0, Cp - C)))

    kernel = functools.partial(mixer_kernel, true_c=C, true_h=H, resident=resident)
    fn = pl.pallas_call(
        kernel,
        out_shape=jax.ShapeDtypeStruct((B, Pp, Cp), jnp.float32),
        grid_spec=pltpu.PrefetchScalarGridSpec(
            num_scalar_prefetch=0,
            grid=(B // tb, L),                 # layer (carry) axis innermost
            in_specs=in_specs,
            out_specs=out_spec,
        ),
        compiler_params=pltpu.CompilerParams(
            dimension_semantics=("parallel", "arbitrary"),
            vmem_limit_bytes=vmem_limit,
        ),
    )
    out = fn(xp, *stacked)
    return out[:, :P, :C]


# ---------------- pure-JAX reference for validation ----------------
def _ref_layernorm(x, w, b, eps=1e-5):
    mu = jnp.mean(x, axis=-1, keepdims=True)
    var = jnp.mean((x - mu) ** 2, axis=-1, keepdims=True)
    return (x - mu) / jnp.sqrt(var + eps) * w + b


def _ref_mlp(x, w1, b1, lnw, lnb, w2, b2):
    h = x @ w1 + b1
    h = 0.5 * h * (1.0 + jax.lax.erf(h * _INV_SQRT2))
    h = _ref_layernorm(h, lnw, lnb)
    return h @ w2 + b2


def reference(x, layer_params):
    for p in layer_params:
        inp = x
        y = _ref_layernorm(inp, p["n1_w"][0], p["n1_b"][0])
        y = jnp.swapaxes(y, -2, -1)
        y = _ref_mlp(y, p["p_w1"], p["p_b1"][0], p["p_lnw"][0], p["p_lnb"][0],
                     p["p_w2"], p["p_b2"][0])
        y = jnp.swapaxes(y, -2, -1)
        y = y + inp
        patch_x = y
        z = _ref_layernorm(y, p["n2_w"][0], p["n2_b"][0])
        z = _ref_mlp(z, p["c_w1"], p["c_b1"][0], p["c_lnw"][0], p["c_lnb"][0],
                     p["c_w2"], p["c_b2"][0])
        mixer_out = z + patch_x
        x = mixer_out + inp
    return x


def init_layer_params(key, patch, channel, hidden):
    ks = jax.random.split(key, 16)

    def lin(k, fan_in, fan_out):
        return (jax.random.normal(k, (fan_in, fan_out), jnp.float32)
                / np.sqrt(fan_in)).astype(jnp.float32)

    def ln_w(k, d):
        return 1.0 + 0.1 * jax.random.normal(k, (1, d), jnp.float32)

    def vec(k, d):
        return 0.1 * jax.random.normal(k, (1, d), jnp.float32)

    return {
        "n1_w": ln_w(ks[0], channel), "n1_b": vec(ks[1], channel),
        "p_w1": lin(ks[2], patch, hidden), "p_b1": vec(ks[3], hidden),
        "p_lnw": ln_w(ks[4], hidden), "p_lnb": vec(ks[5], hidden),
        "p_w2": lin(ks[6], hidden, patch), "p_b2": vec(ks[7], patch),
        "n2_w": ln_w(ks[8], channel), "n2_b": vec(ks[9], channel),
        "c_w1": lin(ks[10], channel, hidden), "c_b1": vec(ks[11], hidden),
        "c_lnw": ln_w(ks[12], hidden), "c_lnb": vec(ks[13], hidden),
        "c_w2": lin(ks[14], hidden, channel), "c_b2": vec(ks[15], channel),
    }


if __name__ == "__main__":
    B, PATCH, CHANNEL, HIDDEN, LAYERS = 2, 8, 16, 32, 2

    key = jax.random.PRNGKey(0)
    key, xk = jax.random.split(key)
    x = jax.random.normal(xk, (B, PATCH, CHANNEL), jnp.float32)

    layer_keys = jax.random.split(key, LAYERS)
    layer_params = [init_layer_params(k, PATCH, CHANNEL, HIDDEN)
                    for k in layer_keys]

    out = stacked_residual_mixer(x, layer_params)
    out = jax.block_until_ready(out)

    ref = reference(x, layer_params)
    np.testing.assert_allclose(np.asarray(out), np.asarray(ref),
                               rtol=1e-4, atol=1e-4)

    print("KERNEL_OK")
</pallas_src>

<mosaic_0001>
module attributes {stable_mosaic.version = 11 : i64} {
  func.func @mixer_kernel(%arg0: i32, %arg1: i32, %arg2: memref<1x128x128xf32, #tpu.memory_space<vmem>>, %arg3: memref<2x1x128xf32, #tpu.memory_space<vmem>>, %arg4: memref<2x1x128xf32, #tpu.memory_space<vmem>>, %arg5: memref<2x128x128xf32, #tpu.memory_space<vmem>>, %arg6: memref<2x1x128xf32, #tpu.memory_space<vmem>>, %arg7: memref<2x1x128xf32, #tpu.memory_space<vmem>>, %arg8: memref<2x1x128xf32, #tpu.memory_space<vmem>>, %arg9: memref<2x128x128xf32, #tpu.memory_space<vmem>>, %arg10: memref<2x1x128xf32, #tpu.memory_space<vmem>>, %arg11: memref<2x1x128xf32, #tpu.memory_space<vmem>>, %arg12: memref<2x1x128xf32, #tpu.memory_space<vmem>>, %arg13: memref<2x128x128xf32, #tpu.memory_space<vmem>>, %arg14: memref<2x1x128xf32, #tpu.memory_space<vmem>>, %arg15: memref<2x1x128xf32, #tpu.memory_space<vmem>>, %arg16: memref<2x1x128xf32, #tpu.memory_space<vmem>>, %arg17: memref<2x128x128xf32, #tpu.memory_space<vmem>>, %arg18: memref<2x1x128xf32, #tpu.memory_space<vmem>>, %arg19: memref<1x128x128xf32, #tpu.memory_space<vmem>>) attributes {dimension_semantics = [#tpu.dimension_semantics<parallel>, #tpu.dimension_semantics<arbitrary>], iteration_bounds = array<i64: 2, 2>, scalar_prefetch = 0 : i64, scratch_operands = 0 : i64, tpu.core_type = #tpu.core_type<tc>, window_params = [{transform_indices = @transform_0, window_bounds = array<i64: 1, 128, 128>}, {pipeline_mode = #tpu.pipeline_mode<synchronous>, transform_indices = @transform_1, window_bounds = array<i64: 2, 1, 128>}, {pipeline_mode = #tpu.pipeline_mode<synchronous>, transform_indices = @transform_2, window_bounds = array<i64: 2, 1, 128>}, {pipeline_mode = #tpu.pipeline_mode<synchronous>, transform_indices = @transform_3, window_bounds = array<i64: 2, 128, 128>}, {pipeline_mode = #tpu.pipeline_mode<synchronous>, transform_indices = @transform_4, window_bounds = array<i64: 2, 1, 128>}, {pipeline_mode = #tpu.pipeline_mode<synchronous>, transform_indices = @transform_5, window_bounds = array<i64: 2, 1, 128>}, {pipeline_mode = #tpu.pipeline_mode<synchronous>, transform_indices = @transform_6, window_bounds = array<i64: 2, 1, 128>}, {pipeline_mode = #tpu.pipeline_mode<synchronous>, transform_indices = @transform_7, window_bounds = array<i64: 2, 128, 128>}, {pipeline_mode = #tpu.pipeline_mode<synchronous>, transform_indices = @transform_8, window_bounds = array<i64: 2, 1, 128>}, {pipeline_mode = #tpu.pipeline_mode<synchronous>, transform_indices = @transform_9, window_bounds = array<i64: 2, 1, 128>}, {pipeline_mode = #tpu.pipeline_mode<synchronous>, transform_indices = @transform_10, window_bounds = array<i64: 2, 1, 128>}, {pipeline_mode = #tpu.pipeline_mode<synchronous>, transform_indices = @transform_11, window_bounds = array<i64: 2, 128, 128>}, {pipeline_mode = #tpu.pipeline_mode<synchronous>, transform_indices = @transform_12, window_bounds = array<i64: 2, 1, 128>}, {pipeline_mode = #tpu.pipeline_mode<synchronous>, transform_indices = @transform_13, window_bounds = array<i64: 2, 1, 128>}, {pipeline_mode = #tpu.pipeline_mode<synchronous>, transform_indices = @transform_14, window_bounds = array<i64: 2, 1, 128>}, {pipeline_mode = #tpu.pipeline_mode<synchronous>, transform_indices = @transform_15, window_bounds = array<i64: 2, 128, 128>}, {pipeline_mode = #tpu.pipeline_mode<synchronous>, transform_indices = @transform_16, window_bounds = array<i64: 2, 1, 128>}, {transform_indices = @transform_17, window_bounds = array<i64: 1, 128, 128>}]} {
    %c0_i32 = arith.constant 0 : i32
    %0 = arith.cmpi eq, %arg1, %c0_i32 : i32
    %1 = arith.extui %0 : i1 to i32
    %c0_i32_0 = arith.constant 0 : i32
    %2 = arith.cmpi ne, %1, %c0_i32_0 : i32
    scf.if %2 {
      %c0_67 = arith.constant 0 : index
      %c0_68 = arith.constant 0 : index
      %c0_69 = arith.constant 0 : index
      %192 = vector.load %arg2[%c0_67, %c0_68, %c0_69] : memref<1x128x128xf32, #tpu.memory_space<vmem>>, vector<1x128x128xf32>
      %c0_70 = arith.constant 0 : index
      %c0_71 = arith.constant 0 : index
      %c0_72 = arith.constant 0 : index
      %193 = vector.load %arg19[%c0_70, %c0_71, %c0_72] : memref<1x128x128xf32, #tpu.memory_space<vmem>>, vector<1x128x128xf32>
      tpu.vector_store %arg19[%c0_70, %c0_71, %c0_72], %192 {strides = array<i32>} : memref<1x128x128xf32, #tpu.memory_space<vmem>>, vector<1x128x128xf32>,
    } else {
    }
    %c0 = arith.constant 0 : index
    %c0_1 = arith.constant 0 : index
    %c0_2 = arith.constant 0 : index
    %3 = vector.load %arg19[%c0, %c0_1, %c0_2] : memref<1x128x128xf32, #tpu.memory_space<vmem>>, vector<1x128x128xf32>
    %4 = tpu.iota {dimensions = array<i32: 1>} : vector<1x128xi32>
    %c16_i32 = arith.constant 16 : i32
    %5 = vector.broadcast %c16_i32 : i32 to vector<1x128xi32>
    %6 = arith.cmpi slt, %4, %5 : vector<1x128xi32>
    %7 = arith.extui %6 : vector<1x128xi1> to vector<1x128xi32>
    %8 = arith.sitofp %7 : vector<1x128xi32> to vector<1x128xf32>
    %9 = tpu.iota {dimensions = array<i32: 1>} : vector<1x128xi32>
    %c32_i32 = arith.constant 32 : i32
    %10 = vector.broadcast %c32_i32 : i32 to vector<1x128xi32>
    %11 = arith.cmpi slt, %9, %10 : vector<1x128xi32>
    %12 = arith.extui %11 : vector<1x128xi1> to vector<1x128xi32>
    %13 = arith.sitofp %12 : vector<1x128xi32> to vector<1x128xf32>
    %14 = vector.shape_cast %3 : vector<1x128x128xf32> to vector<128x128xf32>
    %15 = arith.index_cast %arg1 : i32 to index
    %c0_3 = arith.constant 0 : index
    %c0_4 = arith.constant 0 : index
    %16 = vector.load %arg3[%15, %c0_3, %c0_4] : memref<2x1x128xf32, #tpu.memory_space<vmem>>, vector<1x1x128xf32>
    %17 = vector.shape_cast %16 : vector<1x1x128xf32> to vector<1x128xf32>
    %18 = arith.index_cast %arg1 : i32 to index
    %c0_5 = arith.constant 0 : index
    %c0_6 = arith.constant 0 : index
    %19 = vector.load %arg4[%18, %c0_5, %c0_6] : memref<2x1x128xf32, #tpu.memory_space<vmem>>, vector<1x1x128xf32>
    %20 = vector.shape_cast %19 : vector<1x1x128xf32> to vector<1x128xf32>
    %cst = arith.constant dense<0.000000e+00> : vector<128xf32>
    %21 = vector.multi_reduction <add>, %14, %cst [1] : vector<128x128xf32> to vector<128xf32>
    %22 = vector.shape_cast %21 : vector<128xf32> to vector<128x1xf32>
    %cst_7 = arith.constant 6.250000e-02 : f32
    %23 = vector.broadcast %cst_7 : f32 to vector<128x1xf32>
    %24 = arith.mulf %22, %23 : vector<128x1xf32>
    %25 = vector.broadcast %24 : vector<128x1xf32> to vector<128x128xf32>
    %26 = arith.subf %14, %25 : vector<128x128xf32>
    %27 = vector.broadcast %8 : vector<1x128xf32> to vector<128x128xf32>
    %28 = arith.mulf %26, %27 : vector<128x128xf32>
    %29 = arith.mulf %28, %28 : vector<128x128xf32>
    %cst_8 = arith.constant dense<0.000000e+00> : vector<128xf32>
    %30 = vector.multi_reduction <add>, %29, %cst_8 [1] : vector<128x128xf32> to vector<128xf32>
    %31 = vector.shape_cast %30 : vector<128xf32> to vector<128x1xf32>
    %cst_9 = arith.constant 6.250000e-02 : f32
    %32 = vector.broadcast %cst_9 : f32 to vector<128x1xf32>
    %33 = arith.mulf %31, %32 : vector<128x1xf32>
    %cst_10 = arith.constant 9.99999974E-6 : f32
    %34 = vector.broadcast %cst_10 : f32 to vector<128x1xf32>
    %35 = arith.addf %33, %34 : vector<128x1xf32>
    %36 = math.rsqrt %35 : vector<128x1xf32>
    %37 = vector.broadcast %36 : vector<128x1xf32> to vector<128x128xf32>
    %38 = arith.mulf %28, %37 : vector<128x128xf32>
    %39 = vector.broadcast %17 : vector<1x128xf32> to vector<128x128xf32>
    %40 = arith.mulf %38, %39 : vector<128x128xf32>
    %41 = vector.broadcast %20 : vector<1x128xf32> to vector<128x128xf32>
    %42 = arith.addf %40, %41 : vector<128x128xf32>
    %43 = vector.shape_cast %42 : vector<128x128xf32> to vector<1x128x128xf32>
    %44 = vector.shape_cast %43 : vector<1x128x128xf32> to vector<128x128xf32>
    %45 = tpu.transpose %44, [1, 0] : vector<128x128xf32> -> vector<128x128xf32>
    %46 = arith.index_cast %arg1 : i32 to index
    %c0_11 = arith.constant 0 : index
    %c0_12 = arith.constant 0 : index
    %47 = vector.load %arg5[%46, %c0_11, %c0_12] : memref<2x128x128xf32, #tpu.memory_space<vmem>>, vector<1x128x128xf32>
    %48 = vector.shape_cast %47 : vector<1x128x128xf32> to vector<128x128xf32>
    %cst_13 = arith.constant dense<0.000000e+00> : vector<128x128xf32>
    %49 = tpu.matmul %45, %48, %cst_13 {dimension_numbers = #tpu.dot_dimension_numbers<[1], [0], [0], [1], [0, 0, 1, 1], [], []>} : vector<128x128xf32>, vector<128x128xf32>, vector<128x128xf32> -> vector<128x128xf32>
    %50 = arith.index_cast %arg1 : i32 to index
    %c0_14 = arith.constant 0 : index
    %c0_15 = arith.constant 0 : index
    %51 = vector.load %arg6[%50, %c0_14, %c0_15] : memref<2x1x128xf32, #tpu.memory_space<vmem>>, vector<1x1x128xf32>
    %52 = vector.shape_cast %51 : vector<1x1x128xf32> to vector<1x128xf32>
    %53 = vector.broadcast %52 : vector<1x128xf32> to vector<128x128xf32>
    %54 = arith.addf %49, %53 : vector<128x128xf32>
    %cst_16 = arith.constant 5.000000e-01 : f32
    %55 = vector.broadcast %cst_16 : f32 to vector<128x128xf32>
    %56 = arith.mulf %55, %54 : vector<128x128xf32>
    %cst_17 = arith.constant 0.707106769 : f32
    %57 = vector.broadcast %cst_17 : f32 to vector<128x128xf32>
    %58 = arith.mulf %54, %57 : vector<128x128xf32>
    %59 = math.erf %58 : vector<128x128xf32>
    %cst_18 = arith.constant 1.000000e+00 : f32
    %60 = vector.broadcast %cst_18 : f32 to vector<128x128xf32>
    %61 = arith.addf %60, %59 : vector<128x128xf32>
    %62 = arith.mulf %56, %61 : vector<128x128xf32>
    %63 = arith.index_cast %arg1 : i32 to index
    %c0_19 = arith.constant 0 : index
    %c0_20 = arith.constant 0 : index
    %64 = vector.load %arg7[%63, %c0_19, %c0_20] : memref<2x1x128xf32, #tpu.memory_space<vmem>>, vector<1x1x128xf32>
    %65 = vector.shape_cast %64 : vector<1x1x128xf32> to vector<1x128xf32>
    %66 = arith.index_cast %arg1 : i32 to index
    %c0_21 = arith.constant 0 : index
    %c0_22 = arith.constant 0 : index
    %67 = vector.load %arg8[%66, %c0_21, %c0_22] : memref<2x1x128xf32, #tpu.memory_space<vmem>>, vector<1x1x128xf32>
    %68 = vector.shape_cast %67 : vector<1x1x128xf32> to vector<1x128xf32>
    %cst_23 = arith.constant dense<0.000000e+00> : vector<128xf32>
    %69 = vector.multi_reduction <add>, %62, %cst_23 [1] : vector<128x128xf32> to vector<128xf32>
    %70 = vector.shape_cast %69 : vector<128xf32> to vector<128x1xf32>
    %cst_24 = arith.constant 3.125000e-02 : f32
    %71 = vector.broadcast %cst_24 : f32 to vector<128x1xf32>
    %72 = arith.mulf %70, %71 : vector<128x1xf32>
    %73 = vector.broadcast %72 : vector<128x1xf32> to vector<128x128xf32>
    %74 = arith.subf %62, %73 : vector<128x128xf32>
    %75 = vector.broadcast %13 : vector<1x128xf32> to vector<128x128xf32>
    %76 = arith.mulf %74, %75 : vector<128x128xf32>
    %77 = arith.mulf %76, %76 : vector<128x128xf32>
    %cst_25 = arith.constant dense<0.000000e+00> : vector<128xf32>
    %78 = vector.multi_reduction <add>, %77, %cst_25 [1] : vector<128x128xf32> to vector<128xf32>
    %79 = vector.shape_cast %78 : vector<128xf32> to vector<128x1xf32>
    %cst_26 = arith.constant 3.125000e-02 : f32
    %80 = vector.broadcast %cst_26 : f32 to vector<128x1xf32>
    %81 = arith.mulf %79, %80 : vector<128x1xf32>
    %cst_27 = arith.constant 9.99999974E-6 : f32
    %82 = vector.broadcast %cst_27 : f32 to vector<128x1xf32>
    %83 = arith.addf %81, %82 : vector<128x1xf32>
    %84 = math.rsqrt %83 : vector<128x1xf32>
    %85 = vector.broadcast %84 : vector<128x1xf32> to vector<128x128xf32>
    %86 = arith.mulf %76, %85 : vector<128x128xf32>
    %87 = vector.broadcast %65 : vector<1x128xf32> to vector<128x128xf32>
    %88 = arith.mulf %86, %87 : vector<128x128xf32>
    %89 = vector.broadcast %68 : vector<1x128xf32> to vector<128x128xf32>
    %90 = arith.addf %88, %89 : vector<128x128xf32>
    %91 = arith.index_cast %arg1 : i32 to index
    %c0_28 = arith.constant 0 : index
    %c0_29 = arith.constant 0 : index
    %92 = vector.load %arg9[%91, %c0_28, %c0_29] : memref<2x128x128xf32, #tpu.memory_space<vmem>>, vector<1x128x128xf32>
    %93 = vector.shape_cast %92 : vector<1x128x128xf32> to vector<128x128xf32>
    %cst_30 = arith.constant dense<0.000000e+00> : vector<128x128xf32>
    %94 = tpu.matmul %90, %93, %cst_30 {dimension_numbers = #tpu.dot_dimension_numbers<[1], [0], [0], [1], [0, 0, 1, 1], [], []>} : vector<128x128xf32>, vector<128x128xf32>, vector<128x128xf32> -> vector<128x128xf32>
    %95 = arith.index_cast %arg1 : i32 to index
    %c0_31 = arith.constant 0 : index
    %c0_32 = arith.constant 0 : index
    %96 = vector.load %arg10[%95, %c0_31, %c0_32] : memref<2x1x128xf32, #tpu.memory_space<vmem>>, vector<1x1x128xf32>
    %97 = vector.shape_cast %96 : vector<1x1x128xf32> to vector<1x128xf32>
    %98 = vector.broadcast %97 : vector<1x128xf32> to vector<128x128xf32>
    %99 = arith.addf %94, %98 : vector<128x128xf32>
    %100 = vector.shape_cast %99 : vector<128x128xf32> to vector<1x128x128xf32>
    %101 = vector.shape_cast %100 : vector<1x128x128xf32> to vector<128x128xf32>
    %102 = tpu.transpose %101, [1, 0] : vector<128x128xf32> -> vector<128x128xf32>
    %103 = vector.broadcast %8 : vector<1x128xf32> to vector<128x128xf32>
    %104 = arith.mulf %102, %103 : vector<128x128xf32>
    %105 = arith.addf %104, %14 : vector<128x128xf32>
    %106 = arith.index_cast %arg1 : i32 to index
    %c0_33 = arith.constant 0 : index
    %c0_34 = arith.constant 0 : index
    %107 = vector.load %arg11[%106, %c0_33, %c0_34] : memref<2x1x128xf32, #tpu.memory_space<vmem>>, vector<1x1x128xf32>
    %108 = vector.shape_cast %107 : vector<1x1x128xf32> to vector<1x128xf32>
    %109 = arith.index_cast %arg1 : i32 to index
    %c0_35 = arith.constant 0 : index
    %c0_36 = arith.constant 0 : index
    %110 = vector.load %arg12[%109, %c0_35, %c0_36] : memref<2x1x128xf32, #tpu.memory_space<vmem>>, vector<1x1x128xf32>
    %111 = vector.shape_cast %110 : vector<1x1x128xf32> to vector<1x128xf32>
    %cst_37 = arith.constant dense<0.000000e+00> : vector<128xf32>
    %112 = vector.multi_reduction <add>, %105, %cst_37 [1] : vector<128x128xf32> to vector<128xf32>
    %113 = vector.shape_cast %112 : vector<128xf32> to vector<128x1xf32>
    %cst_38 = arith.constant 6.250000e-02 : f32
    %114 = vector.broadcast %cst_38 : f32 to vector<128x1xf32>
    %115 = arith.mulf %113, %114 : vector<128x1xf32>
    %116 = vector.broadcast %115 : vector<128x1xf32> to vector<128x128xf32>
    %117 = arith.subf %105, %116 : vector<128x128xf32>
    %118 = vector.broadcast %8 : vector<1x128xf32> to vector<128x128xf32>
    %119 = arith.mulf %117, %118 : vector<128x128xf32>
    %120 = arith.mulf %119, %119 : vector<128x128xf32>
    %cst_39 = arith.constant dense<0.000000e+00> : vector<128xf32>
    %121 = vector.multi_reduction <add>, %120, %cst_39 [1] : vector<128x128xf32> to vector<128xf32>
    %122 = vector.shape_cast %121 : vector<128xf32> to vector<128x1xf32>
    %cst_40 = arith.constant 6.250000e-02 : f32
    %123 = vector.broadcast %cst_40 : f32 to vector<128x1xf32>
    %124 = arith.mulf %122, %123 : vector<128x1xf32>
    %cst_41 = arith.constant 9.99999974E-6 : f32
    %125 = vector.broadcast %cst_41 : f32 to vector<128x1xf32>
    %126 = arith.addf %124, %125 : vector<128x1xf32>
    %127 = math.rsqrt %126 : vector<128x1xf32>
    %128 = vector.broadcast %127 : vector<128x1xf32> to vector<128x128xf32>
    %129 = arith.mulf %119, %128 : vector<128x128xf32>
    %130 = vector.broadcast %108 : vector<1x128xf32> to vector<128x128xf32>
    %131 = arith.mulf %129, %130 : vector<128x128xf32>
    %132 = vector.broadcast %111 : vector<1x128xf32> to vector<128x128xf32>
    %133 = arith.addf %131, %132 : vector<128x128xf32>
    %134 = arith.index_cast %arg1 : i32 to index
    %c0_42 = arith.constant 0 : index
    %c0_43 = arith.constant 0 : index
    %135 = vector.load %arg13[%134, %c0_42, %c0_43] : memref<2x128x128xf32, #tpu.memory_space<vmem>>, vector<1x128x128xf32>
    %136 = vector.shape_cast %135 : vector<1x128x128xf32> to vector<128x128xf32>
    %cst_44 = arith.constant dense<0.000000e+00> : vector<128x128xf32>
    %137 = tpu.matmul %133, %136, %cst_44 {dimension_numbers = #tpu.dot_dimension_numbers<[1], [0], [0], [1], [0, 0, 1, 1], [], []>} : vector<128x128xf32>, vector<128x128xf32>, vector<128x128xf32> -> vector<128x128xf32>
    %138 = arith.index_cast %arg1 : i32 to index
    %c0_45 = arith.constant 0 : index
    %c0_46 = arith.constant 0 : index
    %139 = vector.load %arg14[%138, %c0_45, %c0_46] : memref<2x1x128xf32, #tpu.memory_space<vmem>>, vector<1x1x128xf32>
    %140 = vector.shape_cast %139 : vector<1x1x128xf32> to vector<1x128xf32>
    %141 = vector.broadcast %140 : vector<1x128xf32> to vector<128x128xf32>
    %142 = arith.addf %137, %141 : vector<128x128xf32>
    %cst_47 = arith.constant 5.000000e-01 : f32
    %143 = vector.broadcast %cst_47 : f32 to vector<128x128xf32>
    %144 = arith.mulf %143, %142 : vector<128x128xf32>
    %cst_48 = arith.constant 0.707106769 : f32
    %145 = vector.broadcast %cst_48 : f32 to vector<128x128xf32>
    %146 = arith.mulf %142, %145 : vector<128x128xf32>
    %147 = math.erf %146 : vector<128x128xf32>
    %cst_49 = arith.constant 1.000000e+00 : f32
    %148 = vector.broadcast %cst_49 : f32 to vector<128x128xf32>
    %149 = arith.addf %148, %147 : vector<128x128xf32>
    %150 = arith.mulf %144, %149 : vector<128x128xf32>
    %151 = arith.index_cast %arg1 : i32 to index
    %c0_50 = arith.constant 0 : index
    %c0_51 = arith.constant 0 : index
    %152 = vector.load %arg15[%151, %c0_50, %c0_51] : memref<2x1x128xf32, #tpu.memory_space<vmem>>, vector<1x1x128xf32>
    %153 = vector.shape_cast %152 : vector<1x1x128xf32> to vector<1x128xf32>
    %154 = arith.index_cast %arg1 : i32 to index
    %c0_52 = arith.constant 0 : index
    %c0_53 = arith.constant 0 : index
    %155 = vector.load %arg16[%154, %c0_52, %c0_53] : memref<2x1x128xf32, #tpu.memory_space<vmem>>, vector<1x1x128xf32>
    %156 = vector.shape_cast %155 : vector<1x1x128xf32> to vector<1x128xf32>
    %cst_54 = arith.constant dense<0.000000e+00> : vector<128xf32>
    %157 = vector.multi_reduction <add>, %150, %cst_54 [1] : vector<128x128xf32> to vector<128xf32>
    %158 = vector.shape_cast %157 : vector<128xf32> to vector<128x1xf32>
    %cst_55 = arith.constant 3.125000e-02 : f32
    %159 = vector.broadcast %cst_55 : f32 to vector<128x1xf32>
    %160 = arith.mulf %158, %159 : vector<128x1xf32>
    %161 = vector.broadcast %160 : vector<128x1xf32> to vector<128x128xf32>
    %162 = arith.subf %150, %161 : vector<128x128xf32>
    %163 = vector.broadcast %13 : vector<1x128xf32> to vector<128x128xf32>
    %164 = arith.mulf %162, %163 : vector<128x128xf32>
    %165 = arith.mulf %164, %164 : vector<128x128xf32>
    %cst_56 = arith.constant dense<0.000000e+00> : vector<128xf32>
    %166 = vector.multi_reduction <add>, %165, %cst_56 [1] : vector<128x128xf32> to vector<128xf32>
    %167 = vector.shape_cast %166 : vector<128xf32> to vector<128x1xf32>
    %cst_57 = arith.constant 3.125000e-02 : f32
    %168 = vector.broadcast %cst_57 : f32 to vector<128x1xf32>
    %169 = arith.mulf %167, %168 : vector<128x1xf32>
    %cst_58 = arith.constant 9.99999974E-6 : f32
    %170 = vector.broadcast %cst_58 : f32 to vector<128x1xf32>
    %171 = arith.addf %169, %170 : vector<128x1xf32>
    %172 = math.rsqrt %171 : vector<128x1xf32>
    %173 = vector.broadcast %172 : vector<128x1xf32> to vector<128x128xf32>
    %174 = arith.mulf %164, %173 : vector<128x128xf32>
    %175 = vector.broadcast %153 : vector<1x128xf32> to vector<128x128xf32>
    %176 = arith.mulf %174, %175 : vector<128x128xf32>
    %177 = vector.broadcast %156 : vector<1x128xf32> to vector<128x128xf32>
    %178 = arith.addf %176, %177 : vector<128x128xf32>
    %179 = arith.index_cast %arg1 : i32 to index
    %c0_59 = arith.constant 0 : index
    %c0_60 = arith.constant 0 : index
    %180 = vector.load %arg17[%179, %c0_59, %c0_60] : memref<2x128x128xf32, #tpu.memory_space<vmem>>, vector<1x128x128xf32>
    %181 = vector.shape_cast %180 : vector<1x128x128xf32> to vector<128x128xf32>
    %cst_61 = arith.constant dense<0.000000e+00> : vector<128x128xf32>
    %182 = tpu.matmul %178, %181, %cst_61 {dimension_numbers = #tpu.dot_dimension_numbers<[1], [0], [0], [1], [0, 0, 1, 1], [], []>} : vector<128x128xf32>, vector<128x128xf32>, vector<128x128xf32> -> vector<128x128xf32>
    %183 = arith.index_cast %arg1 : i32 to index
    %c0_62 = arith.constant 0 : index
    %c0_63 = arith.constant 0 : index
    %184 = vector.load %arg18[%183, %c0_62, %c0_63] : memref<2x1x128xf32, #tpu.memory_space<vmem>>, vector<1x1x128xf32>
    %185 = vector.shape_cast %184 : vector<1x1x128xf32> to vector<1x128xf32>
    %186 = vector.broadcast %185 : vector<1x128xf32> to vector<128x128xf32>
    %187 = arith.addf %182, %186 : vector<128x128xf32>
    %188 = arith.addf %187, %105 : vector<128x128xf32>
    %189 = arith.addf %188, %14 : vector<128x128xf32>
    %190 = vector.shape_cast %189 : vector<128x128xf32> to vector<1x128x128xf32>
    %c0_64 = arith.constant 0 : index
    %c0_65 = arith.constant 0 : index
    %c0_66 = arith.constant 0 : index
    %191 = vector.load %arg19[%c0_64, %c0_65, %c0_66] : memref<1x128x128xf32, #tpu.memory_space<vmem>>, vector<1x128x128xf32>
    tpu.vector_store %arg19[%c0_64, %c0_65, %c0_66], %190 {strides = array<i32>} : memref<1x128x128xf32, #tpu.memory_space<vmem>>, vector<1x128x128xf32>,
    return
  }
  func.func @transform_0(%arg0: i32, %arg1: i32) -> (i32, i32, i32) {
    %c0_i32 = arith.constant 0 : i32
    %c0_i32_0 = arith.constant 0 : i32
    %c0_i32_1 = arith.constant 0 : i32
    return %arg0, %c0_i32, %c0_i32_0 : i32, i32, i32
  }
  func.func @transform_1(%arg0: i32, %arg1: i32) -> (i32, i32, i32) {
    %c0_i32 = arith.constant 0 : i32
    %c0_i32_0 = arith.constant 0 : i32
    %c0_i32_1 = arith.constant 0 : i32
    %c0_i32_2 = arith.constant 0 : i32
    return %c0_i32, %c0_i32_0, %c0_i32_1 : i32, i32, i32
  }
  func.func @transform_2(%arg0: i32, %arg1: i32) -> (i32, i32, i32) {
    %c0_i32 = arith.constant 0 : i32
    %c0_i32_0 = arith.constant 0 : i32
    %c0_i32_1 = arith.constant 0 : i32
    %c0_i32_2 = arith.constant 0 : i32
    return %c0_i32, %c0_i32_0, %c0_i32_1 : i32, i32, i32
  }
  func.func @transform_3(%arg0: i32, %arg1: i32) -> (i32, i32, i32) {
    %c0_i32 = arith.constant 0 : i32
    %c0_i32_0 = arith.constant 0 : i32
    %c0_i32_1 = arith.constant 0 : i32
    %c0_i32_2 = arith.constant 0 : i32
    return %c0_i32, %c0_i32_0, %c0_i32_1 : i32, i32, i32
  }
  func.func @transform_4(%arg0: i32, %arg1: i32) -> (i32, i32, i32) {
    %c0_i32 = arith.constant 0 : i32
    %c0_i32_0 = arith.constant 0 : i32
    %c0_i32_1 = arith.constant 0 : i32
    %c0_i32_2 = arith.constant 0 : i32
    return %c0_i32, %c0_i32_0, %c0_i32_1 : i32, i32, i32
  }
  func.func @transform_5(%arg0: i32, %arg1: i32) -> (i32, i32, i32) {
    %c0_i32 = arith.constant 0 : i32
    %c0_i32_0 = arith.constant 0 : i32
    %c0_i32_1 = arith.constant 0 : i32
    %c0_i32_2 = arith.constant 0 : i32
    return %c0_i32, %c0_i32_0, %c0_i32_1 : i32, i32, i32
  }
  func.func @transform_6(%arg0: i32, %arg1: i32) -> (i32, i32, i32) {
    %c0_i32 = arith.constant 0 : i32
    %c0_i32_0 = arith.constant 0 : i32
    %c0_i32_1 = arith.constant 0 : i32
    %c0_i32_2 = arith.constant 0 : i32
    return %c0_i32, %c0_i32_0, %c0_i32_1 : i32, i32, i32
  }
  func.func @transform_7(%arg0: i32, %arg1: i32) -> (i32, i32, i32) {
    %c0_i32 = arith.constant 0 : i32
    %c0_i32_0 = arith.constant 0 : i32
    %c0_i32_1 = arith.constant 0 : i32
    %c0_i32_2 = arith.constant 0 : i32
    return %c0_i32, %c0_i32_0, %c0_i32_1 : i32, i32, i32
  }
  func.func @transform_8(%arg0: i32, %arg1: i32) -> (i32, i32, i32) {
    %c0_i32 = arith.constant 0 : i32
    %c0_i32_0 = arith.constant 0 : i32
    %c0_i32_1 = arith.constant 0 : i32
    %c0_i32_2 = arith.constant 0 : i32
    return %c0_i32, %c0_i32_0, %c0_i32_1 : i32, i32, i32
  }
  func.func @transform_9(%arg0: i32, %arg1: i32) -> (i32, i32, i32) {
    %c0_i32 = arith.constant 0 : i32
    %c0_i32_0 = arith.constant 0 : i32
    %c0_i32_1 = arith.constant 0 : i32
    %c0_i32_2 = arith.constant 0 : i32
    return %c0_i32, %c0_i32_0, %c0_i32_1 : i32, i32, i32
  }
  func.func @transform_10(%arg0: i32, %arg1: i32) -> (i32, i32, i32) {
    %c0_i32 = arith.constant 0 : i32
    %c0_i32_0 = arith.constant 0 : i32
    %c0_i32_1 = arith.constant 0 : i32
    %c0_i32_2 = arith.constant 0 : i32
    return %c0_i32, %c0_i32_0, %c0_i32_1 : i32, i32, i32
  }
  func.func @transform_11(%arg0: i32, %arg1: i32) -> (i32, i32, i32) {
    %c0_i32 = arith.constant 0 : i32
    %c0_i32_0 = arith.constant 0 : i32
    %c0_i32_1 = arith.constant 0 : i32
    %c0_i32_2 = arith.constant 0 : i32
    return %c0_i32, %c0_i32_0, %c0_i32_1 : i32, i32, i32
  }
  func.func @transform_12(%arg0: i32, %arg1: i32) -> (i32, i32, i32) {
    %c0_i32 = arith.constant 0 : i32
    %c0_i32_0 = arith.constant 0 : i32
    %c0_i32_1 = arith.constant 0 : i32
    %c0_i32_2 = arith.constant 0 : i32
    return %c0_i32, %c0_i32_0, %c0_i32_1 : i32, i32, i32
  }
  func.func @transform_13(%arg0: i32, %arg1: i32) -> (i32, i32, i32) {
    %c0_i32 = arith.constant 0 : i32
    %c0_i32_0 = arith.constant 0 : i32
    %c0_i32_1 = arith.constant 0 : i32
    %c0_i32_2 = arith.constant 0 : i32
    return %c0_i32, %c0_i32_0, %c0_i32_1 : i32, i32, i32
  }
  func.func @transform_14(%arg0: i32, %arg1: i32) -> (i32, i32, i32) {
    %c0_i32 = arith.constant 0 : i32
    %c0_i32_0 = arith.constant 0 : i32
    %c0_i32_1 = arith.constant 0 : i32
    %c0_i32_2 = arith.constant 0 : i32
    return %c0_i32, %c0_i32_0, %c0_i32_1 : i32, i32, i32
  }
  func.func @transform_15(%arg0: i32, %arg1: i32) -> (i32, i32, i32) {
    %c0_i32 = arith.constant 0 : i32
    %c0_i32_0 = arith.constant 0 : i32
    %c0_i32_1 = arith.constant 0 : i32
    %c0_i32_2 = arith.constant 0 : i32
    return %c0_i32, %c0_i32_0, %c0_i32_1 : i32, i32, i32
  }
  func.func @transform_16(%arg0: i32, %arg1: i32) -> (i32, i32, i32) {
    %c0_i32 = arith.constant 0 : i32
    %c0_i32_0 = arith.constant 0 : i32
    %c0_i32_1 = arith.constant 0 : i32
    %c0_i32_2 = arith.constant 0 : i32
    return %c0_i32, %c0_i32_0, %c0_i32_1 : i32, i32, i32
  }
  func.func @transform_17(%arg0: i32, %arg1: i32) -> (i32, i32, i32) {
    %c0_i32 = arith.constant 0 : i32
    %c0_i32_0 = arith.constant 0 : i32
    %c0_i32_1 = arith.constant 0 : i32
    return %arg0, %c0_i32, %c0_i32_0 : i32, i32, i32
  }
}

</mosaic_0001>

<bundles_post_ra>
// kernel: tpu_custom_call.1
= control target key start
LH: loop header
LB: loop body
LE: loop exit
PB: predicated region body
PF: predicated region fallthrough
CT: control target
= control target key end

     0   :  { %s5446_s0 = inlined_call_operand.hbm [shape: f32[2,128,128], index: 0, kind: input, shape index: {}]   ;;  %s5447_s1 = inlined_call_operand.vmem [shape: f32[2,1,128], index: 1, kind: input, shape index: {}]   ;;  %s5448_s2 = inlined_call_operand.vmem [shape: f32[2,1,128], index: 2, kind: input, shape index: {}]   ;;  %s5449_s3 = inlined_call_operand.hbm [shape: f32[2,128,128], index: 3, kind: input, shape index: {}]   ;;  %s5450_s4 = inlined_call_operand.vmem [shape: f32[2,1,128], index: 4, kind: input, shape index: {}]   ;;  %s5451_s5 = inlined_call_operand.vmem [shape: f32[2,1,128], index: 5, kind: input, shape index: {}]   ;;  %s5452_s6 = inlined_call_operand.vmem [shape: f32[2,1,128], index: 6, kind: input, shape index: {}]   ;;  %s5453_s7 = inlined_call_operand.hbm [shape: f32[2,128,128], index: 7, kind: input, shape index: {}]   ;;  %s5454_s8 = inlined_call_operand.vmem [shape: f32[2,1,128], index: 8, kind: input, shape index: {}]   ;;  %s5455_s9 = inlined_call_operand.vmem [shape: f32[2,1,128], index: 9, kind: input, shape index: {}]   ;;  %s5456_s10 = inlined_call_operand.vmem [shape: f32[2,1,128], index: 10, kind: input, shape index: {}]   ;;  %s5457_s11 = inlined_call_operand.hbm [shape: f32[2,128,128], index: 11, kind: input, shape index: {}]   ;;  %s5458_s12 = inlined_call_operand.vmem [shape: f32[2,1,128], index: 12, kind: input, shape index: {}]   ;;  %s5459_s13 = inlined_call_operand.vmem [shape: f32[2,1,128], index: 13, kind: input, shape index: {}]   ;;  %s5460_s14 = inlined_call_operand.vmem [shape: f32[2,1,128], index: 14, kind: input, shape index: {}]   ;;  %s5461_s15 = inlined_call_operand.hbm [shape: f32[2,128,128], index: 15, kind: input, shape index: {}]   ;;  %s5462_s16 = inlined_call_operand.vmem [shape: f32[2,1,128], index: 16, kind: input, shape index: {}]   ;;  %s5463_s17 = inlined_call_operand.hbm [shape: f32[2,128,128], index: 17, kind: output, shape index: {}]  }
   0x1   :  { %5474 = sst [smem:[#allocation19_spill]] %s5446_s0 }
   0x2   :  { %5475 = sst [smem:[#allocation20_spill]] %s5447_s1 }
   0x3   :  { %5476 = sst [smem:[#allocation21_spill]] %s5450_s4 }
   0x4   :  { %5477 = sst [smem:[#allocation22_spill]] %s5451_s5 }
   0x5   :  { %5478 = sst [smem:[#allocation23_spill]] %s5452_s6 }
   0x6   :  { %5479 = sst [smem:[#allocation24_spill]] %s5454_s8 }
   0x7   :  { %5480 = sst [smem:[#allocation25_spill]] %s5455_s9 }
   0x8   :  { %5481 = sst [smem:[#allocation26_spill]] %s5456_s10 }
   0x9   :  { %5482 = sst [smem:[#allocation27_spill]] %s5458_s12 }
   0xa   :  { %5483 = sst [smem:[#allocation28_spill]] %s5459_s13 }
   0xb   :  { %5484 = sst [smem:[#allocation29_spill]] %s5460_s14 }
   0xc   :  { %5485 = sst [smem:[#allocation30_spill]] %s5462_s16 }
   0xd   :  { %5486 = sst [smem:[#allocation31_spill]] %s5463_s17 }
   0xe   :  { %22 = vsyncpa [#allocation3], 0 }
   0xf   :  { %24 = vsyncpa [#allocation3 + $0x1], 0 }
  0x10   :  { %25 = vsyncpa [#allocation6], 0 }
  0x11   :  { %26 = vsyncpa [#allocation9], 0 }
  0x12   :  { %27 = vsyncpa [#allocation4], 0 }
  0x13   :  { %29 = vsyncpa [#allocation4 + $0x1], 0  ;;  %s4018_s24 = smov 0   ;;  %s4020_s25 = smov 0  }
  0x14   :  { %s4022_s26 = smov 0   ;;  %s4024_s27 = smov 0  }
  0x15   :  { %s4026_s28 = smov 0   ;;  %s4028_s29 = smov 0  }
  0x16   :  { %s4030_s0 = smov 0   ;;  %s4032_s30 = smov 0  }
  0x17 LB: > { %5487 = sst [smem:[#allocation16_spill]] %s3887_s24  ;;  %s2798_s18 = sadd.s32 4294967295, %s3915_s30   ;;  %s3915_s30 = sphi %s4032_s30, %s35_s30   ;;  %s3911_s0 = sphi %s4030_s0, %s5529_s0   ;;  %s3907_s29 = sphi %s4028_s29, %s5528_s29   ;;  %s3903_s28 = sphi %s4026_s28, %s5527_s28   ;;  %s3899_s27 = sphi %s4024_s27, %s5526_s27   ;;  %s3895_s26 = sphi %s4022_s26, %s5525_s26   ;;  %s3891_s25 = sphi %s4020_s25, %s5524_s25   ;;  %s3887_s24 = sphi %s4018_s24, %s5523_s24  }
  0x18   : > { %5488 = sst [smem:[#allocation17_spill]] %s3903_s28  ;;  %s2799_s19 = sadd.s32 4294967294, %s3915_s30  }
  0x19   : > { %p67_p0 = scmp.ne.s32.totalorder %s3891_s25, %s3887_s24  ;;  %p4062_p1 = scmp.eq.s32.totalorder %s2798_s18, 0 }
  0x1a   : > { %p4066_p2 = scmp.eq.s32.totalorder %s2798_s18, 3  ;;  %p433_p3 = scmp.eq.s32.totalorder %s2799_s19, 3 }
  0x1b   : > { %s5489_s1 = scalar_select %p4062_p1, 1, 0 }
  0x1c   : > { %s5490_s20 = scalar_select %p4066_p2, 1, 0 }
  0x1d   : > { %p4072_p4 = por %p4062_p1, %p67_p0  ;;  %p2800_p5 = scmp.ge.s32.totalorder %s3915_s30, 1 }
  0x1e   : > { %p4077_p6 = por %p433_p3, %p67_p0  ;;  %p440_p7 = scmp.lt.s32.totalorder %s3915_s30, 5 }
  0x1f   : > { %s5491_s21 = scalar_select %p4072_p4, 1, 0 }
  0x20   : > { %s5492_s22 = scalar_select %p4077_p6, 1, 0 }
  0x21   : > { %p4082_p8 = pnand %p2800_p5, %p440_p7  ;;  %s3917_s18 = smov [#allocation5]  }
  0x22   : > { %5493 = sst [smem:[#allocation18_spill]] %s5492_s22  ;;  %s458_s24 = sshll.u32 %s3917_s18, 4  ;;  %s4086_s24 = int_to_ptr.vmem [resolvable:$true] %s458_s24 }
  0x23   : > { %s5494_s23 = scalar_select %p4082_p8, 1, 0 }
  0x24   : > { %p3339_p9 = pneg %p4082_p8  ;;  %s3918_s17 = smov [#allocation8]  }
  0x25   : > { %s502_s22 = sshll.u32 %s3918_s17, 4  ;;  %s3919_s28 = smov [#allocation7]   ;;  %s4096_s22 = int_to_ptr.vmem [resolvable:$true] %s502_s22 }
  0x26   : > { %p4092_p10 = pnand %p3339_p9, %p4062_p1  ;;  %s4098_s16 = sshll.u32 %s3919_s28, 4  ;;  %s481_s16 = int_to_ptr.vmem [resolvable:$true] %s4098_s16 }
  0x27   : > { %s3667_s18 = scalar_lea.hbm %s5449_s3, 4096 }
  0x28   : > { %p3668_p11 = scmp.ne.s32.totalorder %s5449_s3, %s3667_s18  ;;  %p4108_p12 = pneg %p4092_p10 }
  0x29   : > { %p3674_p3 = scmp.lt.u32.totalorder %s3667_s18, %s5449_s3 }
  0x2a   : > { %p3670_p13 = pnand %p4108_p12, %p3668_p11 }
  0x2c   : > { %p3671_p0 = pneg %p3670_p13 }
  0x2e   : > { %p3676_p5 = pnand %p3674_p3, %p3671_p0 }
  0x30   : > { %3679 = shalt.err (!%p3676_p5)
}
  0x31   : > { %s3680_s10 = scalar_lea.vmem %s4086_s24, 4096  ;;  %p3688_p1 = scmp.lt.s32.totalorder %s4086_s24, %s4086_s24 }
  0x32   : > { %p3681_p7 = scmp.ne.s32.totalorder %s4086_s24, %s3680_s10  ;;  %p3689_p4 = scmp.lt.s32.totalorder %s3680_s10, %s3680_s10 }
  0x34   : > { %p3683_p9 = pnand %p3681_p7, %p4108_p12  ;;  %p3690_p11 = por %p3689_p4, %p3688_p1 }
  0x36   : > { %p3684_p6 = pneg %p3683_p9 }
  0x38   : > { %p3691_p13 = pnand %p3690_p11, %p3684_p6 }
  0x3a   : > { %3694 = shalt.err (!%p3691_p13)
}
  0x3b   : > { %s5472_s12 = smov 128   ;;  %s5473_s13 = smov 8  }
  0x3c   : > { %3342 = dma.hbm_to_vmem [thread:$0]  (!%p4092_p10), %s5449_s3, 4096, %s4086_s24, [#allocation6], %s5472_s12, %s5472_s12, %s5473_s13  }
  0x3d   : > { %s3695_s10 = scalar_lea.hbm %s5457_s11, 4096 }
  0x3e   : > { %p3696_p1 = scmp.ne.s32.totalorder %s5457_s11, %s3695_s10  ;;  %p3702_p0 = scmp.lt.u32.totalorder %s3695_s10, %s5457_s11 }
  0x40   : > { %p3698_p4 = pnand %p3696_p1, %p4108_p12 }
  0x42   : > { %p3699_p6 = pneg %p3698_p4 }
  0x44   : > { %p3704_p3 = pnand %p3702_p0, %p3699_p6 }
  0x46   : > { %3707 = shalt.err (!%p3704_p3)
}
  0x47   : > { %s3708_s24 = scalar_lea.vmem %s4096_s22, 4096  ;;  %p3716_p11 = scmp.lt.s32.totalorder %s4096_s22, %s4096_s22 }
  0x48   : > { %p3709_p5 = scmp.ne.s32.totalorder %s4096_s22, %s3708_s24  ;;  %p3717_p13 = scmp.lt.s32.totalorder %s3708_s24, %s3708_s24 }
  0x4a   : > { %p3711_p7 = pnand %p3709_p5, %p4108_p12  ;;  %p3718_p1 = por %p3717_p13, %p3716_p11 }
  0x4c   : > { %p3712_p9 = pneg %p3711_p7 }
  0x4e   : > { %p3719_p4 = pnand %p3718_p1, %p3712_p9 }
  0x50   : > { %3722 = shalt.err (!%p3719_p4)
}
  0x51   : > { %3348 = dma.hbm_to_vmem [thread:$0]  (!%p4092_p10), %s5457_s11, 4096, %s4096_s22, [#allocation9], %s5472_s12, %s5472_s12, %s5473_s13  }
  0x52   : > { %s3723_s14 = scalar_lea.hbm %s5453_s7, 4096 }
  0x53   : > { %p3724_p6 = scmp.ne.s32.totalorder %s5453_s7, %s3723_s14  ;;  %p3730_p5 = scmp.lt.u32.totalorder %s3723_s14, %s5453_s7 }
  0x55   : > { %p3726_p0 = pnand %p3724_p6, %p4108_p12 }
  0x57   : > { %p3727_p3 = pneg %p3726_p0 }
  0x59   : > { %p3732_p7 = pnand %p3730_p5, %p3727_p3 }
  0x5b   : > { %3735 = shalt.err (!%p3732_p7)
}
  0x5c   : > { %s3736_s24 = scalar_lea.vmem %s481_s16, 4096  ;;  %p3744_p1 = scmp.lt.s32.totalorder %s481_s16, %s481_s16 }
  0x5d   : > { %p3737_p9 = scmp.ne.s32.totalorder %s481_s16, %s3736_s24  ;;  %p3745_p4 = scmp.lt.s32.totalorder %s3736_s24, %s3736_s24 }
  0x5f   : > { %p3739_p11 = pnand %p3737_p9, %p4108_p12  ;;  %p3746_p8 = por %p3745_p4, %p3744_p1 }
  0x61   : > { %p3740_p13 = pneg %p3739_p11 }
  0x63   : > { %p3747_p2 = pnand %p3746_p8, %p3740_p13 }
  0x65   : > { %3750 = shalt.err (!%p3747_p2)
}
  0x66   : > { %3345 = dma.hbm_to_vmem [thread:$0]  (!%p4092_p10), %s5453_s7, 4096, %s481_s16, [#allocation6], %s5472_s12, %s5472_s12, %s5473_s13  }
  0x67   : > { %s3922_s5 = smov [#allocation10]   ;;  %s3751_s18 = scalar_lea.hbm %s5461_s15, 4096 }
  0x68   : > { %s524_s6 = sshll.u32 %s3922_s5, 4  ;;  %p3752_p2 = scmp.ne.s32.totalorder %s5461_s15, %s3751_s18  ;;  %s525_s6 = int_to_ptr.vmem [resolvable:$true] %s524_s6 }
  0x69   : > { %p3758_p0 = scmp.lt.u32.totalorder %s3751_s18, %s5461_s15 }
  0x6a   : > { %p3754_p8 = pnand %p3752_p2, %p4108_p12 }
  0x6c   : > { %p3755_p6 = pneg %p3754_p8 }
  0x6e   : > { %p3760_p3 = pnand %p3758_p0, %p3755_p6 }
  0x70   : > { %3763 = shalt.err (!%p3760_p3)
}
  0x71   : > { %s3764_s16 = scalar_lea.vmem %s525_s6, 4096  ;;  %p3772_p11 = scmp.lt.s32.totalorder %s525_s6, %s525_s6 }
  0x72   : > { %p3765_p5 = scmp.ne.s32.totalorder %s525_s6, %s3764_s16  ;;  %p3773_p13 = scmp.lt.s32.totalorder %s3764_s16, %s3764_s16 }
  0x74   : > { %p3767_p7 = pnand %p3765_p5, %p4108_p12  ;;  %p3774_p1 = por %p3773_p13, %p3772_p11 }
  0x76   : > { %p3768_p9 = pneg %p3767_p7 }
  0x78   : > { %p3775_p4 = pnand %p3774_p1, %p3768_p9 }
  0x7a   : > { %3778 = shalt.err (!%p3775_p4)
}
  0x7b   : > { %3351 = dma.hbm_to_vmem [thread:$0]  (!%p4092_p10), %s5461_s15, 4096, %s525_s6, [#allocation9], %s5472_s12, %s5472_s12, %s5473_s13  }
  0x7c   : > { %s44_s9 = sadd.s32 1, %s3907_s29  ;;  %s47_s19 = sadd.s32 1, %s3911_s0 }
  0x7d   : > { %p45_p12 = scmp.ge.s32.totalorder %s44_s9, 2  ;;  %s54_s5 = sadd.s32 1, %s3895_s26 }
  0x7e   : > { %p61_p2 = scmp.ne.s32.totalorder %s3895_s26, %s3891_s25  ;;  %p62_p8 = scmp.eq.s32.totalorder %s3915_s30, 0 }
  0x7f   : > { %s5531_s9 = smov (%p45_p12, %s44_s9), 0  ;;  %s5533_s19 = smov (!%p45_p12, %s47_s19), %s3911_s0 }
  0x80   : > { %p4210_p6 = por %p62_p8, %p61_p2  ;;  %p5498_p0 = scmp.ne.s32.totalorder %s5490_s20, 0 }
  0x81   : > { %p49_p10 = scmp.ge.s32.totalorder %s5533_s19, 2  ;;  %p3364_p5 = scmp.lt.s32.totalorder %s3915_s30, 4 }
  0x82   : > { %p4216_p3 = por %p5498_p0, %p61_p2  ;;  %s541_s6 = sand.u32 1, %s3895_s26  }
  0x83   : > { %s2837_s18 = sshll.u32 %s3911_s0, 11  ;;  %s5535_s19 = smov (%p49_p10, %s5533_s19), 0 }
  0x84   : > { %s2806_s17 = sshll.u32 %s541_s6, 7  ;;  %s51_s28 = ssub.s32 %s3911_s0, %s5535_s19 }
  0x85   : > { %p52_p7 = scmp.eq.s32.totalorder %s51_s28, 0  ;;  %s5500_s16 = sld [smem:[#allocation19_spill]] }
  0x86   : > { %s545_s20 = scalar_lea.vmem [#allocation2], %s2806_s17  ;;  %p4234_p9 = pnand %p3364_p5, %p4210_p6 }
  0x87   : > { %s552_s4 = sshll.u32 %s545_s20, 4  ;;  %s4243_s28 = scalar_lea.sflag [#allocation3], %s541_s6  ;;  %s4241_s4 = int_to_ptr.vmem [resolvable:$true] %s552_s4 }
  0x88   : > { %s4239_s13 = scalar_select %p52_p7, %s3895_s26, %s54_s5  }
  0x89   : > { %p3781_p13 = pneg %p4234_p9 }
  0x8b   : > { %s4230_s22 = scalar_lea.hbm %s5500_s16, %s2837_s18  ;;  %s3784_s10 = scalar_lea.hbm %s5500_s16, 4096 }
  0x8c   : > { %s3779_s18 = scalar_lea.hbm %s4230_s22, 2048  ;;  %p3785_p12 = scmp.lt.u32.totalorder %s4230_s22, %s5500_s16 }
  0x8d   : > { %p3780_p11 = scmp.ne.s32.totalorder %s4230_s22, %s3779_s18  ;;  %p3786_p2 = scmp.lt.u32.totalorder %s3784_s10, %s3779_s18 }
  0x8e   : > { %p3788_p6 = scmp.lt.u32.totalorder %s3779_s18, %s4230_s22 }
  0x8f   : > { %p3782_p1 = pnand %p3781_p13, %p3780_p11  ;;  %p3787_p8 = por %p3786_p2, %p3785_p12 }
  0x91   : > { %p3783_p4 = pneg %p3782_p1  ;;  %p3789_p0 = por %p3788_p6, %p3787_p8 }
  0x93   : > { %p3790_p10 = pnand %p3789_p0, %p3783_p4 }
  0x95   : > { %3793 = shalt.err (!%p3790_p10)
}
  0x96   : > { %s3794_s5 = scalar_lea.vmem %s4241_s4, 2048  ;;  %s3923_s6 = smov [#allocation2]  }
  0x97   : > { %p3795_p5 = scmp.ne.s32.totalorder %s4241_s4, %s3794_s5  ;;  %s3799_s8 = sshll.u32 %s3923_s6, 4  ;;  %s3800_s8 = int_to_ptr.vmem [resolvable:$false] %s3799_s8 }
  0x98   : > { %s3801_s17 = scalar_lea.vmem %s3800_s8, 4096  ;;  %p3802_p1 = scmp.lt.s32.totalorder %s4241_s4, %s3800_s8 }
  0x99   : > { %p3797_p7 = pnand %p3795_p5, %p3781_p13  ;;  %p3803_p12 = scmp.lt.s32.totalorder %s3801_s17, %s3794_s5 }
  0x9b   : > { %p3798_p11 = pneg %p3797_p7  ;;  %p3804_p2 = por %p3803_p12, %p3802_p1 }
  0x9d   : > { %p3805_p8 = pnand %p3804_p2, %p3798_p11 }
  0x9f   : > { %3808 = shalt.err (!%p3805_p8)
}
  0xa0   : > { %s5502_s18 = smov 8   ;;  %s5503_s10 = smov 128  }
  0xa1   : > { %3355 = dma.hbm_to_vmem [thread:$0]  (!%p4234_p9), %s4230_s22, 2048, %s4241_s4, %s4243_s28, %s5503_s10, %s5503_s10, %s5502_s18  }
  0xa2   : > { %p5504_p13 = scmp.ne.s32.totalorder %s5494_s23, 0 }
  0xa3   : > { %s4277_s24 = sand.u32 (!%p5504_p13), 1, %s3891_s25   ;;  %p5505_p4 = scmp.ne.s32.totalorder (!%p5504_p13), %s5491_s21, 0 }
  0xa4   : > { %564 = sbr.rel (%p5504_p13) target bundleno = 2684 (0xa7c), region = 88  ;;  %s2810_s20 = sshll.u32 (!%p5504_p13), %s4277_s24, 7 }
  0xa5   : > { %s567_s5 = scalar_lea.sflag (!%p5504_p13), [#allocation3], %s4277_s24  ;;  %s4281_s6 = scalar_lea.vmem (!%p5504_p13), [#allocation2], %s2810_s20 }
  0xab   : > { %3870 = dma.done.wait (%p5505_p4), %s567_s5, 2048  }
  0xac   : > { %3872 = vsyncadd (%p5505_p4), %s567_s5, 4294965248  ;;  %p5506_p9 = scmp.ne.s32.totalorder %s5489_s1, 0 }
  0xae   : > { %3874 = dma.done.wait (%p5506_p9), [#allocation6], 8192  }
  0xaf   : > { %3876 = vsyncadd (%p5506_p9), [#allocation6], 4294959104 }
  0xb0   : > { %3878 = dma.done.wait (%p5506_p9), [#allocation9], 8192  }
  0xb1   : > { %3880 = vsyncadd (%p5506_p9), [#allocation9], 4294959104  ;;  %s4295_s23 = scalar_lea.vmem [#allocation11], %s2810_s20  ;;  %p2816_p6 = scmp.ne.s32.totalorder %s3899_s27, 0 }
  0xb2   : > { %v641_v0 = vld [vmem:[%s4281_s6] sm:$0xff] (!%p2816_p6)  ;;  %v642_v1 = vld [vmem:[%s4281_s6 + $0x8] sm:$0xff] (!%p2816_p6)  ;;  %v643_v2 = vld [vmem:[%s4281_s6 + $0x10] sm:$0xff] (!%p2816_p6) }
  0xb3   : > { %640 = sbr.rel (%p2816_p6) target bundleno = 187 (0xbb), region = 112  ;;  %657 = vst [vmem:[%s4295_s23] sm:$0xff] (!%p2816_p6), %v641_v0  ;;  %658 = vst [vmem:[%s4295_s23 + $0x8] sm:$0xff] (!%p2816_p6), %v642_v1  ;;  %v644_v3 = vld [vmem:[%s4281_s6 + $0x18] sm:$0xff] (!%p2816_p6)  ;;  %v645_v4 = vld [vmem:[%s4281_s6 + $0x20] sm:$0xff] (!%p2816_p6) }
  0xb4   : > { %659 = vst [vmem:[%s4295_s23 + $0x10] sm:$0xff] (!%p2816_p6), %v643_v2  ;;  %v646_v5 = vld [vmem:[%s4281_s6 + $0x28] sm:$0xff] (!%p2816_p6)  ;;  %660 = vst [vmem:[%s4295_s23 + $0x18] sm:$0xff] (!%p2816_p6), %v644_v3  ;;  %v647_v6 = vld [vmem:[%s4281_s6 + $0x30] sm:$0xff] (!%p2816_p6) }
  0xb5   : > { %661 = vst [vmem:[%s4295_s23 + $0x20] sm:$0xff] (!%p2816_p6), %v645_v4  ;;  %662 = vst [vmem:[%s4295_s23 + $0x28] sm:$0xff] (!%p2816_p6), %v646_v5  ;;  %v648_v7 = vld [vmem:[%s4281_s6 + $0x38] sm:$0xff] (!%p2816_p6)  ;;  %v649_v8 = vld [vmem:[%s4281_s6 + $0x40] sm:$0xff] (!%p2816_p6) }
  0xb6   : > { %663 = vst [vmem:[%s4295_s23 + $0x30] sm:$0xff] (!%p2816_p6), %v647_v6  ;;  %664 = vst [vmem:[%s4295_s23 + $0x38] sm:$0xff] (!%p2816_p6), %v648_v7  ;;  %v650_v9 = vld [vmem:[%s4281_s6 + $0x48] sm:$0xff] (!%p2816_p6)  ;;  %v651_v10 = vld [vmem:[%s4281_s6 + $0x50] sm:$0xff] (!%p2816_p6) }
  0xb7   : > { %665 = vst [vmem:[%s4295_s23 + $0x40] sm:$0xff] (!%p2816_p6), %v649_v8  ;;  %v652_v11 = vld [vmem:[%s4281_s6 + $0x58] sm:$0xff] (!%p2816_p6)  ;;  %666 = vst [vmem:[%s4295_s23 + $0x48] sm:$0xff] (!%p2816_p6), %v650_v9  ;;  %v653_v12 = vld [vmem:[%s4281_s6 + $0x60] sm:$0xff] (!%p2816_p6) }
  0xb8   : > { %667 = vst [vmem:[%s4295_s23 + $0x50] sm:$0xff] (!%p2816_p6), %v651_v10  ;;  %668 = vst [vmem:[%s4295_s23 + $0x58] sm:$0xff] (!%p2816_p6), %v652_v11  ;;  %v654_v13 = vld [vmem:[%s4281_s6 + $0x68] sm:$0xff] (!%p2816_p6)  ;;  %v655_v14 = vld [vmem:[%s4281_s6 + $0x70] sm:$0xff] (!%p2816_p6) }
  0xb9   : > { %669 = vst [vmem:[%s4295_s23 + $0x60] sm:$0xff] (!%p2816_p6), %v653_v12  ;;  %670 = vst [vmem:[%s4295_s23 + $0x68] sm:$0xff] (!%p2816_p6), %v654_v13  ;;  %v656_v15 = vld [vmem:[%s4281_s6 + $0x78] sm:$0xff] (!%p2816_p6) }
  0xba   : > { %671 = vst [vmem:[%s4295_s23 + $0x70] sm:$0xff] %v655_v14  ;;  %672 = vst [vmem:[%s4295_s23 + $0x78] sm:$0xff] %v656_v15 }
  0xbb PF: > { %v673_v16 = vld [vmem:[%s4295_s23] sm:$0xff]  ;;  %v674_v18 = vld [vmem:[%s4295_s23 + $0x8] sm:$0xff]  ;;  %v689_v32 = vlaneseq  ;;  %v3924_v38 = vmov 0.0   ;;  %s4481_s1 = sshll.u32 %s3899_s27, 7  ;;  %s5507_s4 = sld [smem:[#allocation20_spill]] }
  0xbc   : > { %v675_v17 = vld [vmem:[%s4295_s23 + $0x10] sm:$0xff]  ;;  %701 = vadd.xlane.f32.xlu0 %v673_v16  ;;  %v676_v19 = vld [vmem:[%s4295_s23 + $0x18] sm:$0xff]  ;;  %s4484_s21 = scalar_lea.vmem [#allocation5], %s4481_s1  ;;  %s699_s18 = scalar_lea.vmem %s5448_s2, %s3899_s27 }
  0xbd   : > { %705 = vadd.xlane.f32.xlu1 %v675_v17  ;;  %v4335_v20 = vld [vmem:[%s4295_s23 + $0x20] sm:$0xff]  ;;  %v4338_v21 = vld [vmem:[%s4295_s23 + $0x28] sm:$0xff]  ;;  %v4382_v33 = vand.u32 127, %v689_v32  ;;  %s5508_s5 = sld [smem:[#allocation21_spill]]  ;;  %s4896_s12 = scalar_lea.vmem [#allocation8], %s4481_s1 }
  0xbe   : > { %v4343_v22 = vld [vmem:[%s4295_s23 + $0x30] sm:$0xff]  ;;  %v4346_v23 = vld [vmem:[%s4295_s23 + $0x38] sm:$0xff]  ;;  %s5141_s22 = scalar_lea.vmem [#allocation10], %s4481_s1 }
  0xbf   : > { %v4351_v24 = vld [vmem:[%s4295_s23 + $0x40] sm:$0xff]  ;;  %v4354_v25 = vld [vmem:[%s4295_s23 + $0x48] sm:$0xff]  ;;  %vm691_vm0 = vcmp.lt.s32.totalorder %v4382_v33, 16  ;;  %vm694_vm1 = vcmp.lt.s32.totalorder %v4382_v33, 32 }
  0xc0   : > { %703 = vadd.xlane.f32.xlu0 %v674_v18  ;;  %v4359_v26 = vld [vmem:[%s4295_s23 + $0x50] sm:$0xff]  ;;  %v4362_v27 = vld [vmem:[%s4295_s23 + $0x58] sm:$0xff]  ;;  %v4386_v39 = vsel %vm691_vm0, 1.0, %v3924_v38 }
  0xc1   : > { %707 = vadd.xlane.f32.xlu1 %v676_v19  ;;  %v4367_v28 = vld [vmem:[%s4295_s23 + $0x60] sm:$0xff]  ;;  %v4370_v29 = vld [vmem:[%s4295_s23 + $0x68] sm:$0xff]  ;;  %v4375_v30 = vld [vmem:[%s4295_s23 + $0x70] sm:$0xff]  ;;  %s697_s28 = scalar_lea.vmem %s5507_s4, %s3899_s27  ;;  %s5509_s4 = sld [smem:[#allocation22_spill]] }
  0xc2   : > { %v4378_v31 = vld [vmem:[%s4295_s23 + $0x78] sm:$0xff] }
  0xc3   : > { %s987_s6 = scalar_lea.vmem %s5508_s5, %s3899_s27 }
  0xc4   : > { %709 = vadd.xlane.f32.xlu0 %v4335_v20 }
  0xc5   : > { %711 = vadd.xlane.f32.xlu1 %v4338_v21 }
  0xc8   : > { %713 = vadd.xlane.f32.xlu0 %v4343_v22 }
  0xc9   : > { %715 = vadd.xlane.f32.xlu1 %v4346_v23 }
  0xcc   : > { %717 = vadd.xlane.f32.xlu0 %v4351_v24 }
  0xcd   : > { %719 = vadd.xlane.f32.xlu1 %v4354_v25 }
  0xd0   : > { %721 = vadd.xlane.f32.xlu0 %v4359_v26 }
  0xd1   : > { %723 = vadd.xlane.f32.xlu1 %v4362_v27 }
  0xd4   : > { %725 = vadd.xlane.f32.xlu0 %v4367_v28 }
  0xd5   : > { %727 = vadd.xlane.f32.xlu1 %v4370_v29 }
  0xd8   : > { %729 = vadd.xlane.f32.xlu0 %v4375_v30 }
  0xd9   : > { %731 = vadd.xlane.f32.xlu1 %v4378_v31 }
 0x149   : > { %v702_v34 = vpop.xlane.xlu0 %701 }
 0x14a   : > { %v706_v35 = vpop.xlane.xlu1 %705  ;;  %v733_v36 = vmul.f32 0.0625, %v702_v34 }
 0x14b   : > { %v735_v37 = vmul.f32 0.0625, %v706_v35 }
 0x14c   : > { %v749_v40 = vsub.f32 %v673_v16, %v733_v36 }
 0x14d   : > { %v751_v41 = vsub.f32 %v675_v17, %v735_v37  ;;  %v704_v42 = vpop.xlane.xlu0 %703 }
 0x14e   : > { %v708_v43 = vpop.xlane.xlu1 %707  ;;  %v734_v44 = vmul.f32 0.0625, %v704_v42  ;;  %v4389_v46 = vmul.f32 %v4386_v39, %v749_v40 }
 0x14f   : > { %v736_v45 = vmul.f32 0.0625, %v708_v43  ;;  %v4392_v47 = vmul.f32 %v4386_v39, %v751_v41 }
 0x150   : > { %v750_v48 = vsub.f32 %v674_v18, %v734_v44  ;;  %v781_v50 = vmul.f32 %v4389_v46, %v4389_v46 }
 0x151   : > { %v752_v49 = vsub.f32 %v676_v19, %v736_v45  ;;  %v710_v51 = vpop.xlane.xlu0 %709  ;;  %v783_v53 = vmul.f32 %v4392_v47, %v4392_v47 }
 0x152   : > { %v712_v52 = vpop.xlane.xlu1 %711  ;;  %v737_v54 = vmul.f32 0.0625, %v710_v51  ;;  %797 = vadd.xlane.f32.xlu0 %v781_v50  ;;  %v4399_v56 = vmul.f32 %v4386_v39, %v750_v48 }
 0x153   : > { %v738_v55 = vmul.f32 0.0625, %v712_v52  ;;  %v4402_v57 = vmul.f32 %v4386_v39, %v752_v49 }
 0x154   : > { %v753_v58 = vsub.f32 %v4335_v20, %v737_v54  ;;  %v782_v60 = vmul.f32 %v4399_v56, %v4399_v56 }
 0x155   : > { %v754_v59 = vsub.f32 %v4338_v21, %v738_v55  ;;  %v714_v61 = vpop.xlane.xlu0 %713  ;;  %v784_v63 = vmul.f32 %v4402_v57, %v4402_v57 }
 0x156   : > { %v716_v62 = vpop.xlane.xlu1 %715  ;;  %v739_v0 = vmul.f32 0.0625, %v714_v61  ;;  %801 = vadd.xlane.f32.xlu0 %v783_v53  ;;  %799 = vadd.xlane.f32.xlu1 %v782_v60  ;;  %v4411_v2 = vmul.f32 %v4386_v39, %v753_v58  ;;  %v972_v60 = vld [vmem:[%s4484_s21 + $0x8] sm:$0xff]  ;;  %v973_v61 = vld [vmem:[%s4484_s21 + $0x10] sm:$0xff] }
 0x157   : > { %v740_v1 = vmul.f32 0.0625, %v716_v62  ;;  %v4414_v3 = vmul.f32 %v4386_v39, %v754_v59 }
 0x158   : > { %v755_v4 = vsub.f32 %v4343_v22, %v739_v0  ;;  %v785_v6 = vmul.f32 %v4411_v2, %v4411_v2 }
 0x159   : > { %v756_v5 = vsub.f32 %v4346_v23, %v740_v1  ;;  %v718_v7 = vpop.xlane.xlu0 %717  ;;  %v786_v9 = vmul.f32 %v4414_v3, %v4414_v3  ;;  %v975_v1 = vld [vmem:[%s4484_s21 + $0x20] sm:$0xff] }
 0x15a   : > { %v720_v8 = vpop.xlane.xlu1 %719  ;;  %v741_v10 = vmul.f32 0.0625, %v718_v7  ;;  %803 = vadd.xlane.f32.xlu1 %v784_v63  ;;  %805 = vadd.xlane.f32.xlu0 %v785_v6  ;;  %v4423_v12 = vmul.f32 %v4386_v39, %v755_v4  ;;  %v974_v63 = vld [vmem:[%s4484_s21 + $0x18] sm:$0xff]  ;;  %v976_v4 = vld [vmem:[%s4484_s21 + $0x28] sm:$0xff]  ;;  %v977_v6 = vld [vmem:[%s4484_s21 + $0x30] sm:$0xff] }
 0x15b   : > { %v742_v11 = vmul.f32 0.0625, %v720_v8  ;;  %v4426_v13 = vmul.f32 %v4386_v39, %v756_v5  ;;  %v3195_v0 = vpack.c.bf16 %v974_v63, %v973_v61  ;;  %v3199_v5 = vpack.c.bf16 %v976_v4, %v975_v1  ;;  %v978_v7 = vld [vmem:[%s4484_s21 + $0x38] sm:$0xff] }
 0x15c   : > { %v757_v14 = vsub.f32 %v4351_v24, %v741_v10  ;;  %v787_v16 = vmul.f32 %v4423_v12, %v4423_v12  ;;  %v3203_v8 = vpack.c.bf16 %v978_v7, %v977_v6  ;;  %v980_v10 = vld [vmem:[%s4484_s21 + $0x48] sm:$0xff] }
 0x15d   : > { %v758_v15 = vsub.f32 %v4354_v25, %v742_v11  ;;  %v722_v17 = vpop.xlane.xlu0 %721  ;;  %v788_v19 = vmul.f32 %v4426_v13, %v4426_v13 }
 0x15e   : > { %v724_v18 = vpop.xlane.xlu1 %723  ;;  %v743_v20 = vmul.f32 0.0625, %v722_v17  ;;  %807 = vadd.xlane.f32.xlu1 %v786_v9  ;;  %809 = vadd.xlane.f32.xlu0 %v787_v16  ;;  %v4435_v22 = vmul.f32 %v4386_v39, %v757_v14  ;;  %v979_v9 = vld [vmem:[%s4484_s21 + $0x40] sm:$0xff]  ;;  %v981_v14 = vld [vmem:[%s4484_s21 + $0x50] sm:$0xff] }
 0x15f   : > { %v744_v21 = vmul.f32 0.0625, %v724_v18  ;;  %v4438_v23 = vmul.f32 %v4386_v39, %v758_v15  ;;  %v3207_v11 = vpack.c.bf16 %v980_v10, %v979_v9  ;;  %v982_v15 = vld [vmem:[%s4484_s21 + $0x58] sm:$0xff]  ;;  %v983_v17 = vld [vmem:[%s4484_s21 + $0x60] sm:$0xff]  ;;  %v984_v18 = vld [vmem:[%s4484_s21 + $0x68] sm:$0xff] }
 0x160   : > { %v759_v24 = vsub.f32 %v4359_v26, %v743_v20  ;;  %v789_v32 = vmul.f32 %v4435_v22, %v4435_v22  ;;  %v3211_v16 = vpack.c.bf16 %v982_v15, %v981_v14 }
 0x161   : > { %v760_v25 = vsub.f32 %v4362_v27, %v744_v21  ;;  %v726_v34 = vpop.xlane.xlu0 %725  ;;  %v790_v36 = vmul.f32 %v4438_v23, %v4438_v23 }
 0x162   : > { %v728_v35 = vpop.xlane.xlu1 %727  ;;  %v745_v37 = vmul.f32 0.0625, %v726_v34  ;;  %811 = vadd.xlane.f32.xlu1 %v788_v19  ;;  %813 = vadd.xlane.f32.xlu0 %v789_v32  ;;  %v4447_v41 = vmul.f32 %v4386_v39, %v759_v24  ;;  %v3215_v19 = vpack.c.bf16 %v984_v18, %v983_v17 }
 0x163   : > { %v746_v40 = vmul.f32 0.0625, %v728_v35  ;;  %v4450_v42 = vmul.f32 %v4386_v39, %v760_v25 }
 0x164   : > { %v761_v26 = vsub.f32 %v4367_v28, %v745_v37  ;;  %v791_v43 = vmul.f32 %v4447_v41, %v4447_v41 }
 0x165   : > { %v762_v27 = vsub.f32 %v4370_v29, %v746_v40  ;;  %v730_v44 = vpop.xlane.xlu0 %729  ;;  %v792_v48 = vmul.f32 %v4450_v42, %v4450_v42 }
 0x166   : > { %v732_v45 = vpop.xlane.xlu1 %731  ;;  %v747_v49 = vmul.f32 0.0625, %v730_v44  ;;  %815 = vadd.xlane.f32.xlu1 %v790_v36  ;;  %817 = vadd.xlane.f32.xlu0 %v791_v43  ;;  %v4459_v51 = vmul.f32 %v4386_v39, %v761_v26 }
 0x167   : > { %v748_v50 = vmul.f32 0.0625, %v732_v45  ;;  %v4462_v28 = vmul.f32 %v4386_v39, %v762_v27 }
 0x168   : > { %v763_v29 = vsub.f32 %v4375_v30, %v747_v49  ;;  %v793_v53 = vmul.f32 %v4459_v51, %v4459_v51 }
 0x169   : > { %v764_v52 = vsub.f32 %v4378_v31, %v748_v50  ;;  %v794_v54 = vmul.f32 %v4462_v28, %v4462_v28  ;;  %v971_v31 = vld [vmem:[%s4484_s21] sm:$0xff] }
 0x16a   : > { %819 = vadd.xlane.f32.xlu1 %v792_v48  ;;  %821 = vadd.xlane.f32.xlu0 %v793_v53  ;;  %v4471_v55 = vmul.f32 %v4386_v39, %v763_v29  ;;  %v3191_v62 = vpack.c.bf16 %v972_v60, %v971_v31  ;;  %v4511_v31 = vld [vmem:[%s699_s18] ss:$0 sm:$0xff]  ;;  %s5510_s18 = sld [smem:[#allocation23_spill]] }
 0x16b   : > { %v4474_v58 = vmul.f32 %v4386_v39, %v764_v52 }
 0x16c   : > { %v795_v59 = vmul.f32 %v4471_v55, %v4471_v55  ;;  %3192 = vmatprep.subr.bf16.mxu0 %v3191_v62 }
 0x16d   : > { %v796_v30 = vmul.f32 %v4474_v58, %v4474_v58  ;;  %3194 = vmatpush3.bf16.msra.mxu0 %v3191_v62 }
 0x16e   : > { %823 = vadd.xlane.f32.xlu1 %v794_v54  ;;  %825 = vadd.xlane.f32.xlu0 %v795_v59  ;;  %v4508_v54 = vld [vmem:[%s697_s28] ss:$0 sm:$0xff]  ;;  %s1220_s28 = scalar_lea.vmem %s5509_s4, %s3899_s27 }
 0x16f   : > { %3196 = vmatprep.subr.bf16.mxu0 %v3195_v0 }
 0x170   : > { %s1222_s10 = scalar_lea.vmem %s5510_s18, %s3899_s27  ;;  %s2643_s18 = scalar_lea.sflag [#allocation4], %s4277_s24 }
 0x171   : > { %3198 = vmatpush3.bf16.msra.mxu0 %v3195_v0 }
 0x172   : > { %827 = vadd.xlane.f32.xlu1 %v796_v30  ;;  %3200 = vmatprep.subr.bf16.mxu0 %v3199_v5 }
 0x175   : > { %3202 = vmatpush3.bf16.msra.mxu0 %v3199_v5 }
 0x176   : > { %3204 = vmatprep.subr.bf16.mxu0 %v3203_v8 }
 0x179   : > { %3206 = vmatpush3.bf16.msra.mxu0 %v3203_v8  ;;  %v986_v8 = vld [vmem:[%s4484_s21 + $0x78] sm:$0xff] }
 0x17a   : > { %3208 = vmatprep.subr.bf16.mxu0 %v3207_v11 }
 0x17d   : > { %3210 = vmatpush3.bf16.msra.mxu0 %v3207_v11 }
 0x17e   : > { %3212 = vmatprep.subr.bf16.mxu0 %v3211_v16 }
 0x181   : > { %3214 = vmatpush3.bf16.msra.mxu0 %v3211_v16 }
 0x182   : > { %3216 = vmatprep.subr.bf16.mxu0 %v3215_v19 }
 0x185   : > { %3218 = vmatpush3.bf16.msra.mxu0 %v3215_v19 }
 0x1df   : > { %v798_v20 = vpop.xlane.xlu0 %797 }
 0x1e0   : > { %v829_v21 = vmul.f32 0.0625, %v798_v20 }
 0x1e2   : > { %v845_v24 = vadd.f32 1e-05, %v829_v21 }
 0x1e3   : > { %v800_v25 = vpop.xlane.xlu1 %799  ;;  %v802_v32 = vpop.xlane.xlu0 %801 }
 0x1e4   : > { %3443 = vrsqrt.f32 %v845_v24  ;;  %v830_v34 = vmul.f32 0.0625, %v800_v25  ;;  %v831_v35 = vmul.f32 0.0625, %v802_v32 }
 0x1e6   : > { %v846_v36 = vadd.f32 1e-05, %v830_v34  ;;  %v847_v37 = vadd.f32 1e-05, %v831_v35 }
 0x1e7   : > { %v804_v40 = vpop.xlane.xlu1 %803  ;;  %v806_v26 = vpop.xlane.xlu0 %805 }
 0x1e8   : > { %3445 = vrsqrt.f32 %v846_v36  ;;  %v832_v27 = vmul.f32 0.0625, %v804_v40  ;;  %v833_v43 = vmul.f32 0.0625, %v806_v26 }
 0x1e9   : > { %3447 = vrsqrt.f32 %v847_v37 }
 0x1ea   : > { %v848_v44 = vadd.f32 1e-05, %v832_v27  ;;  %v849_v45 = vadd.f32 1e-05, %v833_v43 }
 0x1eb   : > { %v808_v48 = vpop.xlane.xlu1 %807  ;;  %v810_v49 = vpop.xlane.xlu0 %809 }
 0x1ec   : > { %3449 = vrsqrt.f32 %v848_v44  ;;  %v834_v50 = vmul.f32 0.0625, %v808_v48  ;;  %v835_v53 = vmul.f32 0.0625, %v810_v49 }
 0x1ed   : > { %3451 = vrsqrt.f32 %v849_v45 }
 0x1ee   : > { %v3444_v29 = vpop.eup %3443  ;;  %v850_v52 = vadd.f32 1e-05, %v834_v50  ;;  %v851_v62 = vadd.f32 1e-05, %v835_v53 }
 0x1ef   : > { %v812_v59 = vpop.xlane.xlu1 %811  ;;  %v877_v30 = vmul.f32 %v3444_v29, %v4389_v46  ;;  %v814_v1 = vpop.xlane.xlu0 %813  ;;  %v985_v46 = vld [vmem:[%s4484_s21 + $0x70] sm:$0xff]  ;;  %s4633_s21 = scalar_lea.vmem [#allocation7], %s4481_s1  ;;  %s2656_s1 = sshll.u32 %s4295_s23, 4  ;;  %s5389_s1 = int_to_ptr.vmem [resolvable:$true] %s2656_s1 }
 0x1f0   : > { %3453 = vrsqrt.f32 %v850_v52  ;;  %v836_v63 = vmul.f32 0.0625, %v812_v59  ;;  %v837_v11 = vmul.f32 0.0625, %v814_v1  ;;  %v3219_v14 = vpack.c.bf16 %v986_v8, %v985_v46 }
 0x1f1   : > { %v899_v60 = vmul.f32 %v4508_v54, %v877_v30  ;;  %3455 = vrsqrt.f32 %v851_v62 }
 0x1f2   : > { %v3446_v61 = vpop.eup %3445  ;;  %v852_v10 = vadd.f32 1e-05, %v836_v63  ;;  %3220 = vmatprep.subr.bf16.mxu0 %v3219_v14 }
 0x1f3   : > { %v3448_v0 = vpop.eup %3447  ;;  %v921_v4 = vadd.f32 %v4511_v31, %v899_v60  ;;  %v878_v5 = vmul.f32 %v3446_v61, %v4399_v56  ;;  %v816_v15 = vpop.xlane.xlu1 %815  ;;  %3222 = vmatpush3.bf16.msra.mxu0 %v3219_v14 }
 0x1f4   : > { %v879_v6 = vmul.f32 %v3448_v0, %v4392_v47  ;;  %3457 = vrsqrt.f32 %v852_v10  ;;  %v853_v47 = vadd.f32 1e-05, %v837_v11  ;;  %v838_v19 = vmul.f32 0.0625, %v816_v15  ;;  %v818_v20 = vpop.xlane.xlu0 %817 }
 0x1f5   : > { %937 = vxpose.xlu0.b32.start [1/16] %v921_v4, 128  ;;  %v900_v7 = vmul.f32 %v4508_v54, %v878_v5  ;;  %v839_v35 = vmul.f32 0.0625, %v818_v20 }
 0x1f6   : > { %v3450_v9 = vpop.eup %3449  ;;  %v901_v17 = vmul.f32 %v4508_v54, %v879_v6  ;;  %3459 = vrsqrt.f32 %v853_v47  ;;  %v854_v34 = vadd.f32 1e-05, %v838_v19 }
 0x1f7   : > { %v922_v16 = vadd.f32 %v4511_v31, %v900_v7  ;;  %v880_v18 = vmul.f32 %v3450_v9, %v4402_v57  ;;  %v3452_v56 = vpop.eup %3451  ;;  %v820_v57 = vpop.xlane.xlu1 %819  ;;  %v855_v27 = vadd.f32 1e-05, %v839_v35 }
 0x1f8   : > { %v923_v21 = vadd.f32 %v4511_v31, %v901_v17  ;;  %v881_v25 = vmul.f32 %v3452_v56, %v4411_v2  ;;  %3461 = vrsqrt.f32 %v854_v34  ;;  %v840_v43 = vmul.f32 0.0625, %v820_v57  ;;  %v822_v44 = vpop.xlane.xlu0 %821 }
 0x1f9   : > { %938 = vxpose.xlu0.b32.cont [2/16] %v922_v16, 128  ;;  %v902_v24 = vmul.f32 %v4508_v54, %v880_v18  ;;  %3463 = vrsqrt.f32 %v855_v27  ;;  %v841_v29 = vmul.f32 0.0625, %v822_v44 }
 0x1fa   : > { %v3454_v32 = vpop.eup %3453  ;;  %v903_v37 = vmul.f32 %v4508_v54, %v881_v25  ;;  %v856_v50 = vadd.f32 1e-05, %v840_v43 }
 0x1fb   : > { %v924_v36 = vadd.f32 %v4511_v31, %v902_v24  ;;  %v882_v40 = vmul.f32 %v3454_v32, %v4414_v3  ;;  %v3456_v26 = vpop.eup %3455  ;;  %v824_v52 = vpop.xlane.xlu1 %823  ;;  %v857_v60 = vadd.f32 1e-05, %v841_v29 }
 0x1fc   : > { %v925_v2 = vadd.f32 %v4511_v31, %v903_v37  ;;  %v883_v48 = vmul.f32 %v3456_v26, %v4423_v12  ;;  %3465 = vrsqrt.f32 %v856_v50  ;;  %v842_v61 = vmul.f32 0.0625, %v824_v52  ;;  %v826_v62 = vpop.xlane.xlu0 %825 }
 0x1fd   : > { %939 = vxpose.xlu0.b32.cont [3/16] %v923_v21, 128  ;;  %v904_v45 = vmul.f32 %v4508_v54, %v882_v40  ;;  %3467 = vrsqrt.f32 %v857_v60  ;;  %v843_v5 = vmul.f32 0.0625, %v826_v62 }
 0x1fe   : > { %v3458_v49 = vpop.eup %3457  ;;  %v905_v53 = vmul.f32 %v4508_v54, %v883_v48  ;;  %v858_v4 = vadd.f32 1e-05, %v842_v61 }
 0x1ff   : > { %v926_v3 = vadd.f32 %v4511_v31, %v904_v45  ;;  %v884_v59 = vmul.f32 %v3458_v49, %v4426_v13  ;;  %v828_v6 = vpop.xlane.xlu1 %827  ;;  %v859_v9 = vadd.f32 1e-05, %v843_v5 }
 0x200   : > { %v3460_v30 = vpop.eup %3459  ;;  %v927_v12 = vadd.f32 %v4511_v31, %v905_v53  ;;  %3469 = vrsqrt.f32 %v858_v4  ;;  %v844_v10 = vmul.f32 0.0625, %v828_v6 }
 0x201   : > { %940 = vxpose.xlu0.b32.cont [4/16] %v924_v36, 128  ;;  %v906_v63 = vmul.f32 %v4508_v54, %v884_v59  ;;  %v885_v0 = vmul.f32 %v3460_v30, %v4435_v22  ;;  %3471 = vrsqrt.f32 %v859_v9  ;;  %v4566_v59 = vld [vmem:[%s987_s6] ss:$0 sm:$0xff]  ;;  %s5511_s6 = sld [smem:[#allocation24_spill]] }
 0x202   : > { %v3462_v1 = vpop.eup %3461  ;;  %v860_v16 = vadd.f32 1e-05, %v844_v10 }
 0x203   : > { %v928_v13 = vadd.f32 %v4511_v31, %v906_v63  ;;  %v907_v7 = vmul.f32 %v4508_v54, %v885_v0  ;;  %v886_v46 = vmul.f32 %v3462_v1, %v4438_v23  ;;  %v3464_v8 = vpop.eup %3463 }
 0x204   : > { %v887_v14 = vmul.f32 %v3464_v8, %v4447_v41  ;;  %3473 = vrsqrt.f32 %v860_v16 }
 0x205   : > { %941 = vxpose.xlu0.b32.cont [5/16] %v925_v2, 128  ;;  %v929_v11 = vadd.f32 %v4511_v31, %v907_v7  ;;  %v908_v22 = vmul.f32 %v4508_v54, %v886_v46 }
 0x206   : > { %v3466_v15 = vpop.eup %3465  ;;  %v909_v18 = vmul.f32 %v4508_v54, %v887_v14 }
 0x207   : > { %v930_v17 = vadd.f32 %v4511_v31, %v908_v22  ;;  %v888_v23 = vmul.f32 %v3466_v15, %v4450_v42  ;;  %v3468_v56 = vpop.eup %3467 }
 0x208   : > { %v931_v47 = vadd.f32 %v4511_v31, %v909_v18  ;;  %v889_v20 = vmul.f32 %v3468_v56, %v4459_v51 }
 0x209   : > { %942 = vxpose.xlu0.b32.cont [6/16] %v926_v3, 128  ;;  %v910_v19 = vmul.f32 %v4508_v54, %v888_v23 }
 0x20a   : > { %v3470_v41 = vpop.eup %3469  ;;  %v911_v24 = vmul.f32 %v4508_v54, %v889_v20 }
 0x20b   : > { %v932_v21 = vadd.f32 %v4511_v31, %v910_v19  ;;  %v890_v25 = vmul.f32 %v3470_v41, %v4462_v28  ;;  %v3472_v32 = vpop.eup %3471 }
 0x20c   : > { %v933_v42 = vadd.f32 %v4511_v31, %v911_v24  ;;  %v891_v35 = vmul.f32 %v3472_v32, %v4471_v55 }
 0x20d   : > { %943 = vxpose.xlu0.b32.cont [7/16] %v927_v12, 128  ;;  %v912_v34 = vmul.f32 %v4508_v54, %v890_v25 }
 0x20e   : > { %v3474_v57 = vpop.eup %3473  ;;  %v913_v36 = vmul.f32 %v4508_v54, %v891_v35 }
 0x20f   : > { %v934_v51 = vadd.f32 %v4511_v31, %v912_v34  ;;  %v892_v37 = vmul.f32 %v3474_v57, %v4474_v58 }
 0x210   : > { %v935_v40 = vadd.f32 %v4511_v31, %v913_v36 }
 0x211   : > { %944 = vxpose.xlu0.b32.cont [8/16] %v928_v13, 128  ;;  %v914_v28 = vmul.f32 %v4508_v54, %v892_v37 }
 0x213   : > { %v936_v26 = vadd.f32 %v4511_v31, %v914_v28 }
 0x215   : > { %945 = vxpose.xlu0.b32.cont [9/16] %v929_v11, 128 }
 0x219   : > { %946 = vxpose.xlu0.b32.cont [10/16] %v930_v17, 128 }
 0x21d   : > { %947 = vxpose.xlu0.b32.cont [11/16] %v931_v47, 128 }
 0x221   : > { %948 = vxpose.xlu0.b32.cont [12/16] %v932_v21, 128 }
 0x225   : > { %949 = vxpose.xlu0.b32.cont [13/16] %v933_v42, 128 }
 0x229   : > { %950 = vxpose.xlu0.b32.cont [14/16] %v934_v51, 128 }
 0x22d   : > { %951 = vxpose.xlu0.b32.cont [15/16] %v935_v40, 128 }
 0x231   : > { %952 = vxpose.xlu0.b32.end [16/16] %v936_v26, 128 }
 0x275   : > { %v953_v27 = vpop.trf.xlu0 }
 0x276   : > { %2999 = vmatprep.mubr.f32.mxu0 %v953_v27 }
 0x279   : > { %v954_v55 = vpop.trf.xlu0 }
 0x27a   : > { %3000 = vmatmul.mubr.f32.vlgmr.msra.gmra.mrb[0].mxu0 %v954_v55 }
 0x27d   : > { %v955_v43 = vpop.trf.xlu0 }
 0x27e   : > { %3002 = vmatprep.mubr.f32.mxu0 %v955_v43 }
 0x281   : > { %v956_v44 = vpop.trf.xlu0 }
 0x282   : > { %3003 = vmatmul.mubr.f32.gmra.mrb[2].mxu0 %v956_v44 }
 0x285   : > { %v957_v2 = vpop.trf.xlu0 }
 0x286   : > { %3005 = vmatprep.mubr.f32.mxu0 %v957_v2 }
 0x289   : > { %v958_v58 = vpop.trf.xlu0 }
 0x28a   : > { %3006 = vmatmul.mubr.f32.gmra.mrb[4].mxu0 %v958_v58 }
 0x28d   : > { %v959_v45 = vpop.trf.xlu0 }
 0x28e   : > { %3008 = vmatprep.mubr.f32.mxu0 %v959_v45 }
 0x291   : > { %v960_v48 = vpop.trf.xlu0 }
 0x292   : > { %3009 = vmatmul.mubr.f32.gmra.mrb[6].mxu0 %v960_v48 }
 0x295   : > { %v961_v54 = vpop.trf.xlu0 }
 0x296   : > { %3011 = vmatprep.mubr.f32.mxu0 %v961_v54 }
 0x299   : > { %v962_v31 = vpop.trf.xlu0 }
 0x29a   : > { %3012 = vmatmul.mubr.f32.gmra.mrb[8].mxu0 %v962_v31 }
 0x29d   : > { %v963_v49 = vpop.trf.xlu0 }
 0x29e   : > { %3014 = vmatprep.mubr.f32.mxu0 %v963_v49 }
 0x2a1   : > { %v964_v50 = vpop.trf.xlu0 }
 0x2a2   : > { %3015 = vmatmul.mubr.f32.gmra.mrb[10].mxu0 %v964_v50 }
 0x2a5   : > { %v965_v29 = vpop.trf.xlu0 }
 0x2a6   : > { %3017 = vmatprep.mubr.f32.mxu0 %v965_v29 }
 0x2a9   : > { %v966_v52 = vpop.trf.xlu0 }
 0x2aa   : > { %3018 = vmatmul.mubr.f32.gmra.mrb[12].mxu0 %v966_v52 }
 0x2ad   : > { %v967_v3 = vpop.trf.xlu0 }
 0x2ae   : > { %3020 = vmatprep.mubr.f32.mxu0 %v967_v3 }
 0x2b1   : > { %v968_v53 = vpop.trf.xlu0 }
 0x2b2   : > { %3021 = vmatmul.mubr.f32.gmra.mrb[14].mxu0 %v968_v53 }
 0x34d   : > { %v3001_v30 = vpop.f32.mrb[0].mxu0 }
 0x34e   : > { %v1067_v60 = vadd.f32 %v3001_v30, %v4566_v59  ;;  %v1061_v61 = vpop.f32.mrb[1].mxu0 }
 0x34f   : > { %v1062_v62 = vadd.f32 %v4566_v59, %v1061_v61 }
 0x350   : > { %v1157_v12 = vmul.f32 0.70710677, %v1067_v60  ;;  %v1141_v8 = vmul.f32 0.5, %v1067_v60 }
 0x351   : > { %v1156_v63 = vmul.f32 0.70710677, %v1062_v62  ;;  %v1140_v18 = vmul.f32 0.5, %v1062_v62 }
 0x352   : > { %3475 = verf.f32 %v1157_v12 }
 0x353   : > { %3477 = verf.f32 %v1156_v63 }
 0x355   : > { %v3004_v0 = vpop.f32.mrb[2].mxu0 }
 0x356   : > { %v1077_v1 = vadd.f32 %v3004_v0, %v4566_v59  ;;  %v1071_v4 = vpop.f32.mrb[3].mxu0 }
 0x357   : > { %v1072_v5 = vadd.f32 %v4566_v59, %v1071_v4 }
 0x358   : > { %v1159_v6 = vmul.f32 0.70710677, %v1077_v1  ;;  %v1143_v20 = vmul.f32 0.5, %v1077_v1 }
 0x359   : > { %v1158_v13 = vmul.f32 0.70710677, %v1072_v5  ;;  %v1142_v57 = vmul.f32 0.5, %v1072_v5 }
 0x35a   : > { %3479 = verf.f32 %v1159_v6 }
 0x35b   : > { %3481 = verf.f32 %v1158_v13 }
 0x35c   : > { %v3476_v7 = vpop.eup %3475 }
 0x35d   : > { %v3478_v46 = vpop.eup %3477  ;;  %v3007_v9 = vpop.f32.mrb[4].mxu0  ;;  %v1189_v10 = vadd.f32 1.0, %v3476_v7 }
 0x35e   : > { %v1087_v11 = vadd.f32 %v3007_v9, %v4566_v59  ;;  %v1081_v22 = vpop.f32.mrb[5].mxu0  ;;  %v1188_v16 = vadd.f32 1.0, %v3478_v46 }
 0x35f   : > { %v1082_v14 = vadd.f32 %v4566_v59, %v1081_v22  ;;  %v4574_v15 = vmul.f32 %v1189_v10, %v1141_v8 }
 0x360   : > { %v1161_v17 = vmul.f32 0.70710677, %v1087_v11  ;;  %v4577_v56 = vmul.f32 %v1188_v16, %v1140_v18  ;;  %v1145_v28 = vmul.f32 0.5, %v1087_v11 }
 0x361   : > { %v1160_v23 = vmul.f32 0.70710677, %v1082_v14  ;;  %1226 = vadd.xlane.f32.xlu1 %v4574_v15  ;;  %v1144_v48 = vmul.f32 0.5, %v1082_v14 }
 0x362   : > { %3483 = verf.f32 %v1161_v17 }
 0x363   : > { %3485 = verf.f32 %v1160_v23 }
 0x364   : > { %v3480_v47 = vpop.eup %3479 }
 0x365   : > { %v3482_v19 = vpop.eup %3481  ;;  %1224 = vadd.xlane.f32.xlu1 %v4577_v56  ;;  %v3010_v41 = vpop.f32.mrb[6].mxu0  ;;  %v1191_v21 = vadd.f32 1.0, %v3480_v47 }
 0x366   : > { %v1097_v24 = vadd.f32 %v3010_v41, %v4566_v59  ;;  %v1091_v25 = vpop.f32.mrb[7].mxu0  ;;  %v1190_v34 = vadd.f32 1.0, %v3482_v19 }
 0x367   : > { %v1092_v32 = vadd.f32 %v4566_v59, %v1091_v25  ;;  %v4582_v42 = vmul.f32 %v1191_v21, %v1143_v20 }
 0x368   : > { %v1163_v35 = vmul.f32 0.70710677, %v1097_v24  ;;  %v4585_v36 = vmul.f32 %v1190_v34, %v1142_v57  ;;  %v1147_v29 = vmul.f32 0.5, %v1097_v24 }
 0x369   : > { %v1162_v51 = vmul.f32 0.70710677, %v1092_v32  ;;  %1230 = vadd.xlane.f32.xlu1 %v4582_v42  ;;  %v1146_v63 = vmul.f32 0.5, %v1092_v32 }
 0x36a   : > { %3487 = verf.f32 %v1163_v35 }
 0x36b   : > { %3489 = verf.f32 %v1162_v51 }
 0x36c   : > { %v3484_v37 = vpop.eup %3483 }
 0x36d   : > { %v3486_v40 = vpop.eup %3485  ;;  %1228 = vadd.xlane.f32.xlu1 %v4585_v36  ;;  %v3013_v26 = vpop.f32.mrb[8].mxu0  ;;  %v1193_v27 = vadd.f32 1.0, %v3484_v37 }
 0x36e   : > { %v1107_v55 = vadd.f32 %v3013_v26, %v4566_v59  ;;  %v1101_v43 = vpop.f32.mrb[9].mxu0  ;;  %v1192_v58 = vadd.f32 1.0, %v3486_v40 }
 0x36f   : > { %v1102_v44 = vadd.f32 %v4566_v59, %v1101_v43  ;;  %v4590_v2 = vmul.f32 %v1193_v27, %v1145_v28 }
 0x370   : > { %v1165_v45 = vmul.f32 0.70710677, %v1107_v55  ;;  %v4593_v31 = vmul.f32 %v1192_v58, %v1144_v48  ;;  %v1149_v6 = vmul.f32 0.5, %v1107_v55 }
 0x371   : > { %v1164_v54 = vmul.f32 0.70710677, %v1102_v44  ;;  %1234 = vadd.xlane.f32.xlu1 %v4590_v2  ;;  %v1148_v14 = vmul.f32 0.5, %v1102_v44 }
 0x372   : > { %3491 = verf.f32 %v1165_v45 }
 0x373   : > { %3493 = verf.f32 %v1164_v54 }
 0x374   : > { %v3488_v49 = vpop.eup %3487 }
 0x375   : > { %v3490_v50 = vpop.eup %3489  ;;  %1232 = vadd.xlane.f32.xlu1 %v4593_v31  ;;  %v3016_v52 = vpop.f32.mrb[10].mxu0  ;;  %v1195_v3 = vadd.f32 1.0, %v3488_v49 }
 0x376   : > { %v1117_v53 = vadd.f32 %v3016_v52, %v4566_v59  ;;  %v1111_v30 = vpop.f32.mrb[11].mxu0  ;;  %v1194_v62 = vadd.f32 1.0, %v3490_v50  ;;  %v1461_v52 = vld [vmem:[%s4633_s21] sm:$0xff] }
 0x377   : > { %v1112_v60 = vadd.f32 %v4566_v59, %v1111_v30  ;;  %v4598_v61 = vmul.f32 %v1195_v3, %v1147_v29  ;;  %v1462_v3 = vld [vmem:[%s4633_s21 + $0x8] sm:$0xff] }
 0x378   : > { %v1167_v12 = vmul.f32 0.70710677, %v1117_v53  ;;  %v4601_v1 = vmul.f32 %v1194_v62, %v1146_v63  ;;  %v1151_v47 = vmul.f32 0.5, %v1117_v53  ;;  %v1463_v53 = vld [vmem:[%s4633_s21 + $0x10] sm:$0xff]  ;;  %v3223_v30 = vpack.c.bf16 %v1462_v3, %v1461_v52 }
 0x379   : > { %v1166_v0 = vmul.f32 0.70710677, %v1112_v60  ;;  %1238 = vadd.xlane.f32.xlu1 %v4598_v61  ;;  %v1150_v35 = vmul.f32 0.5, %v1112_v60  ;;  %v1464_v60 = vld [vmem:[%s4633_s21 + $0x18] sm:$0xff] }
 0x37a   : > { %3495 = verf.f32 %v1167_v12  ;;  %v3227_v62 = vpack.c.bf16 %v1464_v60, %v1463_v53  ;;  %3224 = vmatprep.subr.bf16.mxu1 %v3223_v30 }
 0x37b   : > { %3497 = verf.f32 %v1166_v0  ;;  %3226 = vmatpush3.bf16.msra.mxu1 %v3223_v30  ;;  %v4641_v0 = vsel %vm694_vm1, 1.0, %v3924_v38 }
 0x37c   : > { %v3492_v4 = vpop.eup %3491  ;;  %3228 = vmatprep.subr.bf16.mxu1 %v3227_v62 }
 0x37d   : > { %v3494_v5 = vpop.eup %3493  ;;  %1236 = vadd.xlane.f32.xlu1 %v4601_v1  ;;  %v3019_v13 = vpop.f32.mrb[12].mxu0  ;;  %v1197_v7 = vadd.f32 1.0, %v3492_v4 }
 0x37e   : > { %v1127_v46 = vadd.f32 %v3019_v13, %v4566_v59  ;;  %v1121_v8 = vpop.f32.mrb[13].mxu0  ;;  %v1196_v11 = vadd.f32 1.0, %v3494_v5 }
 0x37f   : > { %v1122_v9 = vadd.f32 %v4566_v59, %v1121_v8  ;;  %v4606_v10 = vmul.f32 %v1197_v7, %v1149_v6  ;;  %3230 = vmatpush3.bf16.msra.mxu1 %v3227_v62  ;;  %v1471_v62 = vld [vmem:[%s4633_s21 + $0x50] sm:$0xff] }
 0x380   : > { %v1169_v22 = vmul.f32 0.70710677, %v1127_v46  ;;  %v4609_v17 = vmul.f32 %v1196_v11, %v1148_v14  ;;  %v1153_v28 = vmul.f32 0.5, %v1127_v46 }
 0x381   : > { %v1168_v16 = vmul.f32 0.70710677, %v1122_v9  ;;  %1242 = vadd.xlane.f32.xlu1 %v4606_v10  ;;  %v1152_v55 = vmul.f32 0.5, %v1122_v9 }
 0x382   : > { %3499 = verf.f32 %v1169_v22 }
 0x383   : > { %3501 = verf.f32 %v1168_v16 }
 0x384   : > { %v3496_v18 = vpop.eup %3495 }
 0x385   : > { %v3498_v23 = vpop.eup %3497  ;;  %1240 = vadd.xlane.f32.xlu1 %v4609_v17  ;;  %v3022_v19 = vpop.f32.mrb[14].mxu0  ;;  %v1199_v20 = vadd.f32 1.0, %v3496_v18 }
 0x386   : > { %v1137_v41 = vadd.f32 %v3022_v19, %v4566_v59  ;;  %v1131_v21 = vpop.f32.mrb[15].mxu0  ;;  %v1198_v32 = vadd.f32 1.0, %v3498_v23 }
 0x387   : > { %v1132_v24 = vadd.f32 %v4566_v59, %v1131_v21  ;;  %v4614_v25 = vmul.f32 %v1199_v20, %v1151_v47 }
 0x388   : > { %v1171_v34 = vmul.f32 0.70710677, %v1137_v41  ;;  %v4617_v51 = vmul.f32 %v1198_v32, %v1150_v35  ;;  %v1155_v50 = vmul.f32 0.5, %v1137_v41  ;;  %v1466_v35 = vld [vmem:[%s4633_s21 + $0x28] sm:$0xff] }
 0x389   : > { %v1170_v57 = vmul.f32 0.70710677, %v1132_v24  ;;  %1246 = vadd.xlane.f32.xlu1 %v4614_v25  ;;  %v1154_v45 = vmul.f32 0.5, %v1132_v24 }
 0x38a   : > { %3503 = verf.f32 %v1171_v34  ;;  %v1465_v34 = vld [vmem:[%s4633_s21 + $0x20] sm:$0xff] }
 0x38b   : > { %3505 = verf.f32 %v1170_v57 }
 0x38c   : > { %v3500_v37 = vpop.eup %3499 }
 0x38d   : > { %v3502_v40 = vpop.eup %3501  ;;  %1244 = vadd.xlane.f32.xlu1 %v4617_v51  ;;  %v1201_v26 = vadd.f32 1.0, %v3500_v37  ;;  %v3231_v37 = vpack.c.bf16 %v1466_v35, %v1465_v34 }
 0x38e   : > { %v1200_v59 = vadd.f32 1.0, %v3502_v40 }
 0x38f   : > { %v4620_v27 = vmul.f32 %v1201_v26, %v1153_v28  ;;  %3232 = vmatprep.subr.bf16.mxu1 %v3231_v37  ;;  %v1467_v26 = vld [vmem:[%s4633_s21 + $0x30] sm:$0xff] }
 0x390   : > { %v4623_v43 = vmul.f32 %v1200_v59, %v1152_v55  ;;  %3234 = vmatpush3.bf16.msra.mxu1 %v3231_v37  ;;  %v1468_v59 = vld [vmem:[%s4633_s21 + $0x38] sm:$0xff] }
 0x391   : > { %1250 = vadd.xlane.f32.xlu1 %v4620_v27 }
 0x394   : > { %v3504_v44 = vpop.eup %3503 }
 0x395   : > { %v3506_v58 = vpop.eup %3505  ;;  %1248 = vadd.xlane.f32.xlu1 %v4623_v43  ;;  %v1203_v49 = vadd.f32 1.0, %v3504_v44 }
 0x396   : > { %v1202_v48 = vadd.f32 1.0, %v3506_v58  ;;  %v3235_v58 = vpack.c.bf16 %v1468_v59, %v1467_v26 }
 0x397   : > { %v4629_v29 = vmul.f32 %v1203_v49, %v1155_v50  ;;  %v1469_v49 = vld [vmem:[%s4633_s21 + $0x40] sm:$0xff]  ;;  %v1470_v50 = vld [vmem:[%s4633_s21 + $0x48] sm:$0xff] }
 0x398   : > { %v4626_v54 = vmul.f32 %v1202_v48, %v1154_v45  ;;  %3236 = vmatprep.subr.bf16.mxu1 %v3235_v58  ;;  %v3239_v53 = vpack.c.bf16 %v1470_v50, %v1469_v49 }
 0x399   : > { %3238 = vmatpush3.bf16.msra.mxu1 %v3235_v58 }
 0x39a   : > { %1252 = vadd.xlane.f32.xlu1 %v4626_v54  ;;  %3240 = vmatprep.subr.bf16.mxu1 %v3239_v53 }
 0x39d   : > { %3242 = vmatpush3.bf16.msra.mxu1 %v3239_v53 }
 0x39e   : > { %1254 = vadd.xlane.f32.xlu1 %v4629_v29 }
 0x3ee   : > { %v1227_v12 = vpop.xlane.xlu1 %1226 }
 0x3ef   : > { %v1257_v63 = vmul.f32 0.03125, %v1227_v12  ;;  %v1472_v12 = vld [vmem:[%s4633_s21 + $0x58] sm:$0xff] }
 0x3f1   : > { %v1273_v4 = vsub.f32 %v4574_v15, %v1257_v63 }
 0x3f2   : > { %v1225_v5 = vpop.xlane.xlu1 %1224 }
 0x3f3   : > { %v1256_v6 = vmul.f32 0.03125, %v1225_v5  ;;  %v4645_v13 = vmul.f32 %v4641_v0, %v1273_v4  ;;  %v3243_v5 = vpack.c.bf16 %v1472_v12, %v1471_v62 }
 0x3f5   : > { %v1272_v7 = vsub.f32 %v4577_v56, %v1256_v6  ;;  %v1305_v46 = vmul.f32 %v4645_v13, %v4645_v13  ;;  %3244 = vmatprep.subr.bf16.mxu1 %v3243_v5 }
 0x3f6   : > { %v1231_v8 = vpop.xlane.xlu1 %1230  ;;  %3246 = vmatpush3.bf16.msra.mxu1 %v3243_v5 }
 0x3f7   : > { %v1259_v9 = vmul.f32 0.03125, %v1231_v8  ;;  %1322 = vadd.xlane.f32.xlu1 %v1305_v46  ;;  %v4651_v33 = vmul.f32 %v4641_v0, %v1272_v7  ;;  %v1473_v46 = vld [vmem:[%s4633_s21 + $0x60] sm:$0xff]  ;;  %v1474_v8 = vld [vmem:[%s4633_s21 + $0x68] sm:$0xff] }
 0x3f9   : > { %v1275_v38 = vsub.f32 %v4582_v42, %v1259_v9  ;;  %v1304_v15 = vmul.f32 %v4651_v33, %v4651_v33 }
 0x3fa   : > { %v1229_v11 = vpop.xlane.xlu1 %1228 }
 0x3fb   : > { %v1258_v22 = vmul.f32 0.03125, %v1229_v11  ;;  %1320 = vadd.xlane.f32.xlu1 %v1304_v15  ;;  %v4657_v14 = vmul.f32 %v4641_v0, %v1275_v38  ;;  %v3247_v15 = vpack.c.bf16 %v1474_v8, %v1473_v46  ;;  %v4756_v46 = vld [vmem:[%s1220_s28] ss:$0 sm:$0xff]  ;;  %s5512_s28 = sld [smem:[#allocation25_spill]] }
 0x3fd   : > { %v1274_v56 = vsub.f32 %v4585_v36, %v1258_v22  ;;  %v1307_v16 = vmul.f32 %v4657_v14, %v4657_v14  ;;  %3248 = vmatprep.subr.bf16.mxu1 %v3247_v15 }
 0x3fe   : > { %v1235_v18 = vpop.xlane.xlu1 %1234  ;;  %3250 = vmatpush3.bf16.msra.mxu1 %v3247_v15 }
 0x3ff   : > { %v1261_v23 = vmul.f32 0.03125, %v1235_v18  ;;  %1326 = vadd.xlane.f32.xlu1 %v1307_v16  ;;  %v4663_v42 = vmul.f32 %v4641_v0, %v1274_v56  ;;  %v1475_v56 = vld [vmem:[%s4633_s21 + $0x70] sm:$0xff]  ;;  %v1476_v16 = vld [vmem:[%s4633_s21 + $0x78] sm:$0xff]  ;;  %s1477_s21 = scalar_lea.vmem %s5511_s6, %s3899_s27 }
 0x401   : > { %v1277_v47 = vsub.f32 %v4590_v2, %v1261_v23  ;;  %v1306_v19 = vmul.f32 %v4663_v42, %v4663_v42  ;;  %s1694_s8 = scalar_lea.vmem %s5512_s28, %s3899_s27  ;;  %s5515_s28 = sld [smem:[#allocation28_spill]] }
 0x402   : > { %v1233_v20 = vpop.xlane.xlu1 %1232 }
 0x403   : > { %v1260_v41 = vmul.f32 0.03125, %v1233_v20  ;;  %1324 = vadd.xlane.f32.xlu1 %v1306_v19  ;;  %v4669_v36 = vmul.f32 %v4641_v0, %v1277_v47  ;;  %v3251_v47 = vpack.c.bf16 %v1476_v16, %v1475_v56  ;;  %v4764_v56 = vld [vmem:[%s1222_s10] ss:$0 sm:$0xff]  ;;  %s5513_s10 = sld [smem:[#allocation26_spill]] }
 0x405   : > { %v1276_v21 = vsub.f32 %v4593_v31, %v1260_v41  ;;  %v1309_v24 = vmul.f32 %v4669_v36, %v4669_v36  ;;  %3252 = vmatprep.subr.bf16.mxu1 %v3251_v47 }
 0x406   : > { %v1239_v32 = vpop.xlane.xlu1 %1238  ;;  %3254 = vmatpush3.bf16.msra.mxu1 %v3251_v47 }
 0x407   : > { %v1263_v2 = vmul.f32 0.03125, %v1239_v32  ;;  %1330 = vadd.xlane.f32.xlu1 %v1309_v24  ;;  %v4677_v57 = vmul.f32 %v4641_v0, %v1276_v21 }
 0x409   : > { %v1279_v40 = vsub.f32 %v4598_v61, %v1263_v2  ;;  %v1308_v28 = vmul.f32 %v4677_v57, %v4677_v57  ;;  %s1696_s20 = scalar_lea.vmem %s5513_s10, %s3899_s27  ;;  %s5516_s10 = sld [smem:[#allocation29_spill]] }
 0x40a   : > { %v1237_v31 = vpop.xlane.xlu1 %1236 }
 0x40b   : > { %v1262_v55 = vmul.f32 0.03125, %v1237_v31  ;;  %1328 = vadd.xlane.f32.xlu1 %v1308_v28  ;;  %v4685_v44 = vmul.f32 %v4641_v0, %v1279_v40 }
 0x40d   : > { %v1278_v45 = vsub.f32 %v4601_v1, %v1262_v55  ;;  %v1311_v61 = vmul.f32 %v4685_v44, %v4685_v44 }
 0x40e   : > { %v1243_v48 = vpop.xlane.xlu1 %1242 }
 0x40f   : > { %v1265_v52 = vmul.f32 0.03125, %v1243_v48  ;;  %1334 = vadd.xlane.f32.xlu1 %v1311_v61  ;;  %v4693_v3 = vmul.f32 %v4641_v0, %v1278_v45 }
 0x411   : > { %v1281_v30 = vsub.f32 %v4606_v10, %v1265_v52  ;;  %v1310_v1 = vmul.f32 %v4693_v3, %v4693_v3 }
 0x412   : > { %v1241_v60 = vpop.xlane.xlu1 %1240 }
 0x413   : > { %v1264_v63 = vmul.f32 0.03125, %v1241_v60  ;;  %1332 = vadd.xlane.f32.xlu1 %v1310_v1  ;;  %v4701_v4 = vmul.f32 %v4641_v0, %v1281_v30 }
 0x415   : > { %v1280_v6 = vsub.f32 %v4609_v17, %v1264_v63  ;;  %v1313_v10 = vmul.f32 %v4701_v4, %v4701_v4 }
 0x416   : > { %v1247_v7 = vpop.xlane.xlu1 %1246 }
 0x417   : > { %v1267_v9 = vmul.f32 0.03125, %v1247_v7  ;;  %1338 = vadd.xlane.f32.xlu1 %v1313_v10  ;;  %v4709_v38 = vmul.f32 %v4641_v0, %v1280_v6 }
 0x419   : > { %v1283_v11 = vsub.f32 %v4614_v25, %v1267_v9  ;;  %v1312_v17 = vmul.f32 %v4709_v38, %v4709_v38 }
 0x41a   : > { %v1245_v22 = vpop.xlane.xlu1 %1244 }
 0x41b   : > { %v1266_v18 = vmul.f32 0.03125, %v1245_v22  ;;  %1336 = vadd.xlane.f32.xlu1 %v1312_v17  ;;  %v4717_v23 = vmul.f32 %v4641_v0, %v1283_v11 }
 0x41d   : > { %v1282_v19 = vsub.f32 %v4617_v51, %v1266_v18  ;;  %v1315_v20 = vmul.f32 %v4717_v23, %v4717_v23 }
 0x41e   : > { %v1251_v25 = vpop.xlane.xlu1 %1250 }
 0x41f   : > { %v1269_v41 = vmul.f32 0.03125, %v1251_v25  ;;  %1342 = vadd.xlane.f32.xlu0 %v1315_v20  ;;  %v4723_v21 = vmul.f32 %v4641_v0, %v1282_v19 }
 0x421   : > { %v1285_v24 = vsub.f32 %v4620_v27, %v1269_v41  ;;  %v1314_v32 = vmul.f32 %v4723_v21, %v4723_v21 }
 0x422   : > { %v1249_v34 = vpop.xlane.xlu1 %1248 }
 0x423   : > { %v1268_v35 = vmul.f32 0.03125, %v1249_v34  ;;  %1340 = vadd.xlane.f32.xlu1 %v1314_v32  ;;  %v4729_v51 = vmul.f32 %v4641_v0, %v1285_v24 }
 0x425   : > { %v1284_v2 = vsub.f32 %v4623_v43, %v1268_v35  ;;  %v1317_v37 = vmul.f32 %v4729_v51, %v4729_v51 }
 0x427   : > { %1346 = vadd.xlane.f32.xlu1 %v1317_v37  ;;  %v1253_v40 = vpop.xlane.xlu1 %1252  ;;  %v4735_v28 = vmul.f32 %v4641_v0, %v1284_v2 }
 0x428   : > { %v1270_v27 = vmul.f32 0.03125, %v1253_v40 }
 0x429   : > { %v1316_v31 = vmul.f32 %v4735_v28, %v4735_v28 }
 0x42a   : > { %v1286_v26 = vsub.f32 %v4626_v54, %v1270_v27 }
 0x42b   : > { %1344 = vadd.xlane.f32.xlu1 %v1316_v31  ;;  %v1255_v59 = vpop.xlane.xlu1 %1254 }
 0x42c   : > { %v1271_v55 = vmul.f32 0.03125, %v1255_v59  ;;  %v4741_v58 = vmul.f32 %v4641_v0, %v1286_v26 }
 0x42e   : > { %v1287_v43 = vsub.f32 %v4629_v29, %v1271_v55  ;;  %v1318_v45 = vmul.f32 %v4741_v58, %v4741_v58 }
 0x430   : > { %1348 = vadd.xlane.f32.xlu1 %v1318_v45  ;;  %v4747_v61 = vmul.f32 %v4641_v0, %v1287_v43 }
 0x432   : > { %v1319_v48 = vmul.f32 %v4747_v61, %v4747_v61 }
 0x434   : > { %1350 = vadd.xlane.f32.xlu1 %v1319_v48 }
 0x484   : > { %v1323_v54 = vpop.xlane.xlu1 %1322 }
 0x485   : > { %v1353_v49 = vmul.f32 0.03125, %v1323_v54 }
 0x487   : > { %v1369_v50 = vadd.f32 1e-05, %v1353_v49 }
 0x488   : > { %v1321_v52 = vpop.xlane.xlu1 %1320 }
 0x489   : > { %3507 = vrsqrt.f32 %v1369_v50  ;;  %v1352_v53 = vmul.f32 0.03125, %v1321_v52 }
 0x48b   : > { %v1368_v30 = vadd.f32 1e-05, %v1352_v53 }
 0x48c   : > { %v1327_v29 = vpop.xlane.xlu1 %1326 }
 0x48d   : > { %3509 = vrsqrt.f32 %v1368_v30  ;;  %v1355_v1 = vmul.f32 0.03125, %v1327_v29 }
 0x48f   : > { %v1371_v60 = vadd.f32 1e-05, %v1355_v1 }
 0x490   : > { %v1325_v62 = vpop.xlane.xlu1 %1324 }
 0x491   : > { %3511 = vrsqrt.f32 %v1371_v60  ;;  %v1354_v12 = vmul.f32 0.03125, %v1325_v62 }
 0x493   : > { %v3508_v63 = vpop.eup %3507  ;;  %v1370_v5 = vadd.f32 1e-05, %v1354_v12 }
 0x494   : > { %v1331_v6 = vpop.xlane.xlu1 %1330  ;;  %v1401_v7 = vmul.f32 %v3508_v63, %v4645_v13 }
 0x495   : > { %3513 = vrsqrt.f32 %v1370_v5  ;;  %v1357_v10 = vmul.f32 0.03125, %v1331_v6 }
 0x496   : > { %v1423_v22 = vmul.f32 %v4756_v46, %v1401_v7 }
 0x497   : > { %v3510_v8 = vpop.eup %3509  ;;  %v1373_v9 = vadd.f32 1e-05, %v1357_v10 }
 0x498   : > { %v1329_v15 = vpop.xlane.xlu1 %1328  ;;  %v1400_v11 = vmul.f32 %v3510_v8, %v4651_v33  ;;  %v1445_v25 = vadd.f32 %v4764_v56, %v1423_v22 }
 0x499   : > { %3515 = vrsqrt.f32 %v1373_v9  ;;  %v1356_v17 = vmul.f32 0.03125, %v1329_v15 }
 0x49a   : > { %v1422_v16 = vmul.f32 %v4756_v46, %v1400_v11 }
 0x49b   : > { %v3512_v13 = vpop.eup %3511  ;;  %v1372_v18 = vadd.f32 1e-05, %v1356_v17 }
 0x49c   : > { %v1335_v47 = vpop.xlane.xlu1 %1334  ;;  %v1444_v19 = vadd.f32 %v4764_v56, %v1422_v16  ;;  %v1403_v41 = vmul.f32 %v3512_v13, %v4657_v14 }
 0x49d   : > { %3517 = vrsqrt.f32 %v1372_v18  ;;  %v1359_v20 = vmul.f32 0.03125, %v1335_v47 }
 0x49e   : > { %3055 = vmatprep.mubr.f32.mxu1 %v1444_v19  ;;  %v1425_v2 = vmul.f32 %v4756_v46, %v1403_v41 }
 0x49f   : > { %v3514_v33 = vpop.eup %3513  ;;  %v1375_v24 = vadd.f32 1e-05, %v1359_v20  ;;  %3056 = vmatmul.mubr.f32.vlgmr.msra.gmra.mrb[0].mxu1 %v1445_v25 }
 0x4a0   : > { %v1333_v32 = vpop.xlane.xlu1 %1332  ;;  %v1402_v34 = vmul.f32 %v3514_v33, %v4663_v42  ;;  %v1447_v59 = vadd.f32 %v4764_v56, %v1425_v2 }
 0x4a1   : > { %3519 = vrsqrt.f32 %v1375_v24  ;;  %v1358_v35 = vmul.f32 0.03125, %v1333_v32 }
 0x4a2   : > { %v1424_v37 = vmul.f32 %v4756_v46, %v1402_v34 }
 0x4a3   : > { %v3516_v40 = vpop.eup %3515  ;;  %v1374_v27 = vadd.f32 1e-05, %v1358_v35 }
 0x4a4   : > { %v1339_v31 = vpop.xlane.xlu1 %1338  ;;  %v1446_v26 = vadd.f32 %v4764_v56, %v1424_v37  ;;  %v1405_v55 = vmul.f32 %v3516_v40, %v4669_v36 }
 0x4a5   : > { %3521 = vrsqrt.f32 %v1374_v27  ;;  %v1361_v14 = vmul.f32 0.03125, %v1339_v31 }
 0x4a6   : > { %3058 = vmatprep.mubr.f32.mxu1 %v1446_v26  ;;  %v1427_v49 = vmul.f32 %v4756_v46, %v1405_v55 }
 0x4a7   : > { %v3518_v43 = vpop.eup %3517  ;;  %v1377_v42 = vadd.f32 1e-05, %v1361_v14  ;;  %3059 = vmatmul.mubr.f32.gmra.mrb[2].mxu1 %v1447_v59 }
 0x4a8   : > { %v1337_v45 = vpop.xlane.xlu1 %1336  ;;  %v1404_v48 = vmul.f32 %v3518_v43, %v4677_v57  ;;  %v1449_v1 = vadd.f32 %v4764_v56, %v1427_v49 }
 0x4a9   : > { %3523 = vrsqrt.f32 %v1377_v42  ;;  %v1360_v54 = vmul.f32 0.03125, %v1337_v45 }
 0x4aa   : > { %v1426_v50 = vmul.f32 %v4756_v46, %v1404_v48 }
 0x4ab   : > { %v3520_v52 = vpop.eup %3519  ;;  %v1376_v53 = vadd.f32 1e-05, %v1360_v54 }
 0x4ac   : > { %v1343_v30 = vpop.xlane.xlu0 %1342  ;;  %v1448_v29 = vadd.f32 %v4764_v56, %v1426_v50  ;;  %v1407_v60 = vmul.f32 %v3520_v52, %v4685_v44 }
 0x4ad   : > { %3525 = vrsqrt.f32 %v1376_v53  ;;  %v1363_v36 = vmul.f32 0.03125, %v1343_v30 }
 0x4ae   : > { %3061 = vmatprep.mubr.f32.mxu1 %v1448_v29  ;;  %v1429_v6 = vmul.f32 %v4756_v46, %v1407_v60 }
 0x4af   : > { %v3522_v62 = vpop.eup %3521  ;;  %v1379_v57 = vadd.f32 1e-05, %v1363_v36  ;;  %3062 = vmatmul.mubr.f32.gmra.mrb[4].mxu1 %v1449_v1 }
 0x4b0   : > { %v1341_v12 = vpop.xlane.xlu1 %1340  ;;  %v1406_v63 = vmul.f32 %v3522_v62, %v4693_v3  ;;  %v1451_v11 = vadd.f32 %v4764_v56, %v1429_v6 }
 0x4b1   : > { %3527 = vrsqrt.f32 %v1379_v57  ;;  %v1362_v5 = vmul.f32 0.03125, %v1341_v12 }
 0x4b2   : > { %v1428_v10 = vmul.f32 %v4756_v46, %v1406_v63 }
 0x4b3   : > { %v3524_v7 = vpop.eup %3523  ;;  %v1378_v8 = vadd.f32 1e-05, %v1362_v5 }
 0x4b4   : > { %v1347_v9 = vpop.xlane.xlu1 %1346  ;;  %v1450_v15 = vadd.f32 %v4764_v56, %v1428_v10  ;;  %v1409_v17 = vmul.f32 %v3524_v7, %v4701_v4 }
 0x4b5   : > { %3529 = vrsqrt.f32 %v1378_v8  ;;  %v1365_v44 = vmul.f32 0.03125, %v1347_v9 }
 0x4b6   : > { %3064 = vmatprep.mubr.f32.mxu1 %v1450_v15  ;;  %v1431_v47 = vmul.f32 %v4756_v46, %v1409_v17 }
 0x4b7   : > { %v3526_v22 = vpop.eup %3525  ;;  %v1381_v3 = vadd.f32 1e-05, %v1365_v44  ;;  %3065 = vmatmul.mubr.f32.gmra.mrb[6].mxu1 %v1451_v11 }
 0x4b8   : > { %v1345_v16 = vpop.xlane.xlu1 %1344  ;;  %v1408_v13 = vmul.f32 %v3526_v22, %v4709_v38  ;;  %v1453_v4 = vadd.f32 %v4764_v56, %v1431_v47 }
 0x4b9   : > { %3531 = vrsqrt.f32 %v1381_v3  ;;  %v1364_v18 = vmul.f32 0.03125, %v1345_v16 }
 0x4ba   : > { %v1430_v19 = vmul.f32 %v4756_v46, %v1408_v13 }
 0x4bb   : > { %v3528_v20 = vpop.eup %3527  ;;  %v1380_v25 = vadd.f32 1e-05, %v1364_v18 }
 0x4bc   : > { %v1452_v41 = vadd.f32 %v4764_v56, %v1430_v19  ;;  %v1411_v24 = vmul.f32 %v3528_v20, %v4717_v23 }
 0x4bd   : > { %3533 = vrsqrt.f32 %v1380_v25  ;;  %v1349_v33 = vpop.xlane.xlu1 %1348 }
 0x4be   : > { %v1366_v32 = vmul.f32 0.03125, %v1349_v33  ;;  %3067 = vmatprep.mubr.f32.mxu1 %v1452_v41  ;;  %v1433_v37 = vmul.f32 %v4756_v46, %v1411_v24 }
 0x4bf   : > { %v3530_v34 = vpop.eup %3529  ;;  %3068 = vmatmul.mubr.f32.gmra.mrb[8].mxu1 %v1453_v4 }
 0x4c0   : > { %v1382_v38 = vadd.f32 1e-05, %v1366_v32  ;;  %v1410_v35 = vmul.f32 %v3530_v34, %v4723_v21  ;;  %v1455_v23 = vadd.f32 %v4764_v56, %v1433_v37  ;;  %v3635_v32 = vld [vmem:[%s4295_s23] sm:$0xff] }
 0x4c1   : > { %v1351_v2 = vpop.xlane.xlu1 %1350 }
 0x4c2   : > { %3535 = vrsqrt.f32 %v1382_v38  ;;  %v1367_v40 = vmul.f32 0.03125, %v1351_v2  ;;  %v1432_v27 = vmul.f32 %v4756_v46, %v1410_v35  ;;  %v3636_v2 = vld [vmem:[%s4295_s23 + $0x8] sm:$0xff] }
 0x4c3   : > { %v3532_v31 = vpop.eup %3531 }
 0x4c4   : > { %v1383_v26 = vadd.f32 1e-05, %v1367_v40  ;;  %v1454_v14 = vadd.f32 %v4764_v56, %v1432_v27  ;;  %v1413_v59 = vmul.f32 %v3532_v31, %v4729_v51  ;;  %v3637_v31 = vld [vmem:[%s4295_s23 + $0x10] sm:$0xff] }
 0x4c6   : > { %3537 = vrsqrt.f32 %v1383_v26  ;;  %3070 = vmatprep.mubr.f32.mxu1 %v1454_v14  ;;  %v1435_v43 = vmul.f32 %v4756_v46, %v1413_v59  ;;  %v3638_v59 = vld [vmem:[%s4295_s23 + $0x18] sm:$0xff] }
 0x4c7   : > { %v3534_v55 = vpop.eup %3533  ;;  %3071 = vmatmul.mubr.f32.gmra.mrb[10].mxu1 %v1455_v23 }
 0x4c8   : > { %v1412_v21 = vmul.f32 %v3534_v55, %v4735_v28  ;;  %v1457_v54 = vadd.f32 %v4764_v56, %v1435_v43 }
 0x4ca   : > { %v1434_v42 = vmul.f32 %v4756_v46, %v1412_v21 }
 0x4cc   : > { %v3536_v45 = vpop.eup %3535  ;;  %v1456_v48 = vadd.f32 %v4764_v56, %v1434_v42  ;;  %v3639_v42 = vld [vmem:[%s4295_s23 + $0x20] sm:$0xff] }
 0x4cd   : > { %v1414_v49 = vmul.f32 %v3536_v45, %v4741_v58  ;;  %v2825_v58 = vld [vmem:[%s1477_s21] ss:$0 sm:$0xff]  ;;  %s5514_s21 = sld [smem:[#allocation27_spill]] }
 0x4ce   : > { %3073 = vmatprep.mubr.f32.mxu1 %v1456_v48 }
 0x4cf   : > { %3074 = vmatmul.mubr.f32.gmra.mrb[12].mxu1 %v1457_v54  ;;  %v1436_v51 = vmul.f32 %v4756_v46, %v1414_v49  ;;  %v3640_v49 = vld [vmem:[%s4295_s23 + $0x28] sm:$0xff] }
 0x4d0   : > { %v3538_v50 = vpop.eup %3537 }
 0x4d1   : > { %v1458_v52 = vadd.f32 %v4764_v56, %v1436_v51  ;;  %v1415_v28 = vmul.f32 %v3538_v50, %v4747_v61 }
 0x4d3   : > { %3076 = vmatprep.mubr.f32.mxu1 %v1458_v52  ;;  %v1437_v53 = vmul.f32 %v4756_v46, %v1415_v28  ;;  %v3641_v28 = vld [vmem:[%s4295_s23 + $0x30] sm:$0xff] }
 0x4d5   : > { %v1459_v30 = vadd.f32 %v4764_v56, %v1437_v53 }
 0x4d7   : > { %3077 = vmatmul.mubr.f32.gmra.mrb[14].mxu1 %v1459_v30 }
 0x572   : > { %v3057_v29 = vpop.f32.mrb[0].mxu1 }
 0x573   : > { %v1551_v36 = vpop.f32.mrb[1].mxu1  ;;  %v1557_v60 = vadd.f32 %v3057_v29, %v2825_v58  ;;  %v3642_v29 = vld [vmem:[%s4295_s23 + $0x38] sm:$0xff] }
 0x574   : > { %v1552_v1 = vadd.f32 %v2825_v58, %v1551_v36 }
 0x576   : > { %1630 = vxpose.xlu1.b32.start [1/16] %v1552_v1, 128 }
 0x57a   : > { %1631 = vxpose.xlu1.b32.cont [2/16] %v1557_v60, 128  ;;  %v3060_v62 = vpop.f32.mrb[2].mxu1 }
 0x57b   : > { %v1561_v57 = vpop.f32.mrb[3].mxu1  ;;  %v1567_v12 = vadd.f32 %v3060_v62, %v2825_v58  ;;  %v3643_v62 = vld [vmem:[%s4295_s23 + $0x40] sm:$0xff] }
 0x57c   : > { %v1562_v61 = vadd.f32 %v2825_v58, %v1561_v57 }
 0x57e   : > { %1632 = vxpose.xlu1.b32.cont [3/16] %v1562_v61, 128 }
 0x582   : > { %1633 = vxpose.xlu1.b32.cont [4/16] %v1567_v12, 128  ;;  %v3063_v46 = vpop.f32.mrb[4].mxu1 }
 0x583   : > { %v1571_v56 = vpop.f32.mrb[5].mxu1  ;;  %v1577_v5 = vadd.f32 %v3063_v46, %v2825_v58  ;;  %v3644_v46 = vld [vmem:[%s4295_s23 + $0x48] sm:$0xff] }
 0x584   : > { %v1572_v63 = vadd.f32 %v2825_v58, %v1571_v56 }
 0x586   : > { %1634 = vxpose.xlu1.b32.cont [5/16] %v1572_v63, 128 }
 0x58a   : > { %1635 = vxpose.xlu1.b32.cont [6/16] %v1577_v5, 128  ;;  %v3066_v6 = vpop.f32.mrb[6].mxu1 }
 0x58b   : > { %v1581_v10 = vpop.f32.mrb[7].mxu1  ;;  %v1587_v8 = vadd.f32 %v3066_v6, %v2825_v58  ;;  %v3645_v6 = vld [vmem:[%s4295_s23 + $0x50] sm:$0xff] }
 0x58c   : > { %v1582_v7 = vadd.f32 %v2825_v58, %v1581_v10 }
 0x58e   : > { %1636 = vxpose.xlu1.b32.cont [7/16] %v1582_v7, 128 }
 0x592   : > { %1637 = vxpose.xlu1.b32.cont [8/16] %v1587_v8, 128  ;;  %v3069_v9 = vpop.f32.mrb[8].mxu1 }
 0x593   : > { %v1591_v15 = vpop.f32.mrb[9].mxu1  ;;  %v1597_v11 = vadd.f32 %v3069_v9, %v2825_v58  ;;  %v3646_v9 = vld [vmem:[%s4295_s23 + $0x58] sm:$0xff] }
 0x594   : > { %v1592_v44 = vadd.f32 %v2825_v58, %v1591_v15 }
 0x596   : > { %1638 = vxpose.xlu1.b32.cont [9/16] %v1592_v44, 128 }
 0x59a   : > { %1639 = vxpose.xlu1.b32.cont [10/16] %v1597_v11, 128  ;;  %v3072_v17 = vpop.f32.mrb[10].mxu1 }
 0x59b   : > { %v1601_v22 = vpop.f32.mrb[11].mxu1  ;;  %v1607_v16 = vadd.f32 %v3072_v17, %v2825_v58  ;;  %v3647_v17 = vld [vmem:[%s4295_s23 + $0x60] sm:$0xff] }
 0x59c   : > { %v1602_v3 = vadd.f32 %v2825_v58, %v1601_v22 }
 0x59e   : > { %1640 = vxpose.xlu1.b32.cont [11/16] %v1602_v3, 128 }
 0x5a2   : > { %v3075_v13 = vpop.f32.mrb[12].mxu1  ;;  %1641 = vxpose.xlu1.b32.cont [12/16] %v1607_v16, 128 }
 0x5a3   : > { %v1611_v18 = vpop.f32.mrb[13].mxu1  ;;  %v1617_v19 = vadd.f32 %v3075_v13, %v2825_v58  ;;  %v3648_v13 = vld [vmem:[%s4295_s23 + $0x68] sm:$0xff] }
 0x5a4   : > { %v1612_v47 = vadd.f32 %v2825_v58, %v1611_v18 }
 0x5a6   : > { %1642 = vxpose.xlu1.b32.cont [13/16] %v1612_v47, 128 }
 0x5aa   : > { %v3078_v20 = vpop.f32.mrb[14].mxu1  ;;  %1643 = vxpose.xlu1.b32.cont [14/16] %v1617_v19, 128 }
 0x5ab   : > { %v1621_v25 = vpop.f32.mrb[15].mxu1  ;;  %v1627_v33 = vadd.f32 %v3078_v20, %v2825_v58  ;;  %v3649_v20 = vld [vmem:[%s4295_s23 + $0x70] sm:$0xff] }
 0x5ac   : > { %v1622_v41 = vadd.f32 %v2825_v58, %v1621_v25 }
 0x5ae   : > { %1644 = vxpose.xlu1.b32.cont [15/16] %v1622_v41, 128 }
 0x5b2   : > { %1645 = vxpose.xlu1.b32.end [16/16] %v1627_v33, 128 }
 0x5f6   : > { %v1646_v4 = vpop.trf.xlu1 }
 0x5f7   : > { %v1662_v24 = vmul.f32 %v4386_v39, %v1646_v4  ;;  %v3650_v4 = vld [vmem:[%s4295_s23 + $0x78] sm:$0xff] }
 0x5f9   : > { %v4817_v34 = vadd.f32 %v3635_v32, %v1662_v24  ;;  %v1935_v32 = vld [vmem:[%s4896_s12] sm:$0xff] }
 0x5fa   : > { %v1647_v38 = vpop.trf.xlu1 }
 0x5fb   : > { %v1663_v35 = vmul.f32 %v4386_v39, %v1647_v38  ;;  %1698 = vadd.xlane.f32.xlu0 %v4817_v34  ;;  %v1936_v38 = vld [vmem:[%s4896_s12 + $0x8] sm:$0xff] }
 0x5fd   : > { %v4822_v37 = vadd.f32 %v3636_v2, %v1663_v35  ;;  %v1937_v35 = vld [vmem:[%s4896_s12 + $0x10] sm:$0xff]  ;;  %v3255_v2 = vpack.c.bf16 %v1936_v38, %v1935_v32 }
 0x5fe   : > { %v1648_v40 = vpop.trf.xlu1 }
 0x5ff   : > { %v1664_v27 = vmul.f32 %v4386_v39, %v1648_v40  ;;  %1700 = vadd.xlane.f32.xlu0 %v4822_v37  ;;  %v1938_v40 = vld [vmem:[%s4896_s12 + $0x18] sm:$0xff]  ;;  %3256 = vmatprep.subr.bf16.mxu0 %v3255_v2 }
 0x600   : > { %3258 = vmatpush3.bf16.msra.mxu0 %v3255_v2 }
 0x601   : > { %v4827_v26 = vadd.f32 %v3637_v31, %v1664_v27  ;;  %v3259_v27 = vpack.c.bf16 %v1938_v40, %v1937_v35  ;;  %v1943_v40 = vld [vmem:[%s4896_s12 + $0x40] sm:$0xff] }
 0x602   : > { %v1649_v14 = vpop.trf.xlu1 }
 0x603   : > { %v1665_v23 = vmul.f32 %v4386_v39, %v1649_v14  ;;  %1702 = vadd.xlane.f32.xlu0 %v4827_v26  ;;  %3260 = vmatprep.subr.bf16.mxu0 %v3259_v27 }
 0x604   : > { %3262 = vmatpush3.bf16.msra.mxu0 %v3259_v27  ;;  %v1944_v27 = vld [vmem:[%s4896_s12 + $0x48] sm:$0xff] }
 0x605   : > { %v4832_v55 = vadd.f32 %v3638_v59, %v1665_v23 }
 0x606   : > { %v1650_v21 = vpop.trf.xlu1 }
 0x607   : > { %v1666_v43 = vmul.f32 %v4386_v39, %v1650_v21  ;;  %1704 = vadd.xlane.f32.xlu0 %v4832_v55 }
 0x609   : > { %v4837_v45 = vadd.f32 %v3639_v42, %v1666_v43 }
 0x60a   : > { %v1651_v48 = vpop.trf.xlu1 }
 0x60b   : > { %v1667_v54 = vmul.f32 %v4386_v39, %v1651_v48  ;;  %1706 = vadd.xlane.f32.xlu0 %v4837_v45 }
 0x60d   : > { %v4842_v51 = vadd.f32 %v3640_v49, %v1667_v54 }
 0x60e   : > { %v1652_v50 = vpop.trf.xlu1 }
 0x60f   : > { %v1668_v52 = vmul.f32 %v4386_v39, %v1652_v50  ;;  %1708 = vadd.xlane.f32.xlu0 %v4842_v51 }
 0x611   : > { %v4847_v53 = vadd.f32 %v3641_v28, %v1668_v52 }
 0x612   : > { %v1653_v30 = vpop.trf.xlu1 }
 0x613   : > { %v1669_v58 = vmul.f32 %v4386_v39, %v1653_v30  ;;  %1710 = vadd.xlane.f32.xlu0 %v4847_v53 }
 0x615   : > { %v4852_v36 = vadd.f32 %v3642_v29, %v1669_v58 }
 0x616   : > { %v1654_v1 = vpop.trf.xlu1 }
 0x617   : > { %v1670_v60 = vmul.f32 %v4386_v39, %v1654_v1  ;;  %1712 = vadd.xlane.f32.xlu0 %v4852_v36 }
 0x619   : > { %v4857_v57 = vadd.f32 %v3643_v62, %v1670_v60 }
 0x61a   : > { %v1655_v61 = vpop.trf.xlu1 }
 0x61b   : > { %v1671_v12 = vmul.f32 %v4386_v39, %v1655_v61  ;;  %1714 = vadd.xlane.f32.xlu0 %v4857_v57 }
 0x61d   : > { %v4862_v56 = vadd.f32 %v3644_v46, %v1671_v12 }
 0x61e   : > { %v1656_v63 = vpop.trf.xlu1 }
 0x61f   : > { %v1672_v5 = vmul.f32 %v4386_v39, %v1656_v63  ;;  %1716 = vadd.xlane.f32.xlu0 %v4862_v56 }
 0x621   : > { %v4867_v10 = vadd.f32 %v3645_v6, %v1672_v5 }
 0x622   : > { %v1657_v7 = vpop.trf.xlu1 }
 0x623   : > { %v1673_v8 = vmul.f32 %v4386_v39, %v1657_v7  ;;  %1718 = vadd.xlane.f32.xlu0 %v4867_v10 }
 0x625   : > { %v4872_v15 = vadd.f32 %v3646_v9, %v1673_v8 }
 0x626   : > { %v1658_v44 = vpop.trf.xlu1 }
 0x627   : > { %v1674_v11 = vmul.f32 %v4386_v39, %v1658_v44  ;;  %1720 = vadd.xlane.f32.xlu0 %v4872_v15  ;;  %v1939_v44 = vld [vmem:[%s4896_s12 + $0x20] sm:$0xff] }
 0x629   : > { %v4877_v22 = vadd.f32 %v3647_v17, %v1674_v11  ;;  %v1940_v11 = vld [vmem:[%s4896_s12 + $0x28] sm:$0xff] }
 0x62a   : > { %v1659_v3 = vpop.trf.xlu1 }
 0x62b   : > { %v1675_v16 = vmul.f32 %v4386_v39, %v1659_v3  ;;  %1722 = vadd.xlane.f32.xlu0 %v4877_v22  ;;  %v3263_v3 = vpack.c.bf16 %v1940_v11, %v1939_v44  ;;  %v1950_v44 = vld [vmem:[%s4896_s12 + $0x78] sm:$0xff] }
 0x62d   : > { %v4882_v18 = vadd.f32 %v3648_v13, %v1675_v16  ;;  %3264 = vmatprep.subr.bf16.mxu0 %v3263_v3 }
 0x62e   : > { %v1660_v47 = vpop.trf.xlu1  ;;  %3266 = vmatpush3.bf16.msra.mxu0 %v3263_v3 }
 0x62f   : > { %v1676_v19 = vmul.f32 %v4386_v39, %v1660_v47  ;;  %1724 = vadd.xlane.f32.xlu0 %v4882_v18 }
 0x631   : > { %v4887_v25 = vadd.f32 %v3649_v20, %v1676_v19  ;;  %v1941_v20 = vld [vmem:[%s4896_s12 + $0x30] sm:$0xff] }
 0x632   : > { %v1661_v41 = vpop.trf.xlu1 }
 0x633   : > { %v1677_v33 = vmul.f32 %v4386_v39, %v1661_v41  ;;  %1726 = vadd.xlane.f32.xlu0 %v4887_v25  ;;  %v1942_v41 = vld [vmem:[%s4896_s12 + $0x38] sm:$0xff] }
 0x635   : > { %v4892_v24 = vadd.f32 %v3650_v4, %v1677_v33  ;;  %v3267_v4 = vpack.c.bf16 %v1942_v41, %v1941_v20 }
 0x637   : > { %1728 = vadd.xlane.f32.xlu0 %v4892_v24  ;;  %3268 = vmatprep.subr.bf16.mxu0 %v3267_v4 }
 0x638   : > { %3270 = vmatpush3.bf16.msra.mxu0 %v3267_v4 }
 0x688   : > { %v1699_v31 = vpop.xlane.xlu0 %1698 }
 0x689   : > { %v1730_v14 = vmul.f32 0.0625, %v1699_v31 }
 0x68b   : > { %v1746_v23 = vsub.f32 %v4817_v34, %v1730_v14  ;;  %v3271_v14 = vpack.c.bf16 %v1944_v27, %v1943_v40 }
 0x68c   : > { %v1701_v59 = vpop.xlane.xlu0 %1700 }
 0x68d   : > { %v4904_v21 = vmul.f32 %v4386_v39, %v1746_v23  ;;  %v1731_v43 = vmul.f32 0.0625, %v1701_v59  ;;  %3272 = vmatprep.subr.bf16.mxu0 %v3271_v14 }
 0x68e   : > { %3274 = vmatpush3.bf16.msra.mxu0 %v3271_v14 }
 0x68f   : > { %v1747_v42 = vsub.f32 %v4822_v37, %v1731_v43  ;;  %v1778_v48 = vmul.f32 %v4904_v21, %v4904_v21 }
 0x690   : > { %v1703_v54 = vpop.xlane.xlu0 %1702 }
 0x691   : > { %v4910_v49 = vmul.f32 %v4386_v39, %v1747_v42  ;;  %v1732_v50 = vmul.f32 0.0625, %v1703_v54  ;;  %1794 = vadd.xlane.f32.xlu0 %v1778_v48  ;;  %v1945_v48 = vld [vmem:[%s4896_s12 + $0x50] sm:$0xff]  ;;  %v1946_v54 = vld [vmem:[%s4896_s12 + $0x58] sm:$0xff] }
 0x693   : > { %v1748_v52 = vsub.f32 %v4827_v26, %v1732_v50  ;;  %v1779_v28 = vmul.f32 %v4910_v49, %v4910_v49 }
 0x694   : > { %v1705_v30 = vpop.xlane.xlu0 %1704 }
 0x695   : > { %v4916_v58 = vmul.f32 %v4386_v39, %v1748_v52  ;;  %v1733_v29 = vmul.f32 0.0625, %v1705_v30  ;;  %1796 = vadd.xlane.f32.xlu0 %v1779_v28  ;;  %v3275_v52 = vpack.c.bf16 %v1946_v54, %v1945_v48 }
 0x697   : > { %v1749_v1 = vsub.f32 %v4832_v55, %v1733_v29  ;;  %v1780_v60 = vmul.f32 %v4916_v58, %v4916_v58  ;;  %3276 = vmatprep.subr.bf16.mxu0 %v3275_v52 }
 0x698   : > { %v1707_v62 = vpop.xlane.xlu0 %1706  ;;  %3278 = vmatpush3.bf16.msra.mxu0 %v3275_v52 }
 0x699   : > { %v4922_v61 = vmul.f32 %v4386_v39, %v1749_v1  ;;  %v1734_v12 = vmul.f32 0.0625, %v1707_v62  ;;  %1798 = vadd.xlane.f32.xlu0 %v1780_v60  ;;  %v1947_v60 = vld [vmem:[%s4896_s12 + $0x60] sm:$0xff]  ;;  %v1948_v62 = vld [vmem:[%s4896_s12 + $0x68] sm:$0xff] }
 0x69b   : > { %v1750_v46 = vsub.f32 %v4837_v45, %v1734_v12  ;;  %v1781_v63 = vmul.f32 %v4922_v61, %v4922_v61 }
 0x69c   : > { %v1709_v5 = vpop.xlane.xlu0 %1708 }
 0x69d   : > { %v4928_v6 = vmul.f32 %v4386_v39, %v1750_v46  ;;  %v1735_v7 = vmul.f32 0.0625, %v1709_v5  ;;  %1800 = vadd.xlane.f32.xlu0 %v1781_v63  ;;  %v3279_v46 = vpack.c.bf16 %v1948_v62, %v1947_v60 }
 0x69f   : > { %v1751_v8 = vsub.f32 %v4842_v51, %v1735_v7  ;;  %v1782_v9 = vmul.f32 %v4928_v6, %v4928_v6  ;;  %3280 = vmatprep.subr.bf16.mxu0 %v3279_v46 }
 0x6a0   : > { %v1711_v17 = vpop.xlane.xlu0 %1710  ;;  %3282 = vmatpush3.bf16.msra.mxu0 %v3279_v46 }
 0x6a1   : > { %v4936_v16 = vmul.f32 %v4386_v39, %v1751_v8  ;;  %v1736_v13 = vmul.f32 0.0625, %v1711_v17  ;;  %1802 = vadd.xlane.f32.xlu0 %v1782_v9  ;;  %v1949_v9 = vld [vmem:[%s4896_s12 + $0x70] sm:$0xff]  ;;  %s1951_s12 = scalar_lea.vmem %s5514_s21, %s3899_s27  ;;  %s5517_s21 = sld [smem:[#allocation30_spill]] }
 0x6a2   : > { %v3283_v17 = vpack.c.bf16 %v1950_v44, %v1949_v9 }
 0x6a3   : > { %v1752_v47 = vsub.f32 %v4847_v53, %v1736_v13  ;;  %v1783_v19 = vmul.f32 %v4936_v16, %v4936_v16 }
 0x6a4   : > { %v1713_v33 = vpop.xlane.xlu0 %1712  ;;  %3284 = vmatprep.subr.bf16.mxu0 %v3283_v17 }
 0x6a5   : > { %v4944_v32 = vmul.f32 %v4386_v39, %v1752_v47  ;;  %v1737_v38 = vmul.f32 0.0625, %v1713_v33  ;;  %1804 = vadd.xlane.f32.xlu0 %v1783_v19  ;;  %3286 = vmatpush3.bf16.msra.mxu0 %v3283_v17 }
 0x6a7   : > { %v1753_v35 = vsub.f32 %v4852_v36, %v1737_v38  ;;  %v1784_v2 = vmul.f32 %v4944_v32, %v4944_v32 }
 0x6a8   : > { %v1715_v31 = vpop.xlane.xlu0 %1714 }
 0x6a9   : > { %v4952_v23 = vmul.f32 %v4386_v39, %v1753_v35  ;;  %v1738_v59 = vmul.f32 0.0625, %v1715_v31  ;;  %1806 = vadd.xlane.f32.xlu1 %v1784_v2 }
 0x6ab   : > { %v1754_v43 = vsub.f32 %v4857_v57, %v1738_v59  ;;  %v1785_v42 = vmul.f32 %v4952_v23, %v4952_v23 }
 0x6ac   : > { %v1717_v50 = vpop.xlane.xlu0 %1716 }
 0x6ad   : > { %v4960_v28 = vmul.f32 %v4386_v39, %v1754_v43  ;;  %v1739_v30 = vmul.f32 0.0625, %v1717_v50  ;;  %1808 = vadd.xlane.f32.xlu0 %v1785_v42 }
 0x6af   : > { %v1755_v29 = vsub.f32 %v4862_v56, %v1739_v30  ;;  %v1786_v1 = vmul.f32 %v4960_v28, %v4960_v28 }
 0x6b0   : > { %v1719_v12 = vpop.xlane.xlu0 %1718 }
 0x6b1   : > { %v4968_v63 = vmul.f32 %v4386_v39, %v1755_v29  ;;  %v1740_v5 = vmul.f32 0.0625, %v1719_v12  ;;  %1810 = vadd.xlane.f32.xlu0 %v1786_v1 }
 0x6b3   : > { %v1756_v7 = vsub.f32 %v4867_v10, %v1740_v5  ;;  %v1787_v8 = vmul.f32 %v4968_v63, %v4968_v63 }
 0x6b4   : > { %v1721_v11 = vpop.xlane.xlu0 %1720 }
 0x6b5   : > { %v4976_v3 = vmul.f32 %v4386_v39, %v1756_v7  ;;  %v1741_v13 = vmul.f32 0.0625, %v1721_v11  ;;  %1812 = vadd.xlane.f32.xlu0 %v1787_v8 }
 0x6b7   : > { %v1757_v47 = vsub.f32 %v4872_v15, %v1741_v13  ;;  %v1788_v19 = vmul.f32 %v4976_v3, %v4976_v3 }
 0x6b8   : > { %v1723_v20 = vpop.xlane.xlu0 %1722 }
 0x6b9   : > { %v4982_v41 = vmul.f32 %v4386_v39, %v1757_v47  ;;  %v1742_v33 = vmul.f32 0.0625, %v1723_v20  ;;  %1814 = vadd.xlane.f32.xlu0 %v1788_v19  ;;  %v5018_v19 = vld [vmem:[%s1694_s8] ss:$0 sm:$0xff]  ;;  %s2184_s8 = scalar_lea.vmem %s5515_s28, %s3899_s27 }
 0x6bb   : > { %v1758_v4 = vsub.f32 %v4877_v22, %v1742_v33  ;;  %v1789_v38 = vmul.f32 %v4982_v41, %v4982_v41 }
 0x6bc   : > { %v1725_v35 = vpop.xlane.xlu0 %1724 }
 0x6bd   : > { %v4988_v2 = vmul.f32 %v4386_v39, %v1758_v4  ;;  %v1743_v40 = vmul.f32 0.0625, %v1725_v35  ;;  %1816 = vadd.xlane.f32.xlu0 %v1789_v38  ;;  %v5021_v38 = vld [vmem:[%s1696_s20] ss:$0 sm:$0xff]  ;;  %s2186_s20 = scalar_lea.vmem %s5516_s10, %s3899_s27  ;;  %s3809_s10 = scalar_lea.vmem %s5389_s1, 2048 }
 0x6be   : > { %p3810_p0 = scmp.ne.s32.totalorder %s5389_s1, %s3809_s10 }
 0x6bf   : > { %v1759_v27 = vsub.f32 %v4882_v18, %v1743_v40  ;;  %v1790_v31 = vmul.f32 %v4988_v2, %v4988_v2 }
 0x6c0   : > { %v1727_v14 = vpop.xlane.xlu0 %1726  ;;  %p3811_p10 = pnand %p3810_p0, %p4216_p3 }
 0x6c1   : > { %v4994_v59 = vmul.f32 %v4386_v39, %v1759_v27  ;;  %v1744_v43 = vmul.f32 0.0625, %v1727_v14  ;;  %1818 = vadd.xlane.f32.xlu0 %v1790_v31 }
 0x6c2   : > { %p3812_p5 = pneg %p3811_p10 }
 0x6c3   : > { %v1760_v42 = vsub.f32 %v4887_v25, %v1744_v43  ;;  %v1791_v48 = vmul.f32 %v4994_v59, %v4994_v59 }
 0x6c4   : > { %v1729_v54 = vpop.xlane.xlu0 %1728 }
 0x6c5   : > { %v5000_v50 = vmul.f32 %v4386_v39, %v1760_v42  ;;  %v1745_v52 = vmul.f32 0.0625, %v1729_v54  ;;  %1820 = vadd.xlane.f32.xlu0 %v1791_v48 }
 0x6c7   : > { %v1761_v30 = vsub.f32 %v4892_v24, %v1745_v52  ;;  %v1792_v29 = vmul.f32 %v5000_v50, %v5000_v50 }
 0x6c9   : > { %v5006_v1 = vmul.f32 %v4386_v39, %v1761_v30  ;;  %1822 = vadd.xlane.f32.xlu0 %v1792_v29 }
 0x6cb   : > { %v1793_v60 = vmul.f32 %v5006_v1, %v5006_v1 }
 0x6cd   : > { %1824 = vadd.xlane.f32.xlu0 %v1793_v60 }
 0x71e   : > { %v1795_v62 = vpop.xlane.xlu0 %1794 }
 0x71f   : > { %v1826_v12 = vmul.f32 0.0625, %v1795_v62 }
 0x721   : > { %v1842_v46 = vadd.f32 1e-05, %v1826_v12 }
 0x722   : > { %v1797_v5 = vpop.xlane.xlu0 %1796 }
 0x723   : > { %3539 = vrsqrt.f32 %v1842_v46  ;;  %v1827_v7 = vmul.f32 0.0625, %v1797_v5 }
 0x725   : > { %v1843_v8 = vadd.f32 1e-05, %v1827_v7 }
 0x726   : > { %v1799_v9 = vpop.xlane.xlu0 %1798 }
 0x727   : > { %3541 = vrsqrt.f32 %v1843_v8  ;;  %v1828_v44 = vmul.f32 0.0625, %v1799_v9 }
 0x729   : > { %v1844_v11 = vadd.f32 1e-05, %v1828_v44 }
 0x72a   : > { %v1801_v39 = vpop.xlane.xlu0 %1800 }
 0x72b   : > { %3543 = vrsqrt.f32 %v1844_v11  ;;  %v1829_v17 = vmul.f32 0.0625, %v1801_v39 }
 0x72d   : > { %v3540_v13 = vpop.eup %3539  ;;  %v1845_v47 = vadd.f32 1e-05, %v1829_v17 }
 0x72e   : > { %v1803_v20 = vpop.xlane.xlu0 %1802  ;;  %v1874_v33 = vmul.f32 %v3540_v13, %v4904_v21 }
 0x72f   : > { %3545 = vrsqrt.f32 %v1845_v47  ;;  %v1830_v4 = vmul.f32 0.0625, %v1803_v20 }
 0x730   : > { %v1896_v35 = vmul.f32 %v5018_v19, %v1874_v33 }
 0x731   : > { %v3542_v40 = vpop.eup %3541  ;;  %v1846_v27 = vadd.f32 1e-05, %v1830_v4 }
 0x732   : > { %v1875_v31 = vmul.f32 %v3542_v40, %v4910_v49  ;;  %v1805_v14 = vpop.xlane.xlu0 %1804  ;;  %v1918_v43 = vadd.f32 %v5021_v38, %v1896_v35 }
 0x733   : > { %3547 = vrsqrt.f32 %v1846_v27  ;;  %v1831_v42 = vmul.f32 0.0625, %v1805_v14 }
 0x734   : > { %3111 = vmatprep.mubr.f32.mxu0 %v1918_v43  ;;  %v1897_v48 = vmul.f32 %v5018_v19, %v1875_v31 }
 0x735   : > { %v3544_v54 = vpop.eup %3543  ;;  %v1847_v21 = vadd.f32 1e-05, %v1831_v42 }
 0x736   : > { %v1807_v52 = vpop.xlane.xlu1 %1806  ;;  %v1919_v30 = vadd.f32 %v5021_v38, %v1897_v48  ;;  %v1876_v29 = vmul.f32 %v3544_v54, %v4916_v58 }
 0x737   : > { %3549 = vrsqrt.f32 %v1847_v21  ;;  %v1832_v60 = vmul.f32 0.0625, %v1807_v52 }
 0x738   : > { %3112 = vmatmul.mubr.f32.vlgmr.msra.gmra.mrb[16].mxu0 %v1919_v30  ;;  %v1898_v49 = vmul.f32 %v5018_v19, %v1876_v29 }
 0x739   : > { %v3546_v62 = vpop.eup %3545  ;;  %v1848_v12 = vadd.f32 1e-05, %v1832_v60 }
 0x73a   : > { %v1809_v46 = vpop.xlane.xlu0 %1808  ;;  %v1920_v5 = vadd.f32 %v5021_v38, %v1898_v49  ;;  %v1877_v7 = vmul.f32 %v3546_v62, %v4922_v61 }
 0x73b   : > { %3551 = vrsqrt.f32 %v1848_v12  ;;  %v1833_v8 = vmul.f32 0.0625, %v1809_v46 }
 0x73c   : > { %3114 = vmatprep.mubr.f32.mxu0 %v1920_v5  ;;  %v1899_v9 = vmul.f32 %v5018_v19, %v1877_v7 }
 0x73d   : > { %v3548_v44 = vpop.eup %3547  ;;  %v1849_v11 = vadd.f32 1e-05, %v1833_v8 }
 0x73e   : > { %v1811_v58 = vpop.xlane.xlu0 %1810  ;;  %v1921_v39 = vadd.f32 %v5021_v38, %v1899_v9  ;;  %v1878_v17 = vmul.f32 %v3548_v44, %v4928_v6 }
 0x73f   : > { %3553 = vrsqrt.f32 %v1849_v11  ;;  %v1834_v13 = vmul.f32 0.0625, %v1811_v58 }
 0x740   : > { %3115 = vmatmul.mubr.f32.gmra.mrb[18].mxu0 %v1921_v39  ;;  %v1900_v47 = vmul.f32 %v5018_v19, %v1878_v17 }
 0x741   : > { %v3550_v20 = vpop.eup %3549  ;;  %v1850_v33 = vadd.f32 1e-05, %v1834_v13 }
 0x742   : > { %v1813_v61 = vpop.xlane.xlu0 %1812  ;;  %v1922_v4 = vadd.f32 %v5021_v38, %v1900_v47  ;;  %v1879_v35 = vmul.f32 %v3550_v20, %v4936_v16 }
 0x743   : > { %3555 = vrsqrt.f32 %v1850_v33  ;;  %v1835_v40 = vmul.f32 0.0625, %v1813_v61 }
 0x744   : > { %3117 = vmatprep.mubr.f32.mxu0 %v1922_v4  ;;  %v1901_v27 = vmul.f32 %v5018_v19, %v1879_v35 }
 0x745   : > { %v3552_v31 = vpop.eup %3551  ;;  %v1851_v14 = vadd.f32 1e-05, %v1835_v40 }
 0x746   : > { %v1815_v6 = vpop.xlane.xlu0 %1814  ;;  %v1923_v43 = vadd.f32 %v5021_v38, %v1901_v27  ;;  %v1880_v42 = vmul.f32 %v3552_v31, %v4944_v32 }
 0x747   : > { %3557 = vrsqrt.f32 %v1851_v14  ;;  %v1836_v48 = vmul.f32 0.0625, %v1815_v6 }
 0x748   : > { %3118 = vmatmul.mubr.f32.gmra.mrb[20].mxu0 %v1923_v43  ;;  %v1902_v54 = vmul.f32 %v5018_v19, %v1880_v42 }
 0x749   : > { %v3554_v21 = vpop.eup %3553  ;;  %v1852_v52 = vadd.f32 1e-05, %v1836_v48 }
 0x74a   : > { %v1817_v16 = vpop.xlane.xlu0 %1816  ;;  %v1924_v30 = vadd.f32 %v5021_v38, %v1902_v54  ;;  %v1881_v29 = vmul.f32 %v3554_v21, %v4952_v23 }
 0x74b   : > { %3559 = vrsqrt.f32 %v1852_v52  ;;  %v1837_v60 = vmul.f32 0.0625, %v1817_v16 }
 0x74c   : > { %3120 = vmatprep.mubr.f32.mxu0 %v1924_v30  ;;  %v1903_v49 = vmul.f32 %v5018_v19, %v1881_v29 }
 0x74d   : > { %v3556_v62 = vpop.eup %3555  ;;  %v1853_v12 = vadd.f32 1e-05, %v1837_v60 }
 0x74e   : > { %v1819_v32 = vpop.xlane.xlu0 %1818  ;;  %v1925_v46 = vadd.f32 %v5021_v38, %v1903_v49  ;;  %v1882_v5 = vmul.f32 %v3556_v62, %v4960_v28 }
 0x74f   : > { %3561 = vrsqrt.f32 %v1853_v12  ;;  %v1838_v7 = vmul.f32 0.0625, %v1819_v32 }
 0x750   : > { %3121 = vmatmul.mubr.f32.gmra.mrb[22].mxu0 %v1925_v46  ;;  %v1904_v8 = vmul.f32 %v5018_v19, %v1882_v5  ;;  %v5074_v46 = vld [vmem:[%s1951_s12] ss:$0 sm:$0xff]  ;;  %s2441_s12 = scalar_lea.vmem %s5517_s21, %s3899_s27  ;;  %s5518_s27 = sld [smem:[#allocation17_spill]] }
 0x751   : > { %v3558_v9 = vpop.eup %3557  ;;  %v1854_v44 = vadd.f32 1e-05, %v1838_v7 }
 0x752   : > { %v1821_v23 = vpop.xlane.xlu0 %1820  ;;  %v1926_v11 = vadd.f32 %v5021_v38, %v1904_v8  ;;  %v1883_v58 = vmul.f32 %v3558_v9, %v4968_v63 }
 0x753   : > { %3563 = vrsqrt.f32 %v1854_v44  ;;  %v1839_v39 = vmul.f32 0.0625, %v1821_v23 }
 0x754   : > { %3123 = vmatprep.mubr.f32.mxu0 %v1926_v11  ;;  %v1905_v17 = vmul.f32 %v5018_v19, %v1883_v58 }
 0x755   : > { %v3560_v13 = vpop.eup %3559  ;;  %v1855_v47 = vadd.f32 1e-05, %v1839_v39 }
 0x756   : > { %v1823_v28 = vpop.xlane.xlu0 %1822  ;;  %v1927_v20 = vadd.f32 %v5021_v38, %v1905_v17  ;;  %v1884_v33 = vmul.f32 %v3560_v13, %v4976_v3 }
 0x757   : > { %3565 = vrsqrt.f32 %v1855_v47  ;;  %v1840_v61 = vmul.f32 0.0625, %v1823_v28 }
 0x758   : > { %3124 = vmatmul.mubr.f32.gmra.mrb[24].mxu0 %v1927_v20  ;;  %v1906_v4 = vmul.f32 %v5018_v19, %v1884_v33 }
 0x759   : > { %v3562_v35 = vpop.eup %3561  ;;  %v1856_v40 = vadd.f32 1e-05, %v1840_v61 }
 0x75a   : > { %v1825_v63 = vpop.xlane.xlu0 %1824  ;;  %v1928_v27 = vadd.f32 %v5021_v38, %v1906_v4  ;;  %v1885_v31 = vmul.f32 %v3562_v35, %v4982_v41 }
 0x75b   : > { %3567 = vrsqrt.f32 %v1856_v40  ;;  %v1841_v14 = vmul.f32 0.0625, %v1825_v63 }
 0x75c   : > { %3126 = vmatprep.mubr.f32.mxu0 %v1928_v27  ;;  %v1907_v6 = vmul.f32 %v5018_v19, %v1885_v31 }
 0x75d   : > { %v3564_v43 = vpop.eup %3563  ;;  %v1857_v42 = vadd.f32 1e-05, %v1841_v14 }
 0x75e   : > { %v1929_v3 = vadd.f32 %v5021_v38, %v1907_v6  ;;  %v1886_v48 = vmul.f32 %v3564_v43, %v4988_v2 }
 0x75f   : > { %3569 = vrsqrt.f32 %v1857_v42 }
 0x760   : > { %3127 = vmatmul.mubr.f32.gmra.mrb[26].mxu0 %v1929_v3  ;;  %v1908_v54 = vmul.f32 %v5018_v19, %v1886_v48 }
 0x761   : > { %v3566_v21 = vpop.eup %3565 }
 0x762   : > { %v1930_v52 = vadd.f32 %v5021_v38, %v1908_v54  ;;  %v1887_v41 = vmul.f32 %v3566_v21, %v4994_v59 }
 0x764   : > { %3129 = vmatprep.mubr.f32.mxu0 %v1930_v52  ;;  %v1909_v16 = vmul.f32 %v5018_v19, %v1887_v41 }
 0x765   : > { %v3568_v30 = vpop.eup %3567 }
 0x766   : > { %v1931_v29 = vadd.f32 %v5021_v38, %v1909_v16  ;;  %v1888_v60 = vmul.f32 %v3568_v30, %v5000_v50 }
 0x768   : > { %3130 = vmatmul.mubr.f32.gmra.mrb[28].mxu0 %v1931_v29  ;;  %v1910_v2 = vmul.f32 %v5018_v19, %v1888_v60 }
 0x769   : > { %v3570_v49 = vpop.eup %3569 }
 0x76a   : > { %v1932_v62 = vadd.f32 %v5021_v38, %v1910_v2  ;;  %v1889_v12 = vmul.f32 %v3570_v49, %v5006_v1 }
 0x76c   : > { %3132 = vmatprep.mubr.f32.mxu0 %v1932_v62  ;;  %v1911_v32 = vmul.f32 %v5018_v19, %v1889_v12 }
 0x76e   : > { %v1933_v59 = vadd.f32 %v5021_v38, %v1911_v32 }
 0x770   : > { %3133 = vmatmul.mubr.f32.gmra.mrb[30].mxu0 %v1933_v59 }
 0x80b   : > { %v3113_v50 = vpop.f32.mrb[16].mxu0 }
 0x80c   : > { %v2031_v5 = vadd.f32 %v3113_v50, %v5074_v46  ;;  %v2025_v7 = vpop.f32.mrb[17].mxu0 }
 0x80d   : > { %v2026_v8 = vadd.f32 %v5074_v46, %v2025_v7 }
 0x80e   : > { %v2121_v9 = vmul.f32 0.70710677, %v2031_v5  ;;  %v2105_v13 = vmul.f32 0.5, %v2031_v5 }
 0x80f   : > { %v2120_v1 = vmul.f32 0.70710677, %v2026_v8  ;;  %v2104_v20 = vmul.f32 0.5, %v2026_v8 }
 0x810   : > { %3571 = verf.f32 %v2121_v9 }
 0x811   : > { %3573 = verf.f32 %v2120_v1 }
 0x813   : > { %v3116_v19 = vpop.f32.mrb[18].mxu0 }
 0x814   : > { %v2041_v38 = vadd.f32 %v3116_v19, %v5074_v46  ;;  %v2035_v44 = vpop.f32.mrb[19].mxu0 }
 0x815   : > { %v2036_v23 = vadd.f32 %v5074_v46, %v2035_v44 }
 0x816   : > { %v2123_v11 = vmul.f32 0.70710677, %v2041_v38  ;;  %v2107_v43 = vmul.f32 0.5, %v2041_v38 }
 0x817   : > { %v2122_v58 = vmul.f32 0.70710677, %v2036_v23  ;;  %v2106_v48 = vmul.f32 0.5, %v2036_v23 }
 0x818   : > { %3575 = verf.f32 %v2123_v11 }
 0x819   : > { %3577 = verf.f32 %v2122_v58 }
 0x81a   : > { %v3572_v39 = vpop.eup %3571 }
 0x81b   : > { %v3574_v17 = vpop.eup %3573  ;;  %v2153_v47 = vadd.f32 1.0, %v3572_v39  ;;  %v3119_v28 = vpop.f32.mrb[20].mxu0 }
 0x81c   : > { %v2152_v33 = vadd.f32 1.0, %v3574_v17  ;;  %v2051_v61 = vadd.f32 %v3119_v28, %v5074_v46  ;;  %v2045_v4 = vpop.f32.mrb[21].mxu0 }
 0x81d   : > { %v2046_v35 = vadd.f32 %v5074_v46, %v2045_v4  ;;  %v5082_v40 = vmul.f32 %v2153_v47, %v2105_v13 }
 0x81e   : > { %v2125_v63 = vmul.f32 0.70710677, %v2051_v61  ;;  %v5084_v27 = vmul.f32 %v2152_v33, %v2104_v20  ;;  %v2109_v62 = vmul.f32 0.5, %v2051_v61 }
 0x81f   : > { %v2124_v31 = vmul.f32 0.70710677, %v2046_v35  ;;  %2190 = vadd.xlane.f32.xlu1 %v5082_v40  ;;  %v2108_v59 = vmul.f32 0.5, %v2046_v35 }
 0x820   : > { %3579 = verf.f32 %v2125_v63  ;;  %2188 = vadd.xlane.f32.xlu0 %v5084_v27 }
 0x821   : > { %3581 = verf.f32 %v2124_v31 }
 0x822   : > { %v3576_v14 = vpop.eup %3575 }
 0x823   : > { %v3578_v6 = vpop.eup %3577  ;;  %v2155_v42 = vadd.f32 1.0, %v3576_v14  ;;  %v3122_v3 = vpop.f32.mrb[22].mxu0 }
 0x824   : > { %v2154_v54 = vadd.f32 1.0, %v3578_v6  ;;  %v2061_v21 = vadd.f32 %v3122_v3, %v5074_v46  ;;  %v2055_v52 = vpop.f32.mrb[23].mxu0 }
 0x825   : > { %v2056_v41 = vadd.f32 %v5074_v46, %v2055_v52  ;;  %v5090_v16 = vmul.f32 %v2155_v42, %v2107_v43 }
 0x826   : > { %v2127_v30 = vmul.f32 0.70710677, %v2061_v21  ;;  %v5092_v29 = vmul.f32 %v2154_v54, %v2106_v48  ;;  %v2111_v11 = vmul.f32 0.5, %v2061_v21 }
 0x827   : > { %v2126_v60 = vmul.f32 0.70710677, %v2056_v41  ;;  %2194 = vadd.xlane.f32.xlu1 %v5090_v16  ;;  %v2110_v17 = vmul.f32 0.5, %v2056_v41 }
 0x828   : > { %3583 = verf.f32 %v2127_v30  ;;  %2192 = vadd.xlane.f32.xlu0 %v5092_v29 }
 0x829   : > { %3585 = verf.f32 %v2126_v60 }
 0x82a   : > { %v3580_v2 = vpop.eup %3579 }
 0x82b   : > { %v3582_v49 = vpop.eup %3581  ;;  %v2157_v12 = vadd.f32 1.0, %v3580_v2  ;;  %v3125_v32 = vpop.f32.mrb[24].mxu0 }
 0x82c   : > { %v2156_v50 = vadd.f32 1.0, %v3582_v49  ;;  %v2071_v5 = vadd.f32 %v3125_v32, %v5074_v46  ;;  %v2065_v7 = vpop.f32.mrb[25].mxu0 }
 0x82d   : > { %v2066_v8 = vadd.f32 %v5074_v46, %v2065_v7  ;;  %v5098_v9 = vmul.f32 %v2157_v12, %v2109_v62 }
 0x82e   : > { %v2129_v1 = vmul.f32 0.70710677, %v2071_v5  ;;  %v5100_v19 = vmul.f32 %v2156_v50, %v2108_v59  ;;  %v2113_v14 = vmul.f32 0.5, %v2071_v5 }
 0x82f   : > { %v2128_v38 = vmul.f32 0.70710677, %v2066_v8  ;;  %2198 = vadd.xlane.f32.xlu1 %v5098_v9  ;;  %v2112_v42 = vmul.f32 0.5, %v2066_v8 }
 0x830   : > { %3587 = verf.f32 %v2129_v1  ;;  %2196 = vadd.xlane.f32.xlu0 %v5100_v19 }
 0x831   : > { %3589 = verf.f32 %v2128_v38 }
 0x832   : > { %v3584_v44 = vpop.eup %3583 }
 0x833   : > { %v3586_v23 = vpop.eup %3585  ;;  %v2159_v58 = vadd.f32 1.0, %v3584_v44  ;;  %v3128_v39 = vpop.f32.mrb[26].mxu0 }
 0x834   : > { %v2158_v13 = vadd.f32 1.0, %v3586_v23  ;;  %v2081_v47 = vadd.f32 %v3128_v39, %v5074_v46  ;;  %v2075_v28 = vpop.f32.mrb[27].mxu0 }
 0x835   : > { %v2076_v20 = vadd.f32 %v5074_v46, %v2075_v28  ;;  %v5106_v33 = vmul.f32 %v2159_v58, %v2111_v11 }
 0x836   : > { %v2131_v61 = vmul.f32 0.70710677, %v2081_v47  ;;  %v5108_v4 = vmul.f32 %v2158_v13, %v2110_v17  ;;  %v2115_v62 = vmul.f32 0.5, %v2081_v47 }
 0x837   : > { %v2130_v35 = vmul.f32 0.70710677, %v2076_v20  ;;  %2202 = vadd.xlane.f32.xlu1 %v5106_v33  ;;  %v2114_v59 = vmul.f32 0.5, %v2076_v20 }
 0x838   : > { %3591 = verf.f32 %v2131_v61  ;;  %2200 = vadd.xlane.f32.xlu0 %v5108_v4 }
 0x839   : > { %3593 = verf.f32 %v2130_v35 }
 0x83a   : > { %v3588_v63 = vpop.eup %3587 }
 0x83b   : > { %v3590_v31 = vpop.eup %3589  ;;  %v2161_v6 = vadd.f32 1.0, %v3588_v63  ;;  %v3131_v43 = vpop.f32.mrb[28].mxu0 }
 0x83c   : > { %v2160_v3 = vadd.f32 1.0, %v3590_v31  ;;  %v2091_v48 = vadd.f32 %v3131_v43, %v5074_v46  ;;  %v2085_v54 = vpop.f32.mrb[29].mxu0 }
 0x83d   : > { %v2086_v21 = vadd.f32 %v5074_v46, %v2085_v54  ;;  %v5114_v52 = vmul.f32 %v2161_v6, %v2113_v14 }
 0x83e   : > { %v2133_v41 = vmul.f32 0.70710677, %v2091_v48  ;;  %v5116_v30 = vmul.f32 %v2160_v3, %v2112_v42  ;;  %v2117_v39 = vmul.f32 0.5, %v2091_v48  ;;  %v2425_v42 = vld [vmem:[%s5141_s22] sm:$0xff]  ;;  %v2426_v3 = vld [vmem:[%s5141_s22 + $0x8] sm:$0xff]  ;;  %v2427_v48 = vld [vmem:[%s5141_s22 + $0x10] sm:$0xff] }
 0x83f   : > { %v2132_v60 = vmul.f32 0.70710677, %v2086_v21  ;;  %2206 = vadd.xlane.f32.xlu1 %v5114_v52  ;;  %v2116_v13 = vmul.f32 0.5, %v2086_v21  ;;  %v3287_v54 = vpack.c.bf16 %v2426_v3, %v2425_v42  ;;  %v2428_v21 = vld [vmem:[%s5141_s22 + $0x18] sm:$0xff] }
 0x840   : > { %3595 = verf.f32 %v2133_v41  ;;  %2204 = vadd.xlane.f32.xlu0 %v5116_v30  ;;  %v3291_v41 = vpack.c.bf16 %v2428_v21, %v2427_v48 }
 0x841   : > { %3597 = verf.f32 %v2132_v60  ;;  %v2429_v60 = vld [vmem:[%s5141_s22 + $0x20] sm:$0xff]  ;;  %3288 = vmatprep.subr.bf16.mxu1 %v3287_v54 }
 0x842   : > { %v3592_v2 = vpop.eup %3591  ;;  %3290 = vmatpush3.bf16.msra.mxu1 %v3287_v54 }
 0x843   : > { %v3594_v49 = vpop.eup %3593  ;;  %v2163_v12 = vadd.f32 1.0, %v3592_v2  ;;  %v3134_v32 = vpop.f32.mrb[30].mxu0  ;;  %v2430_v2 = vld [vmem:[%s5141_s22 + $0x28] sm:$0xff]  ;;  %3292 = vmatprep.subr.bf16.mxu1 %v3291_v41 }
 0x844   : > { %v2162_v50 = vadd.f32 1.0, %v3594_v49  ;;  %v2101_v5 = vadd.f32 %v3134_v32, %v5074_v46  ;;  %v2095_v7 = vpop.f32.mrb[31].mxu0  ;;  %v3295_v49 = vpack.c.bf16 %v2430_v2, %v2429_v60 }
 0x845   : > { %v2096_v8 = vadd.f32 %v5074_v46, %v2095_v7  ;;  %v5122_v1 = vmul.f32 %v2163_v12, %v2115_v62 }
 0x846   : > { %v2135_v38 = vmul.f32 0.70710677, %v2101_v5  ;;  %v5124_v44 = vmul.f32 %v2162_v50, %v2114_v59  ;;  %v2119_v35 = vmul.f32 0.5, %v2101_v5  ;;  %3294 = vmatpush3.bf16.msra.mxu1 %v3291_v41 }
 0x847   : > { %v2134_v23 = vmul.f32 0.70710677, %v2096_v8  ;;  %2210 = vadd.xlane.f32.xlu1 %v5122_v1  ;;  %v2118_v31 = vmul.f32 0.5, %v2096_v8  ;;  %3296 = vmatprep.subr.bf16.mxu1 %v3295_v49 }
 0x848   : > { %3599 = verf.f32 %v2135_v38  ;;  %2208 = vadd.xlane.f32.xlu0 %v5124_v44 }
 0x849   : > { %3601 = verf.f32 %v2134_v23 }
 0x84a   : > { %v3596_v11 = vpop.eup %3595  ;;  %3298 = vmatpush3.bf16.msra.mxu1 %v3295_v49 }
 0x84b   : > { %v3598_v58 = vpop.eup %3597  ;;  %v2165_v17 = vadd.f32 1.0, %v3596_v11 }
 0x84c   : > { %v2164_v47 = vadd.f32 1.0, %v3598_v58 }
 0x84d   : > { %v5128_v46 = vmul.f32 %v2165_v17, %v2117_v39 }
 0x84e   : > { %v5130_v28 = vmul.f32 %v2164_v47, %v2116_v13 }
 0x84f   : > { %2214 = vadd.xlane.f32.xlu1 %v5128_v46 }
 0x850   : > { %2212 = vadd.xlane.f32.xlu0 %v5130_v28 }
 0x852   : > { %v3600_v20 = vpop.eup %3599 }
 0x853   : > { %v3602_v61 = vpop.eup %3601  ;;  %v2167_v63 = vadd.f32 1.0, %v3600_v20 }
 0x854   : > { %v2166_v14 = vadd.f32 1.0, %v3602_v61 }
 0x855   : > { %v5134_v6 = vmul.f32 %v2167_v63, %v2119_v35 }
 0x856   : > { %v5136_v43 = vmul.f32 %v2166_v14, %v2118_v31 }
 0x857   : > { %2218 = vadd.xlane.f32.xlu1 %v5134_v6 }
 0x858   : > { %2216 = vadd.xlane.f32.xlu0 %v5136_v43 }
 0x8ac   : > { %v2191_v62 = vpop.xlane.xlu1 %2190 }
 0x8ad   : > { %v2221_v12 = vmul.f32 0.03125, %v2191_v62  ;;  %v2189_v32 = vpop.xlane.xlu0 %2188 }
 0x8ae   : > { %v2220_v59 = vmul.f32 0.03125, %v2189_v32 }
 0x8af   : > { %v2237_v50 = vsub.f32 %v5082_v40, %v2221_v12 }
 0x8b0   : > { %v2236_v5 = vsub.f32 %v5084_v27, %v2220_v59  ;;  %v2433_v59 = vld [vmem:[%s5141_s22 + $0x40] sm:$0xff] }
 0x8b1   : > { %v5152_v7 = vmul.f32 %v4641_v0, %v2237_v50  ;;  %v2434_v50 = vld [vmem:[%s5141_s22 + $0x48] sm:$0xff] }
 0x8b2   : > { %v5155_v8 = vmul.f32 %v4641_v0, %v2236_v5 }
 0x8b3   : > { %v2269_v38 = vmul.f32 %v5152_v7, %v5152_v7 }
 0x8b4   : > { %v2195_v23 = vpop.xlane.xlu1 %2194  ;;  %v2268_v11 = vmul.f32 %v5155_v8, %v5155_v8 }
 0x8b5   : > { %v2223_v58 = vmul.f32 0.03125, %v2195_v23  ;;  %v2193_v39 = vpop.xlane.xlu0 %2192  ;;  %2286 = vadd.xlane.f32.xlu1 %v2269_v38  ;;  %v3303_v38 = vpack.c.bf16 %v2434_v50, %v2433_v59 }
 0x8b6   : > { %v2222_v17 = vmul.f32 0.03125, %v2193_v39  ;;  %2284 = vadd.xlane.f32.xlu0 %v2268_v11  ;;  %v2435_v39 = vld [vmem:[%s5141_s22 + $0x50] sm:$0xff] }
 0x8b7   : > { %v2239_v40 = vsub.f32 %v5090_v16, %v2223_v58 }
 0x8b8   : > { %v2238_v27 = vsub.f32 %v5092_v29, %v2222_v17  ;;  %v2436_v17 = vld [vmem:[%s5141_s22 + $0x58] sm:$0xff] }
 0x8b9   : > { %v5164_v13 = vmul.f32 %v4641_v0, %v2239_v40 }
 0x8ba   : > { %v5167_v47 = vmul.f32 %v4641_v0, %v2238_v27  ;;  %v3307_v27 = vpack.c.bf16 %v2436_v17, %v2435_v39 }
 0x8bb   : > { %v2271_v20 = vmul.f32 %v5164_v13, %v5164_v13 }
 0x8bc   : > { %v2199_v61 = vpop.xlane.xlu1 %2198  ;;  %v2270_v35 = vmul.f32 %v5167_v47, %v5167_v47 }
 0x8bd   : > { %v2225_v63 = vmul.f32 0.03125, %v2199_v61  ;;  %v2197_v31 = vpop.xlane.xlu0 %2196  ;;  %2290 = vadd.xlane.f32.xlu1 %v2271_v20 }
 0x8be   : > { %v2224_v16 = vmul.f32 0.03125, %v2197_v31  ;;  %2288 = vadd.xlane.f32.xlu0 %v2270_v35  ;;  %v2438_v31 = vld [vmem:[%s5141_s22 + $0x68] sm:$0xff] }
 0x8bf   : > { %v2241_v29 = vsub.f32 %v5098_v9, %v2225_v63  ;;  %v2431_v9 = vld [vmem:[%s5141_s22 + $0x30] sm:$0xff]  ;;  %v2437_v63 = vld [vmem:[%s5141_s22 + $0x60] sm:$0xff] }
 0x8c0   : > { %v2240_v14 = vsub.f32 %v5100_v19, %v2224_v16  ;;  %v2432_v19 = vld [vmem:[%s5141_s22 + $0x38] sm:$0xff] }
 0x8c1   : > { %v5176_v42 = vmul.f32 %v4641_v0, %v2241_v29  ;;  %v3299_v49 = vpack.c.bf16 %v2432_v19, %v2431_v9  ;;  %v3311_v29 = vpack.c.bf16 %v2438_v31, %v2437_v63 }
 0x8c2   : > { %v5179_v3 = vmul.f32 %v4641_v0, %v2240_v14 }
 0x8c3   : > { %v2273_v48 = vmul.f32 %v5176_v42, %v5176_v42  ;;  %3300 = vmatprep.subr.bf16.mxu1 %v3299_v49 }
 0x8c4   : > { %v2203_v54 = vpop.xlane.xlu1 %2202  ;;  %v2272_v21 = vmul.f32 %v5179_v3, %v5179_v3  ;;  %3302 = vmatpush3.bf16.msra.mxu1 %v3299_v49 }
 0x8c5   : > { %v2227_v41 = vmul.f32 0.03125, %v2203_v54  ;;  %v2201_v60 = vpop.xlane.xlu0 %2200  ;;  %2294 = vadd.xlane.f32.xlu1 %v2273_v48  ;;  %3304 = vmatprep.subr.bf16.mxu1 %v3303_v38 }
 0x8c6   : > { %v2226_v2 = vmul.f32 0.03125, %v2201_v60  ;;  %2292 = vadd.xlane.f32.xlu0 %v2272_v21  ;;  %v2439_v21 = vld [vmem:[%s5141_s22 + $0x70] sm:$0xff] }
 0x8c7   : > { %v2243_v62 = vsub.f32 %v5106_v33, %v2227_v41  ;;  %v2440_v41 = vld [vmem:[%s5141_s22 + $0x78] sm:$0xff]  ;;  %s2838_s22 = sshll.u32 %s5518_s27, 11 }
 0x8c8   : > { %v2242_v12 = vsub.f32 %v5108_v4, %v2226_v2  ;;  %3306 = vmatpush3.bf16.msra.mxu1 %v3303_v38  ;;  %v3315_v9 = vpack.c.bf16 %v2440_v41, %v2439_v21 }
 0x8c9   : > { %v5190_v32 = vmul.f32 %v4641_v0, %v2243_v62  ;;  %3308 = vmatprep.subr.bf16.mxu1 %v3307_v27 }
 0x8ca   : > { %v5195_v5 = vmul.f32 %v4641_v0, %v2242_v12 }
 0x8cb   : > { %v2275_v23 = vmul.f32 %v5190_v32, %v5190_v32 }
 0x8cc   : > { %v2207_v11 = vpop.xlane.xlu1 %2206  ;;  %v2274_v33 = vmul.f32 %v5195_v5, %v5195_v5  ;;  %3310 = vmatpush3.bf16.msra.mxu1 %v3307_v27 }
 0x8cd   : > { %v2229_v4 = vmul.f32 0.03125, %v2207_v11  ;;  %v2205_v58 = vpop.xlane.xlu0 %2204  ;;  %2298 = vadd.xlane.f32.xlu1 %v2275_v23  ;;  %3312 = vmatprep.subr.bf16.mxu1 %v3311_v29 }
 0x8ce   : > { %v2228_v40 = vmul.f32 0.03125, %v2205_v58  ;;  %2296 = vadd.xlane.f32.xlu0 %v2274_v33 }
 0x8cf   : > { %v2245_v20 = vsub.f32 %v5114_v52, %v2229_v4 }
 0x8d0   : > { %v2244_v61 = vsub.f32 %v5116_v30, %v2228_v40  ;;  %3314 = vmatpush3.bf16.msra.mxu1 %v3311_v29 }
 0x8d1   : > { %v5206_v35 = vmul.f32 %v4641_v0, %v2245_v20  ;;  %3316 = vmatprep.subr.bf16.mxu1 %v3315_v9 }
 0x8d2   : > { %v5211_v16 = vmul.f32 %v4641_v0, %v2244_v61 }
 0x8d3   : > { %v2277_v14 = vmul.f32 %v5206_v35, %v5206_v35 }
 0x8d4   : > { %v2211_v48 = vpop.xlane.xlu1 %2210  ;;  %v2276_v52 = vmul.f32 %v5211_v16, %v5211_v16  ;;  %3318 = vmatpush3.bf16.msra.mxu1 %v3315_v9 }
 0x8d5   : > { %v2231_v30 = vmul.f32 0.03125, %v2211_v48  ;;  %v2209_v54 = vpop.xlane.xlu0 %2208  ;;  %2302 = vadd.xlane.f32.xlu1 %v2277_v14 }
 0x8d6   : > { %v2230_v60 = vmul.f32 0.03125, %v2209_v54  ;;  %2300 = vadd.xlane.f32.xlu0 %v2276_v52 }
 0x8d7   : > { %v2247_v19 = vsub.f32 %v5122_v1, %v2231_v30 }
 0x8d8   : > { %v2246_v2 = vsub.f32 %v5124_v44, %v2230_v60 }
 0x8d9   : > { %v5222_v49 = vmul.f32 %v4641_v0, %v2247_v19 }
 0x8da   : > { %v5225_v62 = vmul.f32 %v4641_v0, %v2246_v2  ;;  %v5259_v2 = vld [vmem:[%s2184_s8] ss:$0 sm:$0xff]  ;;  %s5519_s8 = sld [smem:[#allocation31_spill]] }
 0x8db   : > { %v2279_v12 = vmul.f32 %v5222_v49, %v5222_v49 }
 0x8dc   : > { %v2215_v59 = vpop.xlane.xlu1 %2214  ;;  %v2278_v50 = vmul.f32 %v5225_v62, %v5225_v62 }
 0x8dd   : > { %v2233_v38 = vmul.f32 0.03125, %v2215_v59  ;;  %v2213_v23 = vpop.xlane.xlu0 %2212  ;;  %2306 = vadd.xlane.f32.xlu1 %v2279_v12 }
 0x8de   : > { %v2232_v1 = vmul.f32 0.03125, %v2213_v23  ;;  %2304 = vadd.xlane.f32.xlu0 %v2278_v50 }
 0x8df   : > { %v2249_v44 = vsub.f32 %v5128_v46, %v2233_v38 }
 0x8e0   : > { %v2248_v11 = vsub.f32 %v5130_v28, %v2232_v1  ;;  %s5387_s17 = scalar_lea.hbm %s5519_s8, %s2838_s22 }
 0x8e1   : > { %v5234_v33 = vmul.f32 %v4641_v0, %v2249_v44 }
 0x8e2   : > { %v5237_v4 = vmul.f32 %v4641_v0, %v2248_v11  ;;  %v5267_v11 = vld [vmem:[%s2186_s20] ss:$0 sm:$0xff]  ;;  %s3925_s20 = smov [#allocation11]  }
 0x8e3   : > { %v2281_v58 = vmul.f32 %v5234_v33, %v5234_v33  ;;  %s3813_s5 = sshll.u32 %s3925_s20, 4  ;;  %s3814_s5 = int_to_ptr.vmem [resolvable:$false] %s3813_s5 }
 0x8e4   : > { %v2219_v39 = vpop.xlane.xlu1 %2218  ;;  %v2280_v17 = vmul.f32 %v5237_v4, %v5237_v4  ;;  %s3815_s6 = scalar_lea.vmem %s3814_s5, 4096  ;;  %p3816_p7 = scmp.lt.s32.totalorder %s5389_s1, %s3814_s5 }
 0x8e5   : > { %v2235_v40 = vmul.f32 0.03125, %v2219_v39  ;;  %v2217_v27 = vpop.xlane.xlu0 %2216  ;;  %2310 = vadd.xlane.f32.xlu1 %v2281_v58  ;;  %p3817_p11 = scmp.lt.s32.totalorder %s3815_s6, %s3809_s10 }
 0x8e6   : > { %v2234_v20 = vmul.f32 0.03125, %v2217_v27  ;;  %2308 = vadd.xlane.f32.xlu0 %v2280_v17 }
 0x8e7   : > { %v2251_v46 = vsub.f32 %v5134_v6, %v2235_v40  ;;  %p3818_p1 = por %p3817_p11, %p3816_p7 }
 0x8e8   : > { %v2250_v28 = vsub.f32 %v5136_v43, %v2234_v20 }
 0x8e9   : > { %v5246_v61 = vmul.f32 %v4641_v0, %v2251_v46  ;;  %p3819_p12 = pnand %p3818_p1, %p3812_p5 }
 0x8ea   : > { %v5249_v63 = vmul.f32 %v4641_v0, %v2250_v28 }
 0x8eb   : > { %v2283_v31 = vmul.f32 %v5246_v61, %v5246_v61 }
 0x8ec   : > { %v2282_v29 = vmul.f32 %v5249_v63, %v5249_v63 }
 0x8ed   : > { %2314 = vadd.xlane.f32.xlu1 %v2283_v31 }
 0x8ee   : > { %2312 = vadd.xlane.f32.xlu0 %v2282_v29 }
 0x942   : > { %v2287_v14 = vpop.xlane.xlu1 %2286 }
 0x943   : > { %v2317_v48 = vmul.f32 0.03125, %v2287_v14  ;;  %v2285_v6 = vpop.xlane.xlu0 %2284 }
 0x944   : > { %v2316_v52 = vmul.f32 0.03125, %v2285_v6 }
 0x945   : > { %v2333_v43 = vadd.f32 1e-05, %v2317_v48 }
 0x946   : > { %v2332_v30 = vadd.f32 1e-05, %v2316_v52 }
 0x947   : > { %3603 = vrsqrt.f32 %v2333_v43 }
 0x948   : > { %3605 = vrsqrt.f32 %v2332_v30 }
 0x94a   : > { %v2291_v0 = vpop.xlane.xlu1 %2290 }
 0x94b   : > { %v2319_v54 = vmul.f32 0.03125, %v2291_v0  ;;  %v2289_v21 = vpop.xlane.xlu0 %2288 }
 0x94c   : > { %v2318_v41 = vmul.f32 0.03125, %v2289_v21 }
 0x94d   : > { %v2335_v60 = vadd.f32 1e-05, %v2319_v54 }
 0x94e   : > { %v2334_v9 = vadd.f32 1e-05, %v2318_v41 }
 0x94f   : > { %3607 = vrsqrt.f32 %v2335_v60 }
 0x950   : > { %3609 = vrsqrt.f32 %v2334_v9 }
 0x951   : > { %v3604_v19 = vpop.eup %3603 }
 0x952   : > { %v3606_v12 = vpop.eup %3605  ;;  %v2365_v59 = vmul.f32 %v3604_v19, %v5152_v7  ;;  %v2295_v50 = vpop.xlane.xlu1 %2294 }
 0x953   : > { %v2321_v38 = vmul.f32 0.03125, %v2295_v50  ;;  %v2293_v23 = vpop.xlane.xlu0 %2292  ;;  %v2364_v1 = vmul.f32 %v3606_v12, %v5155_v8 }
 0x954   : > { %v2320_v44 = vmul.f32 0.03125, %v2293_v23  ;;  %v2387_v58 = vmul.f32 %v5259_v2, %v2365_v59 }
 0x955   : > { %v2337_v39 = vadd.f32 1e-05, %v2321_v38  ;;  %v2386_v17 = vmul.f32 %v5259_v2, %v2364_v1 }
 0x956   : > { %v2336_v40 = vadd.f32 1e-05, %v2320_v44  ;;  %v2409_v7 = vadd.f32 %v5267_v11, %v2387_v58 }
 0x957   : > { %3611 = vrsqrt.f32 %v2337_v39  ;;  %v2408_v27 = vadd.f32 %v5267_v11, %v2386_v17 }
 0x958   : > { %3613 = vrsqrt.f32 %v2336_v40 }
 0x959   : > { %v3608_v20 = vpop.eup %3607  ;;  %3167 = vmatprep.mubr.f32.mxu1 %v2408_v27 }
 0x95a   : > { %v3610_v46 = vpop.eup %3609  ;;  %3168 = vmatmul.mubr.f32.vlgmr.msra.gmra.mrb[16].mxu1 %v2409_v7  ;;  %v2299_v8 = vpop.xlane.xlu1 %2298  ;;  %v2367_v28 = vmul.f32 %v3608_v20, %v5164_v13 }
 0x95b   : > { %v2323_v31 = vmul.f32 0.03125, %v2299_v8  ;;  %v2297_v29 = vpop.xlane.xlu0 %2296  ;;  %v2366_v14 = vmul.f32 %v3610_v46, %v5167_v47 }
 0x95c   : > { %v2322_v48 = vmul.f32 0.03125, %v2297_v29  ;;  %v2389_v6 = vmul.f32 %v5259_v2, %v2367_v28 }
 0x95d   : > { %v2339_v52 = vadd.f32 1e-05, %v2323_v31  ;;  %v2388_v43 = vmul.f32 %v5259_v2, %v2366_v14 }
 0x95e   : > { %v2338_v30 = vadd.f32 1e-05, %v2322_v48  ;;  %v2411_v54 = vadd.f32 %v5267_v11, %v2389_v6 }
 0x95f   : > { %3615 = vrsqrt.f32 %v2339_v52  ;;  %v2410_v0 = vadd.f32 %v5267_v11, %v2388_v43 }
 0x960   : > { %3617 = vrsqrt.f32 %v2338_v30 }
 0x961   : > { %v3612_v21 = vpop.eup %3611  ;;  %3170 = vmatprep.mubr.f32.mxu1 %v2410_v0 }
 0x962   : > { %v3614_v13 = vpop.eup %3613  ;;  %3171 = vmatmul.mubr.f32.gmra.mrb[18].mxu1 %v2411_v54  ;;  %v2303_v41 = vpop.xlane.xlu1 %2302  ;;  %v2369_v47 = vmul.f32 %v3612_v21, %v5176_v42 }
 0x963   : > { %v2325_v60 = vmul.f32 0.03125, %v2303_v41  ;;  %v2301_v9 = vpop.xlane.xlu0 %2300  ;;  %v2368_v19 = vmul.f32 %v3614_v13, %v5179_v3 }
 0x964   : > { %v2324_v12 = vmul.f32 0.03125, %v2301_v9  ;;  %v2391_v59 = vmul.f32 %v5259_v2, %v2369_v47 }
 0x965   : > { %v2341_v50 = vadd.f32 1e-05, %v2325_v60  ;;  %v2390_v38 = vmul.f32 %v5259_v2, %v2368_v19 }
 0x966   : > { %v2340_v23 = vadd.f32 1e-05, %v2324_v12  ;;  %v2413_v44 = vadd.f32 %v5267_v11, %v2391_v59 }
 0x967   : > { %3619 = vrsqrt.f32 %v2341_v50  ;;  %v2412_v1 = vadd.f32 %v5267_v11, %v2390_v38 }
 0x968   : > { %3621 = vrsqrt.f32 %v2340_v23 }
 0x969   : > { %v3616_v58 = vpop.eup %3615  ;;  %3173 = vmatprep.mubr.f32.mxu1 %v2412_v1 }
 0x96a   : > { %v3618_v42 = vpop.eup %3617  ;;  %3174 = vmatmul.mubr.f32.gmra.mrb[20].mxu1 %v2413_v44  ;;  %v2307_v39 = vpop.xlane.xlu1 %2306  ;;  %v2371_v3 = vmul.f32 %v3616_v58, %v5190_v32 }
 0x96b   : > { %v2327_v17 = vmul.f32 0.03125, %v2307_v39  ;;  %v2305_v40 = vpop.xlane.xlu0 %2304  ;;  %v2370_v27 = vmul.f32 %v3618_v42, %v5195_v5 }
 0x96c   : > { %v2326_v7 = vmul.f32 0.03125, %v2305_v40  ;;  %v2393_v20 = vmul.f32 %v5259_v2, %v2371_v3 }
 0x96d   : > { %v2343_v46 = vadd.f32 1e-05, %v2327_v17  ;;  %v2392_v8 = vmul.f32 %v5259_v2, %v2370_v27 }
 0x96e   : > { %v2342_v28 = vadd.f32 1e-05, %v2326_v7  ;;  %v2415_v29 = vadd.f32 %v5267_v11, %v2393_v20 }
 0x96f   : > { %3623 = vrsqrt.f32 %v2343_v46  ;;  %v2414_v31 = vadd.f32 %v5267_v11, %v2392_v8 }
 0x970   : > { %3625 = vrsqrt.f32 %v2342_v28 }
 0x971   : > { %v3620_v14 = vpop.eup %3619  ;;  %3176 = vmatprep.mubr.f32.mxu1 %v2414_v31 }
 0x972   : > { %v3622_v32 = vpop.eup %3621  ;;  %3177 = vmatmul.mubr.f32.gmra.mrb[22].mxu1 %v2415_v29  ;;  %v2311_v48 = vpop.xlane.xlu1 %2310  ;;  %v2373_v5 = vmul.f32 %v3620_v14, %v5206_v35 }
 0x973   : > { %v2329_v6 = vmul.f32 0.03125, %v2311_v48  ;;  %v2309_v52 = vpop.xlane.xlu0 %2308  ;;  %v2372_v43 = vmul.f32 %v3622_v32, %v5211_v16 }
 0x974   : > { %v2328_v30 = vmul.f32 0.03125, %v2309_v52  ;;  %v2395_v0 = vmul.f32 %v5259_v2, %v2373_v5  ;;  %v3651_v5 = vld [vmem:[%s4295_s23 + $0x8] sm:$0xff]  ;;  %v3652_v52 = vld [vmem:[%s4295_s23] sm:$0xff] }
 0x975   : > { %v2345_v54 = vadd.f32 1e-05, %v2329_v6  ;;  %v2394_v21 = vmul.f32 %v5259_v2, %v2372_v43 }
 0x976   : > { %v2344_v13 = vadd.f32 1e-05, %v2328_v30  ;;  %v2417_v47 = vadd.f32 %v5267_v11, %v2395_v0 }
 0x977   : > { %3627 = vrsqrt.f32 %v2345_v54  ;;  %v2416_v41 = vadd.f32 %v5267_v11, %v2394_v21 }
 0x978   : > { %3629 = vrsqrt.f32 %v2344_v13  ;;  %v3653_v13 = vld [vmem:[%s4295_s23 + $0x18] sm:$0xff] }
 0x979   : > { %v3624_v60 = vpop.eup %3623  ;;  %3179 = vmatprep.mubr.f32.mxu1 %v2416_v41 }
 0x97a   : > { %v3626_v35 = vpop.eup %3625  ;;  %3180 = vmatmul.mubr.f32.gmra.mrb[24].mxu1 %v2417_v47  ;;  %v2315_v9 = vpop.xlane.xlu1 %2314  ;;  %v2375_v16 = vmul.f32 %v3624_v60, %v5222_v49  ;;  %v3654_v47 = vld [vmem:[%s4295_s23 + $0x10] sm:$0xff] }
 0x97b   : > { %v2331_v19 = vmul.f32 0.03125, %v2315_v9  ;;  %v2313_v12 = vpop.xlane.xlu0 %2312  ;;  %v2374_v59 = vmul.f32 %v3626_v35, %v5225_v62 }
 0x97c   : > { %v2330_v50 = vmul.f32 0.03125, %v2313_v12  ;;  %v2397_v38 = vmul.f32 %v5259_v2, %v2375_v16  ;;  %v3655_v12 = vld [vmem:[%s4295_s23 + $0x28] sm:$0xff] }
 0x97d   : > { %v2347_v23 = vadd.f32 1e-05, %v2331_v19  ;;  %v2396_v1 = vmul.f32 %v5259_v2, %v2374_v59 }
 0x97e   : > { %v2346_v44 = vadd.f32 1e-05, %v2330_v50  ;;  %v2419_v42 = vadd.f32 %v5267_v11, %v2397_v38  ;;  %v3656_v50 = vld [vmem:[%s4295_s23 + $0x20] sm:$0xff] }
 0x97f   : > { %3631 = vrsqrt.f32 %v2347_v23  ;;  %v2418_v58 = vadd.f32 %v5267_v11, %v2396_v1 }
 0x980   : > { %3633 = vrsqrt.f32 %v2346_v44 }
 0x981   : > { %v3628_v39 = vpop.eup %3627  ;;  %3182 = vmatprep.mubr.f32.mxu1 %v2418_v58 }
 0x982   : > { %v3630_v49 = vpop.eup %3629  ;;  %3183 = vmatmul.mubr.f32.gmra.mrb[26].mxu1 %v2419_v42  ;;  %v2377_v3 = vmul.f32 %v3628_v39, %v5234_v33  ;;  %v3657_v42 = vld [vmem:[%s4295_s23 + $0x38] sm:$0xff] }
 0x983   : > { %v2376_v62 = vmul.f32 %v3630_v49, %v5237_v4  ;;  %v3658_v49 = vld [vmem:[%s4295_s23 + $0x30] sm:$0xff] }
 0x984   : > { %v2399_v17 = vmul.f32 %v5259_v2, %v2377_v3 }
 0x985   : > { %v2398_v40 = vmul.f32 %v5259_v2, %v2376_v62 }
 0x986   : > { %v2421_v7 = vadd.f32 %v5267_v11, %v2399_v17 }
 0x987   : > { %v2420_v27 = vadd.f32 %v5267_v11, %v2398_v40 }
 0x989   : > { %v3632_v20 = vpop.eup %3631  ;;  %3185 = vmatprep.mubr.f32.mxu1 %v2420_v27 }
 0x98a   : > { %v3634_v46 = vpop.eup %3633  ;;  %3186 = vmatmul.mubr.f32.gmra.mrb[28].mxu1 %v2421_v7  ;;  %v2379_v8 = vmul.f32 %v3632_v20, %v5246_v61  ;;  %v5319_v61 = vld [vmem:[%s2441_s12] ss:$0 sm:$0xff]  ;;  %v3659_v7 = vld [vmem:[%s4295_s23 + $0x48] sm:$0xff] }
 0x98b   : > { %v2378_v33 = vmul.f32 %v3634_v46, %v5249_v63  ;;  %v3660_v46 = vld [vmem:[%s4295_s23 + $0x40] sm:$0xff] }
 0x98c   : > { %v2401_v4 = vmul.f32 %v5259_v2, %v2379_v8 }
 0x98d   : > { %v2400_v28 = vmul.f32 %v5259_v2, %v2378_v33 }
 0x98e   : > { %v2423_v29 = vadd.f32 %v5267_v11, %v2401_v4 }
 0x98f   : > { %v2422_v31 = vadd.f32 %v5267_v11, %v2400_v28 }
 0x991   : > { %3188 = vmatprep.mubr.f32.mxu1 %v2422_v31 }
 0x992   : > { %3189 = vmatmul.mubr.f32.gmra.mrb[30].mxu1 %v2423_v29  ;;  %v3661_v29 = vld [vmem:[%s4295_s23 + $0x58] sm:$0xff] }
 0xa2d   : > { %v3169_v63 = vpop.f32.mrb[16].mxu1 }
 0xa2e   : > { %v2521_v14 = vadd.f32 %v3169_v63, %v5319_v61  ;;  %v2515_v32 = vpop.f32.mrb[17].mxu1 }
 0xa2f   : > { %v2516_v2 = vadd.f32 %v5319_v61, %v2515_v32 }
 0xa30   : > { %v2595_v48 = vadd.f32 %v2521_v14, %v4822_v37  ;;  %v3662_v14 = vld [vmem:[%s4295_s23 + $0x50] sm:$0xff] }
 0xa31   : > { %v2594_v11 = vadd.f32 %v2516_v2, %v4817_v34 }
 0xa32   : > { %v2611_v6 = vadd.f32 %v3651_v5, %v2595_v48 }
 0xa33   : > { %v2610_v43 = vadd.f32 %v3652_v52, %v2594_v11 }
 0xa34   : > { %2627 = vst [vmem:[%s4295_s23 + $0x8] sm:$0xff] %v2611_v6  ;;  %v3663_v6 = vld [vmem:[%s4295_s23 + $0x68] sm:$0xff] }
 0xa35   : > { %2626 = vst [vmem:[%s4295_s23] sm:$0xff] %v2610_v43  ;;  %v3172_v30 = vpop.f32.mrb[18].mxu1  ;;  %v3664_v43 = vld [vmem:[%s4295_s23 + $0x60] sm:$0xff] }
 0xa36   : > { %v2531_v0 = vadd.f32 %v3172_v30, %v5319_v61  ;;  %v2525_v54 = vpop.f32.mrb[19].mxu1 }
 0xa37   : > { %v2526_v21 = vadd.f32 %v5319_v61, %v2525_v54 }
 0xa38   : > { %v2597_v37 = vadd.f32 %v2531_v0, %v4832_v55 }
 0xa39   : > { %v2596_v34 = vadd.f32 %v2526_v21, %v4827_v26 }
 0xa3a   : > { %v2613_v41 = vadd.f32 %v3653_v13, %v2597_v37 }
 0xa3b   : > { %v2612_v60 = vadd.f32 %v3654_v47, %v2596_v34  ;;  %v3665_v34 = vld [vmem:[%s4295_s23 + $0x78] sm:$0xff] }
 0xa3c   : > { %2629 = vst [vmem:[%s4295_s23 + $0x18] sm:$0xff] %v2613_v41 }
 0xa3d   : > { %2628 = vst [vmem:[%s4295_s23 + $0x10] sm:$0xff] %v2612_v60  ;;  %v3175_v35 = vpop.f32.mrb[20].mxu1 }
 0xa3e   : > { %v2541_v9 = vadd.f32 %v3175_v35, %v5319_v61  ;;  %v2535_v16 = vpop.f32.mrb[21].mxu1 }
 0xa3f   : > { %v2536_v19 = vadd.f32 %v5319_v61, %v2535_v16 }
 0xa40   : > { %v2599_v55 = vadd.f32 %v2541_v9, %v4842_v51 }
 0xa41   : > { %v2598_v26 = vadd.f32 %v2536_v19, %v4837_v45 }
 0xa42   : > { %v2615_v59 = vadd.f32 %v3655_v12, %v2599_v55 }
 0xa43   : > { %v2614_v38 = vadd.f32 %v3656_v50, %v2598_v26 }
 0xa44   : > { %2631 = vst [vmem:[%s4295_s23 + $0x28] sm:$0xff] %v2615_v59 }
 0xa45   : > { %2630 = vst [vmem:[%s4295_s23 + $0x20] sm:$0xff] %v2614_v38  ;;  %v3178_v23 = vpop.f32.mrb[22].mxu1 }
 0xa46   : > { %v2551_v1 = vadd.f32 %v3178_v23, %v5319_v61  ;;  %v2545_v44 = vpop.f32.mrb[23].mxu1 }
 0xa47   : > { %v2546_v58 = vadd.f32 %v5319_v61, %v2545_v44 }
 0xa48   : > { %v2601_v51 = vadd.f32 %v2551_v1, %v4852_v36 }
 0xa49   : > { %v2600_v45 = vadd.f32 %v2546_v58, %v4847_v53 }
 0xa4a   : > { %v2617_v39 = vadd.f32 %v3657_v42, %v2601_v51 }
 0xa4b   : > { %v2616_v3 = vadd.f32 %v3658_v49, %v2600_v45 }
 0xa4c   : > { %2633 = vst [vmem:[%s4295_s23 + $0x38] sm:$0xff] %v2617_v39 }
 0xa4d   : > { %2632 = vst [vmem:[%s4295_s23 + $0x30] sm:$0xff] %v2616_v3  ;;  %v3181_v62 = vpop.f32.mrb[24].mxu1 }
 0xa4e   : > { %v2561_v17 = vadd.f32 %v3181_v62, %v5319_v61  ;;  %v2555_v40 = vpop.f32.mrb[25].mxu1 }
 0xa4f   : > { %v2556_v27 = vadd.f32 %v5319_v61, %v2555_v40 }
 0xa50   : > { %v2603_v36 = vadd.f32 %v2561_v17, %v4862_v56 }
 0xa51   : > { %v2602_v53 = vadd.f32 %v2556_v27, %v4857_v57 }
 0xa52   : > { %v2619_v20 = vadd.f32 %v3659_v7, %v2603_v36 }
 0xa53   : > { %v2618_v8 = vadd.f32 %v3660_v46, %v2602_v53 }
 0xa54   : > { %2635 = vst [vmem:[%s4295_s23 + $0x48] sm:$0xff] %v2619_v20 }
 0xa55   : > { %2634 = vst [vmem:[%s4295_s23 + $0x40] sm:$0xff] %v2618_v8  ;;  %v3184_v33 = vpop.f32.mrb[26].mxu1 }
 0xa56   : > { %v2571_v4 = vadd.f32 %v3184_v33, %v5319_v61  ;;  %v2565_v28 = vpop.f32.mrb[27].mxu1 }
 0xa57   : > { %v2566_v31 = vadd.f32 %v5319_v61, %v2565_v28 }
 0xa58   : > { %v2605_v56 = vadd.f32 %v2571_v4, %v4872_v15 }
 0xa59   : > { %v2604_v57 = vadd.f32 %v2566_v31, %v4867_v10 }
 0xa5a   : > { %v2621_v63 = vadd.f32 %v3661_v29, %v2605_v56 }
 0xa5b   : > { %v2620_v32 = vadd.f32 %v3662_v14, %v2604_v57 }
 0xa5c   : > { %2637 = vst [vmem:[%s4295_s23 + $0x58] sm:$0xff] %v2621_v63 }
 0xa5d   : > { %2636 = vst [vmem:[%s4295_s23 + $0x50] sm:$0xff] %v2620_v32  ;;  %v3187_v2 = vpop.f32.mrb[28].mxu1 }
 0xa5e   : > { %v2581_v48 = vadd.f32 %v3187_v2, %v5319_v61  ;;  %v2575_v11 = vpop.f32.mrb[29].mxu1 }
 0xa5f   : > { %v2576_v5 = vadd.f32 %v5319_v61, %v2575_v11 }
 0xa60   : > { %v2607_v15 = vadd.f32 %v2581_v48, %v4882_v18 }
 0xa61   : > { %v2606_v10 = vadd.f32 %v2576_v5, %v4877_v22 }
 0xa62   : > { %v2623_v52 = vadd.f32 %v3663_v6, %v2607_v15 }
 0xa63   : > { %v2622_v30 = vadd.f32 %v3664_v43, %v2606_v10 }
 0xa64   : > { %2639 = vst [vmem:[%s4295_s23 + $0x68] sm:$0xff] %v2623_v52 }
 0xa65   : > { %2638 = vst [vmem:[%s4295_s23 + $0x60] sm:$0xff] %v2622_v30  ;;  %v3190_v0 = vpop.f32.mrb[30].mxu1 }
 0xa66   : > { %v2591_v54 = vadd.f32 %v3190_v0, %v5319_v61  ;;  %v2585_v21 = vpop.f32.mrb[31].mxu1 }
 0xa67   : > { %v2586_v37 = vadd.f32 %v5319_v61, %v2585_v21  ;;  %v3666_v61 = vld [vmem:[%s4295_s23 + $0x70] sm:$0xff] }
 0xa68   : > { %v2609_v22 = vadd.f32 %v2591_v54, %v4892_v24 }
 0xa69   : > { %v2608_v18 = vadd.f32 %v2586_v37, %v4887_v25 }
 0xa6a   : > { %v2625_v13 = vadd.f32 %v3665_v34, %v2609_v22 }
 0xa6b   : > { %v2624_v41 = vadd.f32 %v3666_v61, %v2608_v18 }
 0xa6c   : > { %2641 = vst [vmem:[%s4295_s23 + $0x78] sm:$0xff] %v2625_v13 }
 0xa6d   : > { %2640 = vst [vmem:[%s4295_s23 + $0x70] sm:$0xff] %v2624_v41 }
 0xa6e   : > { %3822 = shalt.err (!%p3819_p12)
}
 0xa6f   : > { %s3823_s23 = scalar_lea.hbm %s5387_s17, 2048  ;;  %s3827_s27 = scalar_lea.hbm %s5519_s8, 4096 }
 0xa70   : > { %p3824_p2 = scmp.ne.s32.totalorder %s5387_s17, %s3823_s23  ;;  %p3828_p4 = scmp.lt.u32.totalorder %s5387_s17, %s5519_s8 }
 0xa71   : > { %p3829_p9 = scmp.lt.u32.totalorder %s3827_s27, %s3823_s23  ;;  %p3831_p0 = scmp.lt.u32.totalorder %s3823_s23, %s5387_s17 }
 0xa72   : > { %p3825_p8 = pnand %p3824_p2, %p4216_p3 }
 0xa73   : > { %p3830_p6 = por %p3829_p9, %p3828_p4 }
 0xa74   : > { %p3826_p13 = pneg %p3825_p8 }
 0xa75   : > { %p3832_p10 = por %p3831_p0, %p3830_p6 }
 0xa77   : > { %p3833_p5 = pnand %p3832_p10, %p3826_p13 }
 0xa79   : > { %3836 = shalt.err (!%p3833_p5)
}
 0xa7a   : > { %s3926_s28 = smov 128   ;;  %s3927_s10 = smov 8  }
 0xa7b   : > { %3337 = dma.vmem_to_hbm [thread:$0]  (%p4216_p3), %s5389_s1, 2048, %s5387_s17, %s2643_s18, %s3926_s28, %s3926_s28, %s3927_s10  }
 0xa7c PF: > { %s5520_s20 = sld [smem:[#allocation16_spill]]  ;;  %s5521_s5 = sld [smem:[#allocation18_spill]] }
 0xa7d   : > { %p3369_p7 = scmp.ge.s32.totalorder %s3915_s30, 2 }
 0xa82   : > { %s2671_s6 = sand.u32 1, %s5520_s20   ;;  %p5522_p11 = scmp.ne.s32.totalorder %s5521_s5, 0 }
 0xa83   : > { %s2672_s23 = scalar_lea.sflag [#allocation4], %s2671_s6 }
 0xa84   : > { %p3357_p1 = pnand %p3369_p7, %p5522_p11 }
 0xa86   : > { %3882 = dma.done.wait (!%p3357_p1), %s2672_s23, 2048  }
 0xa87   : > { %3884 = vsyncadd (!%p3357_p1), %s2672_s23, 4294965248  ;;  %s35_s30 = sadd.s32 1, %s3915_s30   ;;  %s5523_s24 = smov %s3891_s25 }
 0xa88   : > { %p32_p12 = scmp.ge.s32.totalorder %s35_s30, 6   ;;  %s5524_s25 = smov %s3895_s26 }
 0xa89   : > { %s5525_s26 = smov %s4239_s13  ;;  %s5526_s27 = smov %s3907_s29 }
 0xa8a   : > { %s5527_s28 = smov %s3911_s0  ;;  %s5528_s29 = smov %s5531_s9 }
 0xa8b   : > { %s5529_s0 = smov %s5535_s19  ;;  %34 = sbr.rel (!%p32_p12) target bundleno = 23 (0x17), region = 169 }
 0xa92   :  { %2677 = vsyncpa [#allocation3], 1 }
 0xa93   :  { %2679 = vsyncpa [#allocation3 + $0x1], 1 }
 0xa94   :  { %2680 = vsyncpa [#allocation6], 1 }
 0xa95   :  { %2681 = vsyncpa [#allocation9], 1 }
 0xa96   :  { %2682 = vsyncpa [#allocation4], 1 }
 0xa97   :  { %2684 = vsyncpa [#allocation4 + $0x1], 1 }

</bundles_post_ra>
